<compile_context>
chip_gen: v7x
topology: tpu7x:2x2x1
jax: 0.10.0
libtpu: 0.0.40
codegen_flags: <defaults>
</compile_context>

<pallas_src>
import functools
import math

import jax
import jax.numpy as jnp
from jax.experimental import pallas as pl
from jax.experimental.pallas import tpu as pltpu


def _full_spec(shape):
    """BlockSpec covering the whole array (grid=(1,))."""
    nd = len(shape)
    return pl.BlockSpec(tuple(shape), lambda i, _n=nd: (0,) * _n)


# ----------------------------------------------------------------------------
# Single fused kernel: encoder LSTM -> heads -> sample z -> decoder linear
#                      -> decoder LSTM -> conv1d head.
# Gate order (PyTorch): i, f, g, o.
# ----------------------------------------------------------------------------
def _vae_fused_kernel(x_ref, eps_ref,
                      e_wih0, e_whh0, e_b0,
                      e_wih1, e_whh1, e_b1,
                      head_w, head_b,
                      dlin_w, dlin_b,
                      d_wih0, d_whh0, d_b0,
                      d_wih1, d_whh1, d_b1,
                      conv_m, conv_b,
                      stats_ref, conv_ref,
                      *, T, B, H, L):
    f32 = jnp.float32

    def lstm_layer(gate_in, whh_ref, collect_seq, time_major):
        """One LSTM layer over T steps.

        gate_in: hoisted x @ W_ih^T + (b_ih + b_hh), either (T*B, 4H) with rows
                 [t*B:(t+1)*B] = time t, or (B, 4H) when the input is constant
                 over time (decoder layer 0).
        Only one lane-dense (H,4H) matmul, 2 full-width EUP ops, tanh(c) and a
        few VPU ops remain on the serial recurrent path.
        """
        w_hh = whh_ref[...]                                   # (H, 4H), read once
        h = jnp.zeros((B, H), f32)
        c = jnp.zeros((B, H), f32)
        hs = []
        for t in range(T):                                    # static unrolled loop
            xg = gate_in[t * B:(t + 1) * B, :] if time_major else gate_in
            g = xg + jnp.dot(h, w_hh, preferred_element_type=f32)   # (B, 4H)
            sg = jax.nn.sigmoid(g)                            # one full-width EUP pass
            tg = jnp.tanh(g)                                  # one full-width EUP pass
            i_g = sg[:, 0 * H:1 * H]
            f_g = sg[:, 1 * H:2 * H]
            g_g = tg[:, 2 * H:3 * H]
            o_g = sg[:, 3 * H:4 * H]
            c = f_g * c + i_g * g_g
            h = o_g * jnp.tanh(c)
            if collect_seq:
                hs.append(h)
        return h, hs

    # ---------------- Encoder (2-layer LSTM) ----------------
    p0 = jnp.dot(x_ref[...], e_wih0[...], preferred_element_type=f32) + e_b0[...]
    _, hs0 = lstm_layer(p0, e_whh0, collect_seq=True, time_major=True)
    seq0 = jnp.concatenate(hs0, axis=0)                                   # (T*B, H)
    p1 = jnp.dot(seq0, e_wih1[...], preferred_element_type=f32) + e_b1[...]
    h_last, _ = lstm_layer(p1, e_whh1, collect_seq=False, time_major=True)  # h_n[-1]

    # -------- heads + reparameterize + decoder input linear --------
    stats = jnp.dot(h_last, head_w[...], preferred_element_type=f32) + head_b[...]
    stats_ref[...] = stats                                   # [mean | log_var], (B, 2L)
    mean = stats[:, 0:L]
    log_var = stats[:, L:2 * L]
    z = mean + jnp.exp(0.5 * log_var) * eps_ref[...]
    d = jnp.maximum(
        jnp.dot(z, dlin_w[...], preferred_element_type=f32) + dlin_b[...], 0.0)

    # ---------------- Decoder (2-layer LSTM) ----------------
    # Layer-0 input is constant over time: project exactly once.
    dg0 = jnp.dot(d, d_wih0[...], preferred_element_type=f32) + d_b0[...]  # (B, 4H)
    _, dhs0 = lstm_layer(dg0, d_whh0, collect_seq=True, time_major=False)
    dseq0 = jnp.concatenate(dhs0, axis=0)                                  # (T*B, H)
    dp1 = jnp.dot(dseq0, d_wih1[...], preferred_element_type=f32) + d_b1[...]
    _, dhs1 = lstm_layer(dp1, d_whh1, collect_seq=True, time_major=True)

    # ---------------- Conv1d head, fused as one lane-dense matmul ----------------
    # dec_wide[b, t*H + h] = decoder layer-1 hidden at step t, batch b.
    # conv_m encodes raw-reshape(B,T,H)->(B,H,T) + pad(1) + conv1d(k=3) +
    # raw-reshape(B,O,T)->flat, so conv_ref row b is the flattened final output.
    dec_wide = jnp.concatenate(dhs1, axis=1)                               # (B, T*H)
    conv_ref[...] = (jnp.dot(dec_wide, conv_m[...], preferred_element_type=f32)
                     + conv_b[...])


def _vae_fused(x2d, eps, kp, *, T, B, H, L, P):
    inputs = [x2d, eps,
              kp["e_wih0"], kp["e_whh0"], kp["e_b0"],
              kp["e_wih1"], kp["e_whh1"], kp["e_b1"],
              kp["head_w"], kp["head_b"],
              kp["dlin_w"], kp["dlin_b"],
              kp["d_wih0"], kp["d_whh0"], kp["d_b0"],
              kp["d_wih1"], kp["d_whh1"], kp["d_b1"],
              kp["conv_m"], kp["conv_b"]]
    kernel = functools.partial(_vae_fused_kernel, T=T, B=B, H=H, L=L)
    return pl.pallas_call(
        kernel,
        out_shape=(jax.ShapeDtypeStruct((B, 2 * L), jnp.float32),
                   jax.ShapeDtypeStruct((B, P), jnp.float32)),
        grid=(1,),
        in_specs=[_full_spec(a.shape) for a in inputs],
        out_specs=(_full_spec((B, 2 * L)), _full_spec((B, P))),
        compiler_params=pltpu.CompilerParams(
            dimension_semantics=("arbitrary",)),
    )(*inputs)


# ----------------------------------------------------------------------------
# Parameter init (deterministic, PyTorch-like uniform(-1/sqrt(fan), 1/sqrt(fan)))
# ----------------------------------------------------------------------------
def _uniform(key, shape, fan_in):
    k = 1.0 / math.sqrt(fan_in)
    return jax.random.uniform(key, shape, jnp.float32, minval=-k, maxval=k)


def init_params(key, latent_dim, n_units, num_joints):
    feat = num_joints * 3
    H = n_units
    keys = iter(jax.random.split(key, 32))
    p = {}
    for layer, d_in in [(0, feat), (1, H)]:               # encoder LSTM
        p[f"enc_l{layer}_wih"] = _uniform(next(keys), (4 * H, d_in), H)
        p[f"enc_l{layer}_whh"] = _uniform(next(keys), (4 * H, H), H)
        p[f"enc_l{layer}_bih"] = _uniform(next(keys), (4 * H,), H)
        p[f"enc_l{layer}_bhh"] = _uniform(next(keys), (4 * H,), H)
    p["enc_mean_w"] = _uniform(next(keys), (latent_dim, H), H)
    p["enc_mean_b"] = _uniform(next(keys), (latent_dim,), H)
    p["enc_lv_w"] = _uniform(next(keys), (latent_dim, H), H)
    p["enc_lv_b"] = _uniform(next(keys), (latent_dim,), H)
    p["dec_lin_w"] = _uniform(next(keys), (H, latent_dim), latent_dim)
    p["dec_lin_b"] = _uniform(next(keys), (H,), latent_dim)
    for layer in (0, 1):                                   # decoder LSTM
        p[f"dec_l{layer}_wih"] = _uniform(next(keys), (4 * H, H), H)
        p[f"dec_l{layer}_whh"] = _uniform(next(keys), (4 * H, H), H)
        p[f"dec_l{layer}_bih"] = _uniform(next(keys), (4 * H,), H)
        p[f"dec_l{layer}_bhh"] = _uniform(next(keys), (4 * H,), H)
    p["dec_conv_w"] = _uniform(next(keys), (feat, H, 3), H * 3)
    p["dec_conv_b"] = _uniform(next(keys), (feat,), H * 3)
    return p


def _prepare_kernel_params(p, T):
    """PyTorch-layout params -> kernel layouts (transposed / fused / padded)."""
    def lstm_pack(prefix):
        wih = p[f"{prefix}_wih"]                               # (4H, D)
        whh = p[f"{prefix}_whh"]                               # (4H, H)
        bias = (p[f"{prefix}_bih"] + p[f"{prefix}_bhh"]).reshape(1, -1)
        # Keep W_hh as ONE (H, 4H) matrix -> single lane-dense matmul per step.
        return jnp.transpose(wih), jnp.transpose(whh), bias

    kp = {}
    kp["e_wih0"], kp["e_whh0"], kp["e_b0"] = lstm_pack("enc_l0")
    kp["e_wih1"], kp["e_whh1"], kp["e_b1"] = lstm_pack("enc_l1")
    kp["d_wih0"], kp["d_whh0"], kp["d_b0"] = lstm_pack("dec_l0")
    kp["d_wih1"], kp["d_whh1"], kp["d_b1"] = lstm_pack("dec_l1")

    # Fused mean/log_var heads: (H, 2L) and (1, 2L)
    kp["head_w"] = jnp.transpose(
        jnp.concatenate([p["enc_mean_w"], p["enc_lv_w"]], axis=0))
    kp["head_b"] = jnp.concatenate(
        [p["enc_mean_b"], p["enc_lv_b"]], axis=0).reshape(1, -1)

    kp["dlin_w"] = jnp.transpose(p["dec_lin_w"])               # (L, H)
    kp["dlin_b"] = p["dec_lin_b"].reshape(1, -1)

    # Conv1d(k=3, p=1) + the PyTorch raw reshapes around it, folded into one
    # (T*H, T*O) linear map acting on the flattened per-batch decoder sequence:
    #   out_flat[p] = bias[p//T] + sum_q dec_flat[q] * M[q, p]
    #   M[c*T+s, o*T+t'] = W[o, c, s-t'+1]   if 0 <= s-t'+1 < 3 else 0
    W = p["dec_conv_w"]                                        # (O, C, 3)
    bcv = p["dec_conv_b"]                                      # (O,)
    O, C, K = W.shape
    band = jnp.stack([jnp.eye(T, dtype=jnp.float32, k=1 - kk) for kk in range(K)])
    m4 = jnp.einsum("ock,kst->csot", W, band)                  # (C, T, O, T)
    m_big = m4.reshape(C * T, O * T)                           # (T*H, T*O)
    bias_flat = jnp.repeat(bcv, T)                             # (T*O,)
    P = ((O * T + 127) // 128) * 128                           # lane-dense output width
    kp["conv_m"] = jnp.pad(m_big, ((0, 0), (0, P - O * T)))
    kp["conv_b"] = jnp.pad(bias_flat, (0, P - O * T)).reshape(1, P)
    return kp, P


# ----------------------------------------------------------------------------
# Full VAELSTM forward
# ----------------------------------------------------------------------------
def vae_lstm_forward(x, params, eps, seq_len, num_joints):
    B, T, J, _ = x.shape
    assert T == seq_len and J == num_joints
    F = J * 3
    H = params["enc_l0_whh"].shape[1]
    L = params["enc_mean_w"].shape[0]
    O = F

    kp, P = _prepare_kernel_params(params, T)

    # Time-major, batch-flattened input: row t*B+b = x[b, t, :].
    x2d = jnp.transpose(x.reshape(B, T, F), (1, 0, 2)).reshape(T * B, F)
    x2d = x2d.astype(jnp.float32)

    stats, conv_flat = _vae_fused(x2d, eps.astype(jnp.float32), kp,
                                  T=T, B=B, H=H, L=L, P=P)
    mean = stats[:, :L]
    log_var = stats[:, L:]
    # conv_flat row b is already the row-major flatten of the PyTorch (O, T)
    # conv output, so the final torch raw reshape is a plain reshape here.
    out = conv_flat[:, :O * T].reshape(B, T, J, 3)
    return out, mean, log_var


# ----------------------------------------------------------------------------
# Pure-JAX reference (mirrors the PyTorch module op-for-op) for validation.
# ----------------------------------------------------------------------------
def _ref_forward(x, params, eps):
    B, T, J, _ = x.shape
    F = J * 3
    H = params["enc_l0_whh"].shape[1]
    xf = x.reshape(B, T, F)

    def lstm2(seq, prefix):
        outs = seq
        h_last = None
        for layer in (0, 1):
            wih = params[f"{prefix}_l{layer}_wih"]
            whh = params[f"{prefix}_l{layer}_whh"]
            b = params[f"{prefix}_l{layer}_bih"] + params[f"{prefix}_l{layer}_bhh"]
            h = jnp.zeros((B, H), jnp.float32)
            c = jnp.zeros((B, H), jnp.float32)
            ys = []
            for t in range(T):
                g = outs[:, t, :] @ wih.T + h @ whh.T + b
                i = jax.nn.sigmoid(g[:, :H])
                f = jax.nn.sigmoid(g[:, H:2 * H])
                gg = jnp.tanh(g[:, 2 * H:3 * H])
                o = jax.nn.sigmoid(g[:, 3 * H:])
                c = f * c + i * gg
                h = o * jnp.tanh(c)
                ys.append(h)
            outs = jnp.stack(ys, axis=1)
            h_last = h
        return outs, h_last

    _, h_n = lstm2(xf, "enc")
    mean = h_n @ params["enc_mean_w"].T + params["enc_mean_b"]
    log_var = h_n @ params["enc_lv_w"].T + params["enc_lv_b"]
    z = mean + jnp.exp(0.5 * log_var) * eps
    d = jax.nn.relu(z @ params["dec_lin_w"].T + params["dec_lin_b"])
    dseq = jnp.repeat(d[:, None, :], T, axis=1)
    lstm_out, _ = lstm2(dseq, "dec")
    lo = lstm_out.reshape(B, H, T)                             # PyTorch raw reshape
    lo_pad = jnp.pad(lo, ((0, 0), (0, 0), (1, 1)))
    W = params["dec_conv_w"]
    stacked = jnp.stack([lo_pad[:, :, k:k + T] for k in range(3)], axis=-1)
    conv = (jnp.einsum("ock,bctk->bot", W, stacked)
            + params["dec_conv_b"][None, :, None])             # (B, O, T)
    out = conv.reshape(B, T, J, 3)                             # PyTorch raw reshape
    return out, mean, log_var


# ----------------------------------------------------------------------------
if __name__ == "__main__":
    # reduced_joints=True -> 18 joints, feature dim = 54
    B, T, J = 2, 8, 18
    latent_dim, n_units = 16, 32

    key = jax.random.PRNGKey(0)
    k_param, k_x, k_eps = jax.random.split(key, 3)

    params = init_params(k_param, latent_dim, n_units, J)
    x = jax.random.normal(k_x, (B, T, J, 3), jnp.float32)
    eps = jax.random.normal(k_eps, (B, latent_dim), jnp.float32)

    fwd = jax.jit(functools.partial(vae_lstm_forward, seq_len=T, num_joints=J))
    out, mean, log_var = fwd(x, params, eps)
    jax.block_until_ready((out, mean, log_var))

    assert out.shape == (B, T, J, 3)
    assert mean.shape == (B, latent_dim)
    assert log_var.shape == (B, latent_dim)
    assert bool(jnp.all(jnp.isfinite(out)))
    assert bool(jnp.all(jnp.isfinite(mean)))
    assert bool(jnp.all(jnp.isfinite(log_var)))

    ref_out, ref_mean, ref_lv = _ref_forward(x, params, eps)
    assert bool(jnp.allclose(mean, ref_mean, atol=5e-3, rtol=1e-2))
    assert bool(jnp.allclose(log_var, ref_lv, atol=5e-3, rtol=1e-2))
    assert bool(jnp.allclose(out, ref_out, atol=5e-3, rtol=1e-2))

    print("KERNEL_OK")
</pallas_src>

<mosaic_0001>
module attributes {stable_mosaic.version = 11 : i64} {
  func.func @_vae_fused_kernel(%arg0: i32, %arg1: memref<16x54xf32, #tpu.memory_space<vmem>>, %arg2: memref<2x16xf32, #tpu.memory_space<vmem>>, %arg3: memref<54x128xf32, #tpu.memory_space<vmem>>, %arg4: memref<32x128xf32, #tpu.memory_space<vmem>>, %arg5: memref<1x128xf32, #tpu.memory_space<vmem>>, %arg6: memref<32x128xf32, #tpu.memory_space<vmem>>, %arg7: memref<32x128xf32, #tpu.memory_space<vmem>>, %arg8: memref<1x128xf32, #tpu.memory_space<vmem>>, %arg9: memref<32x32xf32, #tpu.memory_space<vmem>>, %arg10: memref<1x32xf32, #tpu.memory_space<vmem>>, %arg11: memref<16x32xf32, #tpu.memory_space<vmem>>, %arg12: memref<1x32xf32, #tpu.memory_space<vmem>>, %arg13: memref<32x128xf32, #tpu.memory_space<vmem>>, %arg14: memref<32x128xf32, #tpu.memory_space<vmem>>, %arg15: memref<1x128xf32, #tpu.memory_space<vmem>>, %arg16: memref<32x128xf32, #tpu.memory_space<vmem>>, %arg17: memref<32x128xf32, #tpu.memory_space<vmem>>, %arg18: memref<1x128xf32, #tpu.memory_space<vmem>>, %arg19: memref<256x512xf32, #tpu.memory_space<vmem>>, %arg20: memref<1x512xf32, #tpu.memory_space<vmem>>, %arg21: memref<2x32xf32, #tpu.memory_space<vmem>>, %arg22: memref<2x512xf32, #tpu.memory_space<vmem>>) attributes {dimension_semantics = [#tpu.dimension_semantics<arbitrary>], iteration_bounds = array<i64: 1>, scalar_prefetch = 0 : i64, scratch_operands = 0 : i64, tpu.core_type = #tpu.core_type<tc>, window_params = [{pipeline_mode = #tpu.pipeline_mode<synchronous>, transform_indices = @transform_0, window_bounds = array<i64: 16, 54>}, {pipeline_mode = #tpu.pipeline_mode<synchronous>, transform_indices = @transform_1, window_bounds = array<i64: 2, 16>}, {pipeline_mode = #tpu.pipeline_mode<synchronous>, transform_indices = @transform_2, window_bounds = array<i64: 54, 128>}, {pipeline_mode = #tpu.pipeline_mode<synchronous>, transform_indices = @transform_3, window_bounds = array<i64: 32, 128>}, {pipeline_mode = #tpu.pipeline_mode<synchronous>, transform_indices = @transform_4, window_bounds = array<i64: 1, 128>}, {pipeline_mode = #tpu.pipeline_mode<synchronous>, transform_indices = @transform_5, window_bounds = array<i64: 32, 128>}, {pipeline_mode = #tpu.pipeline_mode<synchronous>, transform_indices = @transform_6, window_bounds = array<i64: 32, 128>}, {pipeline_mode = #tpu.pipeline_mode<synchronous>, transform_indices = @transform_7, window_bounds = array<i64: 1, 128>}, {pipeline_mode = #tpu.pipeline_mode<synchronous>, transform_indices = @transform_8, window_bounds = array<i64: 32, 32>}, {pipeline_mode = #tpu.pipeline_mode<synchronous>, transform_indices = @transform_9, window_bounds = array<i64: 1, 32>}, {pipeline_mode = #tpu.pipeline_mode<synchronous>, transform_indices = @transform_10, window_bounds = array<i64: 16, 32>}, {pipeline_mode = #tpu.pipeline_mode<synchronous>, transform_indices = @transform_11, window_bounds = array<i64: 1, 32>}, {pipeline_mode = #tpu.pipeline_mode<synchronous>, transform_indices = @transform_12, window_bounds = array<i64: 32, 128>}, {pipeline_mode = #tpu.pipeline_mode<synchronous>, transform_indices = @transform_13, window_bounds = array<i64: 32, 128>}, {pipeline_mode = #tpu.pipeline_mode<synchronous>, transform_indices = @transform_14, window_bounds = array<i64: 1, 128>}, {pipeline_mode = #tpu.pipeline_mode<synchronous>, transform_indices = @transform_15, window_bounds = array<i64: 32, 128>}, {pipeline_mode = #tpu.pipeline_mode<synchronous>, transform_indices = @transform_16, window_bounds = array<i64: 32, 128>}, {pipeline_mode = #tpu.pipeline_mode<synchronous>, transform_indices = @transform_17, window_bounds = array<i64: 1, 128>}, {pipeline_mode = #tpu.pipeline_mode<synchronous>, transform_indices = @transform_18, window_bounds = array<i64: 256, 512>}, {pipeline_mode = #tpu.pipeline_mode<synchronous>, transform_indices = @transform_19, window_bounds = array<i64: 1, 512>}, {pipeline_mode = #tpu.pipeline_mode<synchronous>, transform_indices = @transform_20, window_bounds = array<i64: 2, 32>}, {pipeline_mode = #tpu.pipeline_mode<synchronous>, transform_indices = @transform_21, window_bounds = array<i64: 2, 512>}]} {
    %c0 = arith.constant 0 : index
    %c0_0 = arith.constant 0 : index
    %0 = vector.load %arg1[%c0, %c0_0] : memref<16x54xf32, #tpu.memory_space<vmem>>, vector<16x54xf32>
    %c0_1 = arith.constant 0 : index
    %c0_2 = arith.constant 0 : index
    %1 = vector.load %arg3[%c0_1, %c0_2] : memref<54x128xf32, #tpu.memory_space<vmem>>, vector<54x128xf32>
    %cst = arith.constant dense<0.000000e+00> : vector<16x128xf32>
    %2 = tpu.matmul %0, %1, %cst {dimension_numbers = #tpu.dot_dimension_numbers<[1], [0], [0], [1], [0, 0, 1, 1], [], []>} : vector<16x54xf32>, vector<54x128xf32>, vector<16x128xf32> -> vector<16x128xf32>
    %c0_3 = arith.constant 0 : index
    %c0_4 = arith.constant 0 : index
    %3 = vector.load %arg5[%c0_3, %c0_4] : memref<1x128xf32, #tpu.memory_space<vmem>>, vector<1x128xf32>
    %4 = vector.broadcast %3 : vector<1x128xf32> to vector<16x128xf32>
    %5 = arith.addf %2, %4 : vector<16x128xf32>
    %c0_5 = arith.constant 0 : index
    %c0_6 = arith.constant 0 : index
    %6 = vector.load %arg4[%c0_5, %c0_6] : memref<32x128xf32, #tpu.memory_space<vmem>>, vector<32x128xf32>
    %cst_7 = arith.constant 0.000000e+00 : f32
    %7 = vector.broadcast %cst_7 : f32 to vector<2x32xf32>
    %cst_8 = arith.constant 0.000000e+00 : f32
    %8 = vector.broadcast %cst_8 : f32 to vector<2x32xf32>
    %9 = vector.extract_strided_slice %5 {offsets = [0, 0], sizes = [2, 128], strides = [1, 1]} : vector<16x128xf32> to vector<2x128xf32>
    %cst_9 = arith.constant dense<0.000000e+00> : vector<2x128xf32>
    %10 = tpu.matmul %7, %6, %cst_9 {dimension_numbers = #tpu.dot_dimension_numbers<[1], [0], [0], [1], [0, 0, 1, 1], [], []>} : vector<2x32xf32>, vector<32x128xf32>, vector<2x128xf32> -> vector<2x128xf32>
    %11 = arith.addf %9, %10 : vector<2x128xf32>
    %12 = arith.negf %11 : vector<2x128xf32>
    %13 = math.exp %12 : vector<2x128xf32>
    %cst_10 = arith.constant 1.000000e+00 : f32
    %14 = vector.broadcast %cst_10 : f32 to vector<2x128xf32>
    %15 = arith.addf %14, %13 : vector<2x128xf32>
    %16 = arith.divf %14, %15 : vector<2x128xf32>
    %17 = math.tanh %11 : vector<2x128xf32>
    %18 = vector.extract_strided_slice %16 {offsets = [0, 0], sizes = [2, 32], strides = [1, 1]} : vector<2x128xf32> to vector<2x32xf32>
    %19 = vector.extract_strided_slice %16 {offsets = [0, 32], sizes = [2, 32], strides = [1, 1]} : vector<2x128xf32> to vector<2x32xf32>
    %20 = vector.extract_strided_slice %17 {offsets = [0, 64], sizes = [2, 32], strides = [1, 1]} : vector<2x128xf32> to vector<2x32xf32>
    %21 = vector.extract_strided_slice %16 {offsets = [0, 96], sizes = [2, 32], strides = [1, 1]} : vector<2x128xf32> to vector<2x32xf32>
    %22 = arith.mulf %19, %8 : vector<2x32xf32>
    %23 = arith.mulf %18, %20 : vector<2x32xf32>
    %24 = arith.addf %22, %23 : vector<2x32xf32>
    %25 = math.tanh %24 : vector<2x32xf32>
    %26 = arith.mulf %21, %25 : vector<2x32xf32>
    %27 = vector.extract_strided_slice %5 {offsets = [2, 0], sizes = [2, 128], strides = [1, 1]} : vector<16x128xf32> to vector<2x128xf32>
    %cst_11 = arith.constant dense<0.000000e+00> : vector<2x128xf32>
    %28 = tpu.matmul %26, %6, %cst_11 {dimension_numbers = #tpu.dot_dimension_numbers<[1], [0], [0], [1], [0, 0, 1, 1], [], []>} : vector<2x32xf32>, vector<32x128xf32>, vector<2x128xf32> -> vector<2x128xf32>
    %29 = arith.addf %27, %28 : vector<2x128xf32>
    %30 = arith.negf %29 : vector<2x128xf32>
    %31 = math.exp %30 : vector<2x128xf32>
    %cst_12 = arith.constant 1.000000e+00 : f32
    %32 = vector.broadcast %cst_12 : f32 to vector<2x128xf32>
    %33 = arith.addf %32, %31 : vector<2x128xf32>
    %34 = arith.divf %32, %33 : vector<2x128xf32>
    %35 = math.tanh %29 : vector<2x128xf32>
    %36 = vector.extract_strided_slice %34 {offsets = [0, 0], sizes = [2, 32], strides = [1, 1]} : vector<2x128xf32> to vector<2x32xf32>
    %37 = vector.extract_strided_slice %34 {offsets = [0, 32], sizes = [2, 32], strides = [1, 1]} : vector<2x128xf32> to vector<2x32xf32>
    %38 = vector.extract_strided_slice %35 {offsets = [0, 64], sizes = [2, 32], strides = [1, 1]} : vector<2x128xf32> to vector<2x32xf32>
    %39 = vector.extract_strided_slice %34 {offsets = [0, 96], sizes = [2, 32], strides = [1, 1]} : vector<2x128xf32> to vector<2x32xf32>
    %40 = arith.mulf %37, %24 : vector<2x32xf32>
    %41 = arith.mulf %36, %38 : vector<2x32xf32>
    %42 = arith.addf %40, %41 : vector<2x32xf32>
    %43 = math.tanh %42 : vector<2x32xf32>
    %44 = arith.mulf %39, %43 : vector<2x32xf32>
    %45 = vector.extract_strided_slice %5 {offsets = [4, 0], sizes = [2, 128], strides = [1, 1]} : vector<16x128xf32> to vector<2x128xf32>
    %cst_13 = arith.constant dense<0.000000e+00> : vector<2x128xf32>
    %46 = tpu.matmul %44, %6, %cst_13 {dimension_numbers = #tpu.dot_dimension_numbers<[1], [0], [0], [1], [0, 0, 1, 1], [], []>} : vector<2x32xf32>, vector<32x128xf32>, vector<2x128xf32> -> vector<2x128xf32>
    %47 = arith.addf %45, %46 : vector<2x128xf32>
    %48 = arith.negf %47 : vector<2x128xf32>
    %49 = math.exp %48 : vector<2x128xf32>
    %cst_14 = arith.constant 1.000000e+00 : f32
    %50 = vector.broadcast %cst_14 : f32 to vector<2x128xf32>
    %51 = arith.addf %50, %49 : vector<2x128xf32>
    %52 = arith.divf %50, %51 : vector<2x128xf32>
    %53 = math.tanh %47 : vector<2x128xf32>
    %54 = vector.extract_strided_slice %52 {offsets = [0, 0], sizes = [2, 32], strides = [1, 1]} : vector<2x128xf32> to vector<2x32xf32>
    %55 = vector.extract_strided_slice %52 {offsets = [0, 32], sizes = [2, 32], strides = [1, 1]} : vector<2x128xf32> to vector<2x32xf32>
    %56 = vector.extract_strided_slice %53 {offsets = [0, 64], sizes = [2, 32], strides = [1, 1]} : vector<2x128xf32> to vector<2x32xf32>
    %57 = vector.extract_strided_slice %52 {offsets = [0, 96], sizes = [2, 32], strides = [1, 1]} : vector<2x128xf32> to vector<2x32xf32>
    %58 = arith.mulf %55, %42 : vector<2x32xf32>
    %59 = arith.mulf %54, %56 : vector<2x32xf32>
    %60 = arith.addf %58, %59 : vector<2x32xf32>
    %61 = math.tanh %60 : vector<2x32xf32>
    %62 = arith.mulf %57, %61 : vector<2x32xf32>
    %63 = vector.extract_strided_slice %5 {offsets = [6, 0], sizes = [2, 128], strides = [1, 1]} : vector<16x128xf32> to vector<2x128xf32>
    %cst_15 = arith.constant dense<0.000000e+00> : vector<2x128xf32>
    %64 = tpu.matmul %62, %6, %cst_15 {dimension_numbers = #tpu.dot_dimension_numbers<[1], [0], [0], [1], [0, 0, 1, 1], [], []>} : vector<2x32xf32>, vector<32x128xf32>, vector<2x128xf32> -> vector<2x128xf32>
    %65 = arith.addf %63, %64 : vector<2x128xf32>
    %66 = arith.negf %65 : vector<2x128xf32>
    %67 = math.exp %66 : vector<2x128xf32>
    %cst_16 = arith.constant 1.000000e+00 : f32
    %68 = vector.broadcast %cst_16 : f32 to vector<2x128xf32>
    %69 = arith.addf %68, %67 : vector<2x128xf32>
    %70 = arith.divf %68, %69 : vector<2x128xf32>
    %71 = math.tanh %65 : vector<2x128xf32>
    %72 = vector.extract_strided_slice %70 {offsets = [0, 0], sizes = [2, 32], strides = [1, 1]} : vector<2x128xf32> to vector<2x32xf32>
    %73 = vector.extract_strided_slice %70 {offsets = [0, 32], sizes = [2, 32], strides = [1, 1]} : vector<2x128xf32> to vector<2x32xf32>
    %74 = vector.extract_strided_slice %71 {offsets = [0, 64], sizes = [2, 32], strides = [1, 1]} : vector<2x128xf32> to vector<2x32xf32>
    %75 = vector.extract_strided_slice %70 {offsets = [0, 96], sizes = [2, 32], strides = [1, 1]} : vector<2x128xf32> to vector<2x32xf32>
    %76 = arith.mulf %73, %60 : vector<2x32xf32>
    %77 = arith.mulf %72, %74 : vector<2x32xf32>
    %78 = arith.addf %76, %77 : vector<2x32xf32>
    %79 = math.tanh %78 : vector<2x32xf32>
    %80 = arith.mulf %75, %79 : vector<2x32xf32>
    %81 = vector.extract_strided_slice %5 {offsets = [8, 0], sizes = [2, 128], strides = [1, 1]} : vector<16x128xf32> to vector<2x128xf32>
    %cst_17 = arith.constant dense<0.000000e+00> : vector<2x128xf32>
    %82 = tpu.matmul %80, %6, %cst_17 {dimension_numbers = #tpu.dot_dimension_numbers<[1], [0], [0], [1], [0, 0, 1, 1], [], []>} : vector<2x32xf32>, vector<32x128xf32>, vector<2x128xf32> -> vector<2x128xf32>
    %83 = arith.addf %81, %82 : vector<2x128xf32>
    %84 = arith.negf %83 : vector<2x128xf32>
    %85 = math.exp %84 : vector<2x128xf32>
    %cst_18 = arith.constant 1.000000e+00 : f32
    %86 = vector.broadcast %cst_18 : f32 to vector<2x128xf32>
    %87 = arith.addf %86, %85 : vector<2x128xf32>
    %88 = arith.divf %86, %87 : vector<2x128xf32>
    %89 = math.tanh %83 : vector<2x128xf32>
    %90 = vector.extract_strided_slice %88 {offsets = [0, 0], sizes = [2, 32], strides = [1, 1]} : vector<2x128xf32> to vector<2x32xf32>
    %91 = vector.extract_strided_slice %88 {offsets = [0, 32], sizes = [2, 32], strides = [1, 1]} : vector<2x128xf32> to vector<2x32xf32>
    %92 = vector.extract_strided_slice %89 {offsets = [0, 64], sizes = [2, 32], strides = [1, 1]} : vector<2x128xf32> to vector<2x32xf32>
    %93 = vector.extract_strided_slice %88 {offsets = [0, 96], sizes = [2, 32], strides = [1, 1]} : vector<2x128xf32> to vector<2x32xf32>
    %94 = arith.mulf %91, %78 : vector<2x32xf32>
    %95 = arith.mulf %90, %92 : vector<2x32xf32>
    %96 = arith.addf %94, %95 : vector<2x32xf32>
    %97 = math.tanh %96 : vector<2x32xf32>
    %98 = arith.mulf %93, %97 : vector<2x32xf32>
    %99 = vector.extract_strided_slice %5 {offsets = [10, 0], sizes = [2, 128], strides = [1, 1]} : vector<16x128xf32> to vector<2x128xf32>
    %cst_19 = arith.constant dense<0.000000e+00> : vector<2x128xf32>
    %100 = tpu.matmul %98, %6, %cst_19 {dimension_numbers = #tpu.dot_dimension_numbers<[1], [0], [0], [1], [0, 0, 1, 1], [], []>} : vector<2x32xf32>, vector<32x128xf32>, vector<2x128xf32> -> vector<2x128xf32>
    %101 = arith.addf %99, %100 : vector<2x128xf32>
    %102 = arith.negf %101 : vector<2x128xf32>
    %103 = math.exp %102 : vector<2x128xf32>
    %cst_20 = arith.constant 1.000000e+00 : f32
    %104 = vector.broadcast %cst_20 : f32 to vector<2x128xf32>
    %105 = arith.addf %104, %103 : vector<2x128xf32>
    %106 = arith.divf %104, %105 : vector<2x128xf32>
    %107 = math.tanh %101 : vector<2x128xf32>
    %108 = vector.extract_strided_slice %106 {offsets = [0, 0], sizes = [2, 32], strides = [1, 1]} : vector<2x128xf32> to vector<2x32xf32>
    %109 = vector.extract_strided_slice %106 {offsets = [0, 32], sizes = [2, 32], strides = [1, 1]} : vector<2x128xf32> to vector<2x32xf32>
    %110 = vector.extract_strided_slice %107 {offsets = [0, 64], sizes = [2, 32], strides = [1, 1]} : vector<2x128xf32> to vector<2x32xf32>
    %111 = vector.extract_strided_slice %106 {offsets = [0, 96], sizes = [2, 32], strides = [1, 1]} : vector<2x128xf32> to vector<2x32xf32>
    %112 = arith.mulf %109, %96 : vector<2x32xf32>
    %113 = arith.mulf %108, %110 : vector<2x32xf32>
    %114 = arith.addf %112, %113 : vector<2x32xf32>
    %115 = math.tanh %114 : vector<2x32xf32>
    %116 = arith.mulf %111, %115 : vector<2x32xf32>
    %117 = vector.extract_strided_slice %5 {offsets = [12, 0], sizes = [2, 128], strides = [1, 1]} : vector<16x128xf32> to vector<2x128xf32>
    %cst_21 = arith.constant dense<0.000000e+00> : vector<2x128xf32>
    %118 = tpu.matmul %116, %6, %cst_21 {dimension_numbers = #tpu.dot_dimension_numbers<[1], [0], [0], [1], [0, 0, 1, 1], [], []>} : vector<2x32xf32>, vector<32x128xf32>, vector<2x128xf32> -> vector<2x128xf32>
    %119 = arith.addf %117, %118 : vector<2x128xf32>
    %120 = arith.negf %119 : vector<2x128xf32>
    %121 = math.exp %120 : vector<2x128xf32>
    %cst_22 = arith.constant 1.000000e+00 : f32
    %122 = vector.broadcast %cst_22 : f32 to vector<2x128xf32>
    %123 = arith.addf %122, %121 : vector<2x128xf32>
    %124 = arith.divf %122, %123 : vector<2x128xf32>
    %125 = math.tanh %119 : vector<2x128xf32>
    %126 = vector.extract_strided_slice %124 {offsets = [0, 0], sizes = [2, 32], strides = [1, 1]} : vector<2x128xf32> to vector<2x32xf32>
    %127 = vector.extract_strided_slice %124 {offsets = [0, 32], sizes = [2, 32], strides = [1, 1]} : vector<2x128xf32> to vector<2x32xf32>
    %128 = vector.extract_strided_slice %125 {offsets = [0, 64], sizes = [2, 32], strides = [1, 1]} : vector<2x128xf32> to vector<2x32xf32>
    %129 = vector.extract_strided_slice %124 {offsets = [0, 96], sizes = [2, 32], strides = [1, 1]} : vector<2x128xf32> to vector<2x32xf32>
    %130 = arith.mulf %127, %114 : vector<2x32xf32>
    %131 = arith.mulf %126, %128 : vector<2x32xf32>
    %132 = arith.addf %130, %131 : vector<2x32xf32>
    %133 = math.tanh %132 : vector<2x32xf32>
    %134 = arith.mulf %129, %133 : vector<2x32xf32>
    %135 = vector.extract_strided_slice %5 {offsets = [14, 0], sizes = [2, 128], strides = [1, 1]} : vector<16x128xf32> to vector<2x128xf32>
    %cst_23 = arith.constant dense<0.000000e+00> : vector<2x128xf32>
    %136 = tpu.matmul %134, %6, %cst_23 {dimension_numbers = #tpu.dot_dimension_numbers<[1], [0], [0], [1], [0, 0, 1, 1], [], []>} : vector<2x32xf32>, vector<32x128xf32>, vector<2x128xf32> -> vector<2x128xf32>
    %137 = arith.addf %135, %136 : vector<2x128xf32>
    %138 = arith.negf %137 : vector<2x128xf32>
    %139 = math.exp %138 : vector<2x128xf32>
    %cst_24 = arith.constant 1.000000e+00 : f32
    %140 = vector.broadcast %cst_24 : f32 to vector<2x128xf32>
    %141 = arith.addf %140, %139 : vector<2x128xf32>
    %142 = arith.divf %140, %141 : vector<2x128xf32>
    %143 = math.tanh %137 : vector<2x128xf32>
    %144 = vector.extract_strided_slice %142 {offsets = [0, 0], sizes = [2, 32], strides = [1, 1]} : vector<2x128xf32> to vector<2x32xf32>
    %145 = vector.extract_strided_slice %142 {offsets = [0, 32], sizes = [2, 32], strides = [1, 1]} : vector<2x128xf32> to vector<2x32xf32>
    %146 = vector.extract_strided_slice %143 {offsets = [0, 64], sizes = [2, 32], strides = [1, 1]} : vector<2x128xf32> to vector<2x32xf32>
    %147 = vector.extract_strided_slice %142 {offsets = [0, 96], sizes = [2, 32], strides = [1, 1]} : vector<2x128xf32> to vector<2x32xf32>
    %148 = arith.mulf %145, %132 : vector<2x32xf32>
    %149 = arith.mulf %144, %146 : vector<2x32xf32>
    %150 = arith.addf %148, %149 : vector<2x32xf32>
    %151 = math.tanh %150 : vector<2x32xf32>
    %152 = arith.mulf %147, %151 : vector<2x32xf32>
    %153 = tpu.concatenate %26, %44, %62, %80, %98, %116, %134, %152 in 0 : vector<2x32xf32>, vector<2x32xf32>, vector<2x32xf32>, vector<2x32xf32>, vector<2x32xf32>, vector<2x32xf32>, vector<2x32xf32>, vector<2x32xf32> -> vector<16x32xf32>
    %c0_25 = arith.constant 0 : index
    %c0_26 = arith.constant 0 : index
    %154 = vector.load %arg6[%c0_25, %c0_26] : memref<32x128xf32, #tpu.memory_space<vmem>>, vector<32x128xf32>
    %cst_27 = arith.constant dense<0.000000e+00> : vector<16x128xf32>
    %155 = tpu.matmul %153, %154, %cst_27 {dimension_numbers = #tpu.dot_dimension_numbers<[1], [0], [0], [1], [0, 0, 1, 1], [], []>} : vector<16x32xf32>, vector<32x128xf32>, vector<16x128xf32> -> vector<16x128xf32>
    %c0_28 = arith.constant 0 : index
    %c0_29 = arith.constant 0 : index
    %156 = vector.load %arg8[%c0_28, %c0_29] : memref<1x128xf32, #tpu.memory_space<vmem>>, vector<1x128xf32>
    %157 = vector.broadcast %156 : vector<1x128xf32> to vector<16x128xf32>
    %158 = arith.addf %155, %157 : vector<16x128xf32>
    %c0_30 = arith.constant 0 : index
    %c0_31 = arith.constant 0 : index
    %159 = vector.load %arg7[%c0_30, %c0_31] : memref<32x128xf32, #tpu.memory_space<vmem>>, vector<32x128xf32>
    %cst_32 = arith.constant 0.000000e+00 : f32
    %160 = vector.broadcast %cst_32 : f32 to vector<2x32xf32>
    %cst_33 = arith.constant 0.000000e+00 : f32
    %161 = vector.broadcast %cst_33 : f32 to vector<2x32xf32>
    %162 = vector.extract_strided_slice %158 {offsets = [0, 0], sizes = [2, 128], strides = [1, 1]} : vector<16x128xf32> to vector<2x128xf32>
    %cst_34 = arith.constant dense<0.000000e+00> : vector<2x128xf32>
    %163 = tpu.matmul %160, %159, %cst_34 {dimension_numbers = #tpu.dot_dimension_numbers<[1], [0], [0], [1], [0, 0, 1, 1], [], []>} : vector<2x32xf32>, vector<32x128xf32>, vector<2x128xf32> -> vector<2x128xf32>
    %164 = arith.addf %162, %163 : vector<2x128xf32>
    %165 = arith.negf %164 : vector<2x128xf32>
    %166 = math.exp %165 : vector<2x128xf32>
    %cst_35 = arith.constant 1.000000e+00 : f32
    %167 = vector.broadcast %cst_35 : f32 to vector<2x128xf32>
    %168 = arith.addf %167, %166 : vector<2x128xf32>
    %169 = arith.divf %167, %168 : vector<2x128xf32>
    %170 = math.tanh %164 : vector<2x128xf32>
    %171 = vector.extract_strided_slice %169 {offsets = [0, 0], sizes = [2, 32], strides = [1, 1]} : vector<2x128xf32> to vector<2x32xf32>
    %172 = vector.extract_strided_slice %169 {offsets = [0, 32], sizes = [2, 32], strides = [1, 1]} : vector<2x128xf32> to vector<2x32xf32>
    %173 = vector.extract_strided_slice %170 {offsets = [0, 64], sizes = [2, 32], strides = [1, 1]} : vector<2x128xf32> to vector<2x32xf32>
    %174 = vector.extract_strided_slice %169 {offsets = [0, 96], sizes = [2, 32], strides = [1, 1]} : vector<2x128xf32> to vector<2x32xf32>
    %175 = arith.mulf %172, %161 : vector<2x32xf32>
    %176 = arith.mulf %171, %173 : vector<2x32xf32>
    %177 = arith.addf %175, %176 : vector<2x32xf32>
    %178 = math.tanh %177 : vector<2x32xf32>
    %179 = arith.mulf %174, %178 : vector<2x32xf32>
    %180 = vector.extract_strided_slice %158 {offsets = [2, 0], sizes = [2, 128], strides = [1, 1]} : vector<16x128xf32> to vector<2x128xf32>
    %cst_36 = arith.constant dense<0.000000e+00> : vector<2x128xf32>
    %181 = tpu.matmul %179, %159, %cst_36 {dimension_numbers = #tpu.dot_dimension_numbers<[1], [0], [0], [1], [0, 0, 1, 1], [], []>} : vector<2x32xf32>, vector<32x128xf32>, vector<2x128xf32> -> vector<2x128xf32>
    %182 = arith.addf %180, %181 : vector<2x128xf32>
    %183 = arith.negf %182 : vector<2x128xf32>
    %184 = math.exp %183 : vector<2x128xf32>
    %cst_37 = arith.constant 1.000000e+00 : f32
    %185 = vector.broadcast %cst_37 : f32 to vector<2x128xf32>
    %186 = arith.addf %185, %184 : vector<2x128xf32>
    %187 = arith.divf %185, %186 : vector<2x128xf32>
    %188 = math.tanh %182 : vector<2x128xf32>
    %189 = vector.extract_strided_slice %187 {offsets = [0, 0], sizes = [2, 32], strides = [1, 1]} : vector<2x128xf32> to vector<2x32xf32>
    %190 = vector.extract_strided_slice %187 {offsets = [0, 32], sizes = [2, 32], strides = [1, 1]} : vector<2x128xf32> to vector<2x32xf32>
    %191 = vector.extract_strided_slice %188 {offsets = [0, 64], sizes = [2, 32], strides = [1, 1]} : vector<2x128xf32> to vector<2x32xf32>
    %192 = vector.extract_strided_slice %187 {offsets = [0, 96], sizes = [2, 32], strides = [1, 1]} : vector<2x128xf32> to vector<2x32xf32>
    %193 = arith.mulf %190, %177 : vector<2x32xf32>
    %194 = arith.mulf %189, %191 : vector<2x32xf32>
    %195 = arith.addf %193, %194 : vector<2x32xf32>
    %196 = math.tanh %195 : vector<2x32xf32>
    %197 = arith.mulf %192, %196 : vector<2x32xf32>
    %198 = vector.extract_strided_slice %158 {offsets = [4, 0], sizes = [2, 128], strides = [1, 1]} : vector<16x128xf32> to vector<2x128xf32>
    %cst_38 = arith.constant dense<0.000000e+00> : vector<2x128xf32>
    %199 = tpu.matmul %197, %159, %cst_38 {dimension_numbers = #tpu.dot_dimension_numbers<[1], [0], [0], [1], [0, 0, 1, 1], [], []>} : vector<2x32xf32>, vector<32x128xf32>, vector<2x128xf32> -> vector<2x128xf32>
    %200 = arith.addf %198, %199 : vector<2x128xf32>
    %201 = arith.negf %200 : vector<2x128xf32>
    %202 = math.exp %201 : vector<2x128xf32>
    %cst_39 = arith.constant 1.000000e+00 : f32
    %203 = vector.broadcast %cst_39 : f32 to vector<2x128xf32>
    %204 = arith.addf %203, %202 : vector<2x128xf32>
    %205 = arith.divf %203, %204 : vector<2x128xf32>
    %206 = math.tanh %200 : vector<2x128xf32>
    %207 = vector.extract_strided_slice %205 {offsets = [0, 0], sizes = [2, 32], strides = [1, 1]} : vector<2x128xf32> to vector<2x32xf32>
    %208 = vector.extract_strided_slice %205 {offsets = [0, 32], sizes = [2, 32], strides = [1, 1]} : vector<2x128xf32> to vector<2x32xf32>
    %209 = vector.extract_strided_slice %206 {offsets = [0, 64], sizes = [2, 32], strides = [1, 1]} : vector<2x128xf32> to vector<2x32xf32>
    %210 = vector.extract_strided_slice %205 {offsets = [0, 96], sizes = [2, 32], strides = [1, 1]} : vector<2x128xf32> to vector<2x32xf32>
    %211 = arith.mulf %208, %195 : vector<2x32xf32>
    %212 = arith.mulf %207, %209 : vector<2x32xf32>
    %213 = arith.addf %211, %212 : vector<2x32xf32>
    %214 = math.tanh %213 : vector<2x32xf32>
    %215 = arith.mulf %210, %214 : vector<2x32xf32>
    %216 = vector.extract_strided_slice %158 {offsets = [6, 0], sizes = [2, 128], strides = [1, 1]} : vector<16x128xf32> to vector<2x128xf32>
    %cst_40 = arith.constant dense<0.000000e+00> : vector<2x128xf32>
    %217 = tpu.matmul %215, %159, %cst_40 {dimension_numbers = #tpu.dot_dimension_numbers<[1], [0], [0], [1], [0, 0, 1, 1], [], []>} : vector<2x32xf32>, vector<32x128xf32>, vector<2x128xf32> -> vector<2x128xf32>
    %218 = arith.addf %216, %217 : vector<2x128xf32>
    %219 = arith.negf %218 : vector<2x128xf32>
    %220 = math.exp %219 : vector<2x128xf32>
    %cst_41 = arith.constant 1.000000e+00 : f32
    %221 = vector.broadcast %cst_41 : f32 to vector<2x128xf32>
    %222 = arith.addf %221, %220 : vector<2x128xf32>
    %223 = arith.divf %221, %222 : vector<2x128xf32>
    %224 = math.tanh %218 : vector<2x128xf32>
    %225 = vector.extract_strided_slice %223 {offsets = [0, 0], sizes = [2, 32], strides = [1, 1]} : vector<2x128xf32> to vector<2x32xf32>
    %226 = vector.extract_strided_slice %223 {offsets = [0, 32], sizes = [2, 32], strides = [1, 1]} : vector<2x128xf32> to vector<2x32xf32>
    %227 = vector.extract_strided_slice %224 {offsets = [0, 64], sizes = [2, 32], strides = [1, 1]} : vector<2x128xf32> to vector<2x32xf32>
    %228 = vector.extract_strided_slice %223 {offsets = [0, 96], sizes = [2, 32], strides = [1, 1]} : vector<2x128xf32> to vector<2x32xf32>
    %229 = arith.mulf %226, %213 : vector<2x32xf32>
    %230 = arith.mulf %225, %227 : vector<2x32xf32>
    %231 = arith.addf %229, %230 : vector<2x32xf32>
    %232 = math.tanh %231 : vector<2x32xf32>
    %233 = arith.mulf %228, %232 : vector<2x32xf32>
    %234 = vector.extract_strided_slice %158 {offsets = [8, 0], sizes = [2, 128], strides = [1, 1]} : vector<16x128xf32> to vector<2x128xf32>
    %cst_42 = arith.constant dense<0.000000e+00> : vector<2x128xf32>
    %235 = tpu.matmul %233, %159, %cst_42 {dimension_numbers = #tpu.dot_dimension_numbers<[1], [0], [0], [1], [0, 0, 1, 1], [], []>} : vector<2x32xf32>, vector<32x128xf32>, vector<2x128xf32> -> vector<2x128xf32>
    %236 = arith.addf %234, %235 : vector<2x128xf32>
    %237 = arith.negf %236 : vector<2x128xf32>
    %238 = math.exp %237 : vector<2x128xf32>
    %cst_43 = arith.constant 1.000000e+00 : f32
    %239 = vector.broadcast %cst_43 : f32 to vector<2x128xf32>
    %240 = arith.addf %239, %238 : vector<2x128xf32>
    %241 = arith.divf %239, %240 : vector<2x128xf32>
    %242 = math.tanh %236 : vector<2x128xf32>
    %243 = vector.extract_strided_slice %241 {offsets = [0, 0], sizes = [2, 32], strides = [1, 1]} : vector<2x128xf32> to vector<2x32xf32>
    %244 = vector.extract_strided_slice %241 {offsets = [0, 32], sizes = [2, 32], strides = [1, 1]} : vector<2x128xf32> to vector<2x32xf32>
    %245 = vector.extract_strided_slice %242 {offsets = [0, 64], sizes = [2, 32], strides = [1, 1]} : vector<2x128xf32> to vector<2x32xf32>
    %246 = vector.extract_strided_slice %241 {offsets = [0, 96], sizes = [2, 32], strides = [1, 1]} : vector<2x128xf32> to vector<2x32xf32>
    %247 = arith.mulf %244, %231 : vector<2x32xf32>
    %248 = arith.mulf %243, %245 : vector<2x32xf32>
    %249 = arith.addf %247, %248 : vector<2x32xf32>
    %250 = math.tanh %249 : vector<2x32xf32>
    %251 = arith.mulf %246, %250 : vector<2x32xf32>
    %252 = vector.extract_strided_slice %158 {offsets = [10, 0], sizes = [2, 128], strides = [1, 1]} : vector<16x128xf32> to vector<2x128xf32>
    %cst_44 = arith.constant dense<0.000000e+00> : vector<2x128xf32>
    %253 = tpu.matmul %251, %159, %cst_44 {dimension_numbers = #tpu.dot_dimension_numbers<[1], [0], [0], [1], [0, 0, 1, 1], [], []>} : vector<2x32xf32>, vector<32x128xf32>, vector<2x128xf32> -> vector<2x128xf32>
    %254 = arith.addf %252, %253 : vector<2x128xf32>
    %255 = arith.negf %254 : vector<2x128xf32>
    %256 = math.exp %255 : vector<2x128xf32>
    %cst_45 = arith.constant 1.000000e+00 : f32
    %257 = vector.broadcast %cst_45 : f32 to vector<2x128xf32>
    %258 = arith.addf %257, %256 : vector<2x128xf32>
    %259 = arith.divf %257, %258 : vector<2x128xf32>
    %260 = math.tanh %254 : vector<2x128xf32>
    %261 = vector.extract_strided_slice %259 {offsets = [0, 0], sizes = [2, 32], strides = [1, 1]} : vector<2x128xf32> to vector<2x32xf32>
    %262 = vector.extract_strided_slice %259 {offsets = [0, 32], sizes = [2, 32], strides = [1, 1]} : vector<2x128xf32> to vector<2x32xf32>
    %263 = vector.extract_strided_slice %260 {offsets = [0, 64], sizes = [2, 32], strides = [1, 1]} : vector<2x128xf32> to vector<2x32xf32>
    %264 = vector.extract_strided_slice %259 {offsets = [0, 96], sizes = [2, 32], strides = [1, 1]} : vector<2x128xf32> to vector<2x32xf32>
    %265 = arith.mulf %262, %249 : vector<2x32xf32>
    %266 = arith.mulf %261, %263 : vector<2x32xf32>
    %267 = arith.addf %265, %266 : vector<2x32xf32>
    %268 = math.tanh %267 : vector<2x32xf32>
    %269 = arith.mulf %264, %268 : vector<2x32xf32>
    %270 = vector.extract_strided_slice %158 {offsets = [12, 0], sizes = [2, 128], strides = [1, 1]} : vector<16x128xf32> to vector<2x128xf32>
    %cst_46 = arith.constant dense<0.000000e+00> : vector<2x128xf32>
    %271 = tpu.matmul %269, %159, %cst_46 {dimension_numbers = #tpu.dot_dimension_numbers<[1], [0], [0], [1], [0, 0, 1, 1], [], []>} : vector<2x32xf32>, vector<32x128xf32>, vector<2x128xf32> -> vector<2x128xf32>
    %272 = arith.addf %270, %271 : vector<2x128xf32>
    %273 = arith.negf %272 : vector<2x128xf32>
    %274 = math.exp %273 : vector<2x128xf32>
    %cst_47 = arith.constant 1.000000e+00 : f32
    %275 = vector.broadcast %cst_47 : f32 to vector<2x128xf32>
    %276 = arith.addf %275, %274 : vector<2x128xf32>
    %277 = arith.divf %275, %276 : vector<2x128xf32>
    %278 = math.tanh %272 : vector<2x128xf32>
    %279 = vector.extract_strided_slice %277 {offsets = [0, 0], sizes = [2, 32], strides = [1, 1]} : vector<2x128xf32> to vector<2x32xf32>
    %280 = vector.extract_strided_slice %277 {offsets = [0, 32], sizes = [2, 32], strides = [1, 1]} : vector<2x128xf32> to vector<2x32xf32>
    %281 = vector.extract_strided_slice %278 {offsets = [0, 64], sizes = [2, 32], strides = [1, 1]} : vector<2x128xf32> to vector<2x32xf32>
    %282 = vector.extract_strided_slice %277 {offsets = [0, 96], sizes = [2, 32], strides = [1, 1]} : vector<2x128xf32> to vector<2x32xf32>
    %283 = arith.mulf %280, %267 : vector<2x32xf32>
    %284 = arith.mulf %279, %281 : vector<2x32xf32>
    %285 = arith.addf %283, %284 : vector<2x32xf32>
    %286 = math.tanh %285 : vector<2x32xf32>
    %287 = arith.mulf %282, %286 : vector<2x32xf32>
    %288 = vector.extract_strided_slice %158 {offsets = [14, 0], sizes = [2, 128], strides = [1, 1]} : vector<16x128xf32> to vector<2x128xf32>
    %cst_48 = arith.constant dense<0.000000e+00> : vector<2x128xf32>
    %289 = tpu.matmul %287, %159, %cst_48 {dimension_numbers = #tpu.dot_dimension_numbers<[1], [0], [0], [1], [0, 0, 1, 1], [], []>} : vector<2x32xf32>, vector<32x128xf32>, vector<2x128xf32> -> vector<2x128xf32>
    %290 = arith.addf %288, %289 : vector<2x128xf32>
    %291 = arith.negf %290 : vector<2x128xf32>
    %292 = math.exp %291 : vector<2x128xf32>
    %cst_49 = arith.constant 1.000000e+00 : f32
    %293 = vector.broadcast %cst_49 : f32 to vector<2x128xf32>
    %294 = arith.addf %293, %292 : vector<2x128xf32>
    %295 = arith.divf %293, %294 : vector<2x128xf32>
    %296 = math.tanh %290 : vector<2x128xf32>
    %297 = vector.extract_strided_slice %295 {offsets = [0, 0], sizes = [2, 32], strides = [1, 1]} : vector<2x128xf32> to vector<2x32xf32>
    %298 = vector.extract_strided_slice %295 {offsets = [0, 32], sizes = [2, 32], strides = [1, 1]} : vector<2x128xf32> to vector<2x32xf32>
    %299 = vector.extract_strided_slice %296 {offsets = [0, 64], sizes = [2, 32], strides = [1, 1]} : vector<2x128xf32> to vector<2x32xf32>
    %300 = vector.extract_strided_slice %295 {offsets = [0, 96], sizes = [2, 32], strides = [1, 1]} : vector<2x128xf32> to vector<2x32xf32>
    %301 = arith.mulf %298, %285 : vector<2x32xf32>
    %302 = arith.mulf %297, %299 : vector<2x32xf32>
    %303 = arith.addf %301, %302 : vector<2x32xf32>
    %304 = math.tanh %303 : vector<2x32xf32>
    %305 = arith.mulf %300, %304 : vector<2x32xf32>
    %c0_50 = arith.constant 0 : index
    %c0_51 = arith.constant 0 : index
    %306 = vector.load %arg9[%c0_50, %c0_51] : memref<32x32xf32, #tpu.memory_space<vmem>>, vector<32x32xf32>
    %cst_52 = arith.constant dense<0.000000e+00> : vector<2x32xf32>
    %307 = tpu.matmul %305, %306, %cst_52 {dimension_numbers = #tpu.dot_dimension_numbers<[1], [0], [0], [1], [0, 0, 1, 1], [], []>} : vector<2x32xf32>, vector<32x32xf32>, vector<2x32xf32> -> vector<2x32xf32>
    %c0_53 = arith.constant 0 : index
    %c0_54 = arith.constant 0 : index
    %308 = vector.load %arg10[%c0_53, %c0_54] : memref<1x32xf32, #tpu.memory_space<vmem>>, vector<1x32xf32>
    %309 = vector.broadcast %308 : vector<1x32xf32> to vector<2x32xf32>
    %310 = arith.addf %307, %309 : vector<2x32xf32>
    %c0_55 = arith.constant 0 : index
    %c0_56 = arith.constant 0 : index
    %311 = vector.load %arg21[%c0_55, %c0_56] : memref<2x32xf32, #tpu.memory_space<vmem>>, vector<2x32xf32>
    tpu.vector_store %arg21[%c0_55, %c0_56], %310 {strides = array<i32>} : memref<2x32xf32, #tpu.memory_space<vmem>>, vector<2x32xf32>,
    %312 = vector.extract_strided_slice %310 {offsets = [0, 0], sizes = [2, 16], strides = [1, 1]} : vector<2x32xf32> to vector<2x16xf32>
    %313 = vector.extract_strided_slice %310 {offsets = [0, 16], sizes = [2, 16], strides = [1, 1]} : vector<2x32xf32> to vector<2x16xf32>
    %cst_57 = arith.constant 5.000000e-01 : f32
    %314 = vector.broadcast %cst_57 : f32 to vector<2x16xf32>
    %315 = arith.mulf %314, %313 : vector<2x16xf32>
    %316 = math.exp %315 : vector<2x16xf32>
    %c0_58 = arith.constant 0 : index
    %c0_59 = arith.constant 0 : index
    %317 = vector.load %arg2[%c0_58, %c0_59] : memref<2x16xf32, #tpu.memory_space<vmem>>, vector<2x16xf32>
    %318 = arith.mulf %316, %317 : vector<2x16xf32>
    %319 = arith.addf %312, %318 : vector<2x16xf32>
    %c0_60 = arith.constant 0 : index
    %c0_61 = arith.constant 0 : index
    %320 = vector.load %arg11[%c0_60, %c0_61] : memref<16x32xf32, #tpu.memory_space<vmem>>, vector<16x32xf32>
    %cst_62 = arith.constant dense<0.000000e+00> : vector<2x32xf32>
    %321 = tpu.matmul %319, %320, %cst_62 {dimension_numbers = #tpu.dot_dimension_numbers<[1], [0], [0], [1], [0, 0, 1, 1], [], []>} : vector<2x16xf32>, vector<16x32xf32>, vector<2x32xf32> -> vector<2x32xf32>
    %c0_63 = arith.constant 0 : index
    %c0_64 = arith.constant 0 : index
    %322 = vector.load %arg12[%c0_63, %c0_64] : memref<1x32xf32, #tpu.memory_space<vmem>>, vector<1x32xf32>
    %323 = vector.broadcast %322 : vector<1x32xf32> to vector<2x32xf32>
    %324 = arith.addf %321, %323 : vector<2x32xf32>
    %cst_65 = arith.constant 0.000000e+00 : f32
    %325 = vector.broadcast %cst_65 : f32 to vector<2x32xf32>
    %326 = arith.maximumf %324, %325 : vector<2x32xf32>
    %c0_66 = arith.constant 0 : index
    %c0_67 = arith.constant 0 : index
    %327 = vector.load %arg13[%c0_66, %c0_67] : memref<32x128xf32, #tpu.memory_space<vmem>>, vector<32x128xf32>
    %cst_68 = arith.constant dense<0.000000e+00> : vector<2x128xf32>
    %328 = tpu.matmul %326, %327, %cst_68 {dimension_numbers = #tpu.dot_dimension_numbers<[1], [0], [0], [1], [0, 0, 1, 1], [], []>} : vector<2x32xf32>, vector<32x128xf32>, vector<2x128xf32> -> vector<2x128xf32>
    %c0_69 = arith.constant 0 : index
    %c0_70 = arith.constant 0 : index
    %329 = vector.load %arg15[%c0_69, %c0_70] : memref<1x128xf32, #tpu.memory_space<vmem>>, vector<1x128xf32>
    %330 = vector.broadcast %329 : vector<1x128xf32> to vector<2x128xf32>
    %331 = arith.addf %328, %330 : vector<2x128xf32>
    %c0_71 = arith.constant 0 : index
    %c0_72 = arith.constant 0 : index
    %332 = vector.load %arg14[%c0_71, %c0_72] : memref<32x128xf32, #tpu.memory_space<vmem>>, vector<32x128xf32>
    %cst_73 = arith.constant 0.000000e+00 : f32
    %333 = vector.broadcast %cst_73 : f32 to vector<2x32xf32>
    %cst_74 = arith.constant 0.000000e+00 : f32
    %334 = vector.broadcast %cst_74 : f32 to vector<2x32xf32>
    %cst_75 = arith.constant dense<0.000000e+00> : vector<2x128xf32>
    %335 = tpu.matmul %333, %332, %cst_75 {dimension_numbers = #tpu.dot_dimension_numbers<[1], [0], [0], [1], [0, 0, 1, 1], [], []>} : vector<2x32xf32>, vector<32x128xf32>, vector<2x128xf32> -> vector<2x128xf32>
    %336 = arith.addf %331, %335 : vector<2x128xf32>
    %337 = arith.negf %336 : vector<2x128xf32>
    %338 = math.exp %337 : vector<2x128xf32>
    %cst_76 = arith.constant 1.000000e+00 : f32
    %339 = vector.broadcast %cst_76 : f32 to vector<2x128xf32>
    %340 = arith.addf %339, %338 : vector<2x128xf32>
    %341 = arith.divf %339, %340 : vector<2x128xf32>
    %342 = math.tanh %336 : vector<2x128xf32>
    %343 = vector.extract_strided_slice %341 {offsets = [0, 0], sizes = [2, 32], strides = [1, 1]} : vector<2x128xf32> to vector<2x32xf32>
    %344 = vector.extract_strided_slice %341 {offsets = [0, 32], sizes = [2, 32], strides = [1, 1]} : vector<2x128xf32> to vector<2x32xf32>
    %345 = vector.extract_strided_slice %342 {offsets = [0, 64], sizes = [2, 32], strides = [1, 1]} : vector<2x128xf32> to vector<2x32xf32>
    %346 = vector.extract_strided_slice %341 {offsets = [0, 96], sizes = [2, 32], strides = [1, 1]} : vector<2x128xf32> to vector<2x32xf32>
    %347 = arith.mulf %344, %334 : vector<2x32xf32>
    %348 = arith.mulf %343, %345 : vector<2x32xf32>
    %349 = arith.addf %347, %348 : vector<2x32xf32>
    %350 = math.tanh %349 : vector<2x32xf32>
    %351 = arith.mulf %346, %350 : vector<2x32xf32>
    %cst_77 = arith.constant dense<0.000000e+00> : vector<2x128xf32>
    %352 = tpu.matmul %351, %332, %cst_77 {dimension_numbers = #tpu.dot_dimension_numbers<[1], [0], [0], [1], [0, 0, 1, 1], [], []>} : vector<2x32xf32>, vector<32x128xf32>, vector<2x128xf32> -> vector<2x128xf32>
    %353 = arith.addf %331, %352 : vector<2x128xf32>
    %354 = arith.negf %353 : vector<2x128xf32>
    %355 = math.exp %354 : vector<2x128xf32>
    %cst_78 = arith.constant 1.000000e+00 : f32
    %356 = vector.broadcast %cst_78 : f32 to vector<2x128xf32>
    %357 = arith.addf %356, %355 : vector<2x128xf32>
    %358 = arith.divf %356, %357 : vector<2x128xf32>
    %359 = math.tanh %353 : vector<2x128xf32>
    %360 = vector.extract_strided_slice %358 {offsets = [0, 0], sizes = [2, 32], strides = [1, 1]} : vector<2x128xf32> to vector<2x32xf32>
    %361 = vector.extract_strided_slice %358 {offsets = [0, 32], sizes = [2, 32], strides = [1, 1]} : vector<2x128xf32> to vector<2x32xf32>
    %362 = vector.extract_strided_slice %359 {offsets = [0, 64], sizes = [2, 32], strides = [1, 1]} : vector<2x128xf32> to vector<2x32xf32>
    %363 = vector.extract_strided_slice %358 {offsets = [0, 96], sizes = [2, 32], strides = [1, 1]} : vector<2x128xf32> to vector<2x32xf32>
    %364 = arith.mulf %361, %349 : vector<2x32xf32>
    %365 = arith.mulf %360, %362 : vector<2x32xf32>
    %366 = arith.addf %364, %365 : vector<2x32xf32>
    %367 = math.tanh %366 : vector<2x32xf32>
    %368 = arith.mulf %363, %367 : vector<2x32xf32>
    %cst_79 = arith.constant dense<0.000000e+00> : vector<2x128xf32>
    %369 = tpu.matmul %368, %332, %cst_79 {dimension_numbers = #tpu.dot_dimension_numbers<[1], [0], [0], [1], [0, 0, 1, 1], [], []>} : vector<2x32xf32>, vector<32x128xf32>, vector<2x128xf32> -> vector<2x128xf32>
    %370 = arith.addf %331, %369 : vector<2x128xf32>
    %371 = arith.negf %370 : vector<2x128xf32>
    %372 = math.exp %371 : vector<2x128xf32>
    %cst_80 = arith.constant 1.000000e+00 : f32
    %373 = vector.broadcast %cst_80 : f32 to vector<2x128xf32>
    %374 = arith.addf %373, %372 : vector<2x128xf32>
    %375 = arith.divf %373, %374 : vector<2x128xf32>
    %376 = math.tanh %370 : vector<2x128xf32>
    %377 = vector.extract_strided_slice %375 {offsets = [0, 0], sizes = [2, 32], strides = [1, 1]} : vector<2x128xf32> to vector<2x32xf32>
    %378 = vector.extract_strided_slice %375 {offsets = [0, 32], sizes = [2, 32], strides = [1, 1]} : vector<2x128xf32> to vector<2x32xf32>
    %379 = vector.extract_strided_slice %376 {offsets = [0, 64], sizes = [2, 32], strides = [1, 1]} : vector<2x128xf32> to vector<2x32xf32>
    %380 = vector.extract_strided_slice %375 {offsets = [0, 96], sizes = [2, 32], strides = [1, 1]} : vector<2x128xf32> to vector<2x32xf32>
    %381 = arith.mulf %378, %366 : vector<2x32xf32>
    %382 = arith.mulf %377, %379 : vector<2x32xf32>
    %383 = arith.addf %381, %382 : vector<2x32xf32>
    %384 = math.tanh %383 : vector<2x32xf32>
    %385 = arith.mulf %380, %384 : vector<2x32xf32>
    %cst_81 = arith.constant dense<0.000000e+00> : vector<2x128xf32>
    %386 = tpu.matmul %385, %332, %cst_81 {dimension_numbers = #tpu.dot_dimension_numbers<[1], [0], [0], [1], [0, 0, 1, 1], [], []>} : vector<2x32xf32>, vector<32x128xf32>, vector<2x128xf32> -> vector<2x128xf32>
    %387 = arith.addf %331, %386 : vector<2x128xf32>
    %388 = arith.negf %387 : vector<2x128xf32>
    %389 = math.exp %388 : vector<2x128xf32>
    %cst_82 = arith.constant 1.000000e+00 : f32
    %390 = vector.broadcast %cst_82 : f32 to vector<2x128xf32>
    %391 = arith.addf %390, %389 : vector<2x128xf32>
    %392 = arith.divf %390, %391 : vector<2x128xf32>
    %393 = math.tanh %387 : vector<2x128xf32>
    %394 = vector.extract_strided_slice %392 {offsets = [0, 0], sizes = [2, 32], strides = [1, 1]} : vector<2x128xf32> to vector<2x32xf32>
    %395 = vector.extract_strided_slice %392 {offsets = [0, 32], sizes = [2, 32], strides = [1, 1]} : vector<2x128xf32> to vector<2x32xf32>
    %396 = vector.extract_strided_slice %393 {offsets = [0, 64], sizes = [2, 32], strides = [1, 1]} : vector<2x128xf32> to vector<2x32xf32>
    %397 = vector.extract_strided_slice %392 {offsets = [0, 96], sizes = [2, 32], strides = [1, 1]} : vector<2x128xf32> to vector<2x32xf32>
    %398 = arith.mulf %395, %383 : vector<2x32xf32>
    %399 = arith.mulf %394, %396 : vector<2x32xf32>
    %400 = arith.addf %398, %399 : vector<2x32xf32>
    %401 = math.tanh %400 : vector<2x32xf32>
    %402 = arith.mulf %397, %401 : vector<2x32xf32>
    %cst_83 = arith.constant dense<0.000000e+00> : vector<2x128xf32>
    %403 = tpu.matmul %402, %332, %cst_83 {dimension_numbers = #tpu.dot_dimension_numbers<[1], [0], [0], [1], [0, 0, 1, 1], [], []>} : vector<2x32xf32>, vector<32x128xf32>, vector<2x128xf32> -> vector<2x128xf32>
    %404 = arith.addf %331, %403 : vector<2x128xf32>
    %405 = arith.negf %404 : vector<2x128xf32>
    %406 = math.exp %405 : vector<2x128xf32>
    %cst_84 = arith.constant 1.000000e+00 : f32
    %407 = vector.broadcast %cst_84 : f32 to vector<2x128xf32>
    %408 = arith.addf %407, %406 : vector<2x128xf32>
    %409 = arith.divf %407, %408 : vector<2x128xf32>
    %410 = math.tanh %404 : vector<2x128xf32>
    %411 = vector.extract_strided_slice %409 {offsets = [0, 0], sizes = [2, 32], strides = [1, 1]} : vector<2x128xf32> to vector<2x32xf32>
    %412 = vector.extract_strided_slice %409 {offsets = [0, 32], sizes = [2, 32], strides = [1, 1]} : vector<2x128xf32> to vector<2x32xf32>
    %413 = vector.extract_strided_slice %410 {offsets = [0, 64], sizes = [2, 32], strides = [1, 1]} : vector<2x128xf32> to vector<2x32xf32>
    %414 = vector.extract_strided_slice %409 {offsets = [0, 96], sizes = [2, 32], strides = [1, 1]} : vector<2x128xf32> to vector<2x32xf32>
    %415 = arith.mulf %412, %400 : vector<2x32xf32>
    %416 = arith.mulf %411, %413 : vector<2x32xf32>
    %417 = arith.addf %415, %416 : vector<2x32xf32>
    %418 = math.tanh %417 : vector<2x32xf32>
    %419 = arith.mulf %414, %418 : vector<2x32xf32>
    %cst_85 = arith.constant dense<0.000000e+00> : vector<2x128xf32>
    %420 = tpu.matmul %419, %332, %cst_85 {dimension_numbers = #tpu.dot_dimension_numbers<[1], [0], [0], [1], [0, 0, 1, 1], [], []>} : vector<2x32xf32>, vector<32x128xf32>, vector<2x128xf32> -> vector<2x128xf32>
    %421 = arith.addf %331, %420 : vector<2x128xf32>
    %422 = arith.negf %421 : vector<2x128xf32>
    %423 = math.exp %422 : vector<2x128xf32>
    %cst_86 = arith.constant 1.000000e+00 : f32
    %424 = vector.broadcast %cst_86 : f32 to vector<2x128xf32>
    %425 = arith.addf %424, %423 : vector<2x128xf32>
    %426 = arith.divf %424, %425 : vector<2x128xf32>
    %427 = math.tanh %421 : vector<2x128xf32>
    %428 = vector.extract_strided_slice %426 {offsets = [0, 0], sizes = [2, 32], strides = [1, 1]} : vector<2x128xf32> to vector<2x32xf32>
    %429 = vector.extract_strided_slice %426 {offsets = [0, 32], sizes = [2, 32], strides = [1, 1]} : vector<2x128xf32> to vector<2x32xf32>
    %430 = vector.extract_strided_slice %427 {offsets = [0, 64], sizes = [2, 32], strides = [1, 1]} : vector<2x128xf32> to vector<2x32xf32>
    %431 = vector.extract_strided_slice %426 {offsets = [0, 96], sizes = [2, 32], strides = [1, 1]} : vector<2x128xf32> to vector<2x32xf32>
    %432 = arith.mulf %429, %417 : vector<2x32xf32>
    %433 = arith.mulf %428, %430 : vector<2x32xf32>
    %434 = arith.addf %432, %433 : vector<2x32xf32>
    %435 = math.tanh %434 : vector<2x32xf32>
    %436 = arith.mulf %431, %435 : vector<2x32xf32>
    %cst_87 = arith.constant dense<0.000000e+00> : vector<2x128xf32>
    %437 = tpu.matmul %436, %332, %cst_87 {dimension_numbers = #tpu.dot_dimension_numbers<[1], [0], [0], [1], [0, 0, 1, 1], [], []>} : vector<2x32xf32>, vector<32x128xf32>, vector<2x128xf32> -> vector<2x128xf32>
    %438 = arith.addf %331, %437 : vector<2x128xf32>
    %439 = arith.negf %438 : vector<2x128xf32>
    %440 = math.exp %439 : vector<2x128xf32>
    %cst_88 = arith.constant 1.000000e+00 : f32
    %441 = vector.broadcast %cst_88 : f32 to vector<2x128xf32>
    %442 = arith.addf %441, %440 : vector<2x128xf32>
    %443 = arith.divf %441, %442 : vector<2x128xf32>
    %444 = math.tanh %438 : vector<2x128xf32>
    %445 = vector.extract_strided_slice %443 {offsets = [0, 0], sizes = [2, 32], strides = [1, 1]} : vector<2x128xf32> to vector<2x32xf32>
    %446 = vector.extract_strided_slice %443 {offsets = [0, 32], sizes = [2, 32], strides = [1, 1]} : vector<2x128xf32> to vector<2x32xf32>
    %447 = vector.extract_strided_slice %444 {offsets = [0, 64], sizes = [2, 32], strides = [1, 1]} : vector<2x128xf32> to vector<2x32xf32>
    %448 = vector.extract_strided_slice %443 {offsets = [0, 96], sizes = [2, 32], strides = [1, 1]} : vector<2x128xf32> to vector<2x32xf32>
    %449 = arith.mulf %446, %434 : vector<2x32xf32>
    %450 = arith.mulf %445, %447 : vector<2x32xf32>
    %451 = arith.addf %449, %450 : vector<2x32xf32>
    %452 = math.tanh %451 : vector<2x32xf32>
    %453 = arith.mulf %448, %452 : vector<2x32xf32>
    %cst_89 = arith.constant dense<0.000000e+00> : vector<2x128xf32>
    %454 = tpu.matmul %453, %332, %cst_89 {dimension_numbers = #tpu.dot_dimension_numbers<[1], [0], [0], [1], [0, 0, 1, 1], [], []>} : vector<2x32xf32>, vector<32x128xf32>, vector<2x128xf32> -> vector<2x128xf32>
    %455 = arith.addf %331, %454 : vector<2x128xf32>
    %456 = arith.negf %455 : vector<2x128xf32>
    %457 = math.exp %456 : vector<2x128xf32>
    %cst_90 = arith.constant 1.000000e+00 : f32
    %458 = vector.broadcast %cst_90 : f32 to vector<2x128xf32>
    %459 = arith.addf %458, %457 : vector<2x128xf32>
    %460 = arith.divf %458, %459 : vector<2x128xf32>
    %461 = math.tanh %455 : vector<2x128xf32>
    %462 = vector.extract_strided_slice %460 {offsets = [0, 0], sizes = [2, 32], strides = [1, 1]} : vector<2x128xf32> to vector<2x32xf32>
    %463 = vector.extract_strided_slice %460 {offsets = [0, 32], sizes = [2, 32], strides = [1, 1]} : vector<2x128xf32> to vector<2x32xf32>
    %464 = vector.extract_strided_slice %461 {offsets = [0, 64], sizes = [2, 32], strides = [1, 1]} : vector<2x128xf32> to vector<2x32xf32>
    %465 = vector.extract_strided_slice %460 {offsets = [0, 96], sizes = [2, 32], strides = [1, 1]} : vector<2x128xf32> to vector<2x32xf32>
    %466 = arith.mulf %463, %451 : vector<2x32xf32>
    %467 = arith.mulf %462, %464 : vector<2x32xf32>
    %468 = arith.addf %466, %467 : vector<2x32xf32>
    %469 = math.tanh %468 : vector<2x32xf32>
    %470 = arith.mulf %465, %469 : vector<2x32xf32>
    %471 = tpu.concatenate %351, %368, %385, %402, %419, %436, %453, %470 in 0 : vector<2x32xf32>, vector<2x32xf32>, vector<2x32xf32>, vector<2x32xf32>, vector<2x32xf32>, vector<2x32xf32>, vector<2x32xf32>, vector<2x32xf32> -> vector<16x32xf32>
    %c0_91 = arith.constant 0 : index
    %c0_92 = arith.constant 0 : index
    %472 = vector.load %arg16[%c0_91, %c0_92] : memref<32x128xf32, #tpu.memory_space<vmem>>, vector<32x128xf32>
    %cst_93 = arith.constant dense<0.000000e+00> : vector<16x128xf32>
    %473 = tpu.matmul %471, %472, %cst_93 {dimension_numbers = #tpu.dot_dimension_numbers<[1], [0], [0], [1], [0, 0, 1, 1], [], []>} : vector<16x32xf32>, vector<32x128xf32>, vector<16x128xf32> -> vector<16x128xf32>
    %c0_94 = arith.constant 0 : index
    %c0_95 = arith.constant 0 : index
    %474 = vector.load %arg18[%c0_94, %c0_95] : memref<1x128xf32, #tpu.memory_space<vmem>>, vector<1x128xf32>
    %475 = vector.broadcast %474 : vector<1x128xf32> to vector<16x128xf32>
    %476 = arith.addf %473, %475 : vector<16x128xf32>
    %c0_96 = arith.constant 0 : index
    %c0_97 = arith.constant 0 : index
    %477 = vector.load %arg17[%c0_96, %c0_97] : memref<32x128xf32, #tpu.memory_space<vmem>>, vector<32x128xf32>
    %cst_98 = arith.constant 0.000000e+00 : f32
    %478 = vector.broadcast %cst_98 : f32 to vector<2x32xf32>
    %cst_99 = arith.constant 0.000000e+00 : f32
    %479 = vector.broadcast %cst_99 : f32 to vector<2x32xf32>
    %480 = vector.extract_strided_slice %476 {offsets = [0, 0], sizes = [2, 128], strides = [1, 1]} : vector<16x128xf32> to vector<2x128xf32>
    %cst_100 = arith.constant dense<0.000000e+00> : vector<2x128xf32>
    %481 = tpu.matmul %478, %477, %cst_100 {dimension_numbers = #tpu.dot_dimension_numbers<[1], [0], [0], [1], [0, 0, 1, 1], [], []>} : vector<2x32xf32>, vector<32x128xf32>, vector<2x128xf32> -> vector<2x128xf32>
    %482 = arith.addf %480, %481 : vector<2x128xf32>
    %483 = arith.negf %482 : vector<2x128xf32>
    %484 = math.exp %483 : vector<2x128xf32>
    %cst_101 = arith.constant 1.000000e+00 : f32
    %485 = vector.broadcast %cst_101 : f32 to vector<2x128xf32>
    %486 = arith.addf %485, %484 : vector<2x128xf32>
    %487 = arith.divf %485, %486 : vector<2x128xf32>
    %488 = math.tanh %482 : vector<2x128xf32>
    %489 = vector.extract_strided_slice %487 {offsets = [0, 0], sizes = [2, 32], strides = [1, 1]} : vector<2x128xf32> to vector<2x32xf32>
    %490 = vector.extract_strided_slice %487 {offsets = [0, 32], sizes = [2, 32], strides = [1, 1]} : vector<2x128xf32> to vector<2x32xf32>
    %491 = vector.extract_strided_slice %488 {offsets = [0, 64], sizes = [2, 32], strides = [1, 1]} : vector<2x128xf32> to vector<2x32xf32>
    %492 = vector.extract_strided_slice %487 {offsets = [0, 96], sizes = [2, 32], strides = [1, 1]} : vector<2x128xf32> to vector<2x32xf32>
    %493 = arith.mulf %490, %479 : vector<2x32xf32>
    %494 = arith.mulf %489, %491 : vector<2x32xf32>
    %495 = arith.addf %493, %494 : vector<2x32xf32>
    %496 = math.tanh %495 : vector<2x32xf32>
    %497 = arith.mulf %492, %496 : vector<2x32xf32>
    %498 = vector.extract_strided_slice %476 {offsets = [2, 0], sizes = [2, 128], strides = [1, 1]} : vector<16x128xf32> to vector<2x128xf32>
    %cst_102 = arith.constant dense<0.000000e+00> : vector<2x128xf32>
    %499 = tpu.matmul %497, %477, %cst_102 {dimension_numbers = #tpu.dot_dimension_numbers<[1], [0], [0], [1], [0, 0, 1, 1], [], []>} : vector<2x32xf32>, vector<32x128xf32>, vector<2x128xf32> -> vector<2x128xf32>
    %500 = arith.addf %498, %499 : vector<2x128xf32>
    %501 = arith.negf %500 : vector<2x128xf32>
    %502 = math.exp %501 : vector<2x128xf32>
    %cst_103 = arith.constant 1.000000e+00 : f32
    %503 = vector.broadcast %cst_103 : f32 to vector<2x128xf32>
    %504 = arith.addf %503, %502 : vector<2x128xf32>
    %505 = arith.divf %503, %504 : vector<2x128xf32>
    %506 = math.tanh %500 : vector<2x128xf32>
    %507 = vector.extract_strided_slice %505 {offsets = [0, 0], sizes = [2, 32], strides = [1, 1]} : vector<2x128xf32> to vector<2x32xf32>
    %508 = vector.extract_strided_slice %505 {offsets = [0, 32], sizes = [2, 32], strides = [1, 1]} : vector<2x128xf32> to vector<2x32xf32>
    %509 = vector.extract_strided_slice %506 {offsets = [0, 64], sizes = [2, 32], strides = [1, 1]} : vector<2x128xf32> to vector<2x32xf32>
    %510 = vector.extract_strided_slice %505 {offsets = [0, 96], sizes = [2, 32], strides = [1, 1]} : vector<2x128xf32> to vector<2x32xf32>
    %511 = arith.mulf %508, %495 : vector<2x32xf32>
    %512 = arith.mulf %507, %509 : vector<2x32xf32>
    %513 = arith.addf %511, %512 : vector<2x32xf32>
    %514 = math.tanh %513 : vector<2x32xf32>
    %515 = arith.mulf %510, %514 : vector<2x32xf32>
    %516 = vector.extract_strided_slice %476 {offsets = [4, 0], sizes = [2, 128], strides = [1, 1]} : vector<16x128xf32> to vector<2x128xf32>
    %cst_104 = arith.constant dense<0.000000e+00> : vector<2x128xf32>
    %517 = tpu.matmul %515, %477, %cst_104 {dimension_numbers = #tpu.dot_dimension_numbers<[1], [0], [0], [1], [0, 0, 1, 1], [], []>} : vector<2x32xf32>, vector<32x128xf32>, vector<2x128xf32> -> vector<2x128xf32>
    %518 = arith.addf %516, %517 : vector<2x128xf32>
    %519 = arith.negf %518 : vector<2x128xf32>
    %520 = math.exp %519 : vector<2x128xf32>
    %cst_105 = arith.constant 1.000000e+00 : f32
    %521 = vector.broadcast %cst_105 : f32 to vector<2x128xf32>
    %522 = arith.addf %521, %520 : vector<2x128xf32>
    %523 = arith.divf %521, %522 : vector<2x128xf32>
    %524 = math.tanh %518 : vector<2x128xf32>
    %525 = vector.extract_strided_slice %523 {offsets = [0, 0], sizes = [2, 32], strides = [1, 1]} : vector<2x128xf32> to vector<2x32xf32>
    %526 = vector.extract_strided_slice %523 {offsets = [0, 32], sizes = [2, 32], strides = [1, 1]} : vector<2x128xf32> to vector<2x32xf32>
    %527 = vector.extract_strided_slice %524 {offsets = [0, 64], sizes = [2, 32], strides = [1, 1]} : vector<2x128xf32> to vector<2x32xf32>
    %528 = vector.extract_strided_slice %523 {offsets = [0, 96], sizes = [2, 32], strides = [1, 1]} : vector<2x128xf32> to vector<2x32xf32>
    %529 = arith.mulf %526, %513 : vector<2x32xf32>
    %530 = arith.mulf %525, %527 : vector<2x32xf32>
    %531 = arith.addf %529, %530 : vector<2x32xf32>
    %532 = math.tanh %531 : vector<2x32xf32>
    %533 = arith.mulf %528, %532 : vector<2x32xf32>
    %534 = vector.extract_strided_slice %476 {offsets = [6, 0], sizes = [2, 128], strides = [1, 1]} : vector<16x128xf32> to vector<2x128xf32>
    %cst_106 = arith.constant dense<0.000000e+00> : vector<2x128xf32>
    %535 = tpu.matmul %533, %477, %cst_106 {dimension_numbers = #tpu.dot_dimension_numbers<[1], [0], [0], [1], [0, 0, 1, 1], [], []>} : vector<2x32xf32>, vector<32x128xf32>, vector<2x128xf32> -> vector<2x128xf32>
    %536 = arith.addf %534, %535 : vector<2x128xf32>
    %537 = arith.negf %536 : vector<2x128xf32>
    %538 = math.exp %537 : vector<2x128xf32>
    %cst_107 = arith.constant 1.000000e+00 : f32
    %539 = vector.broadcast %cst_107 : f32 to vector<2x128xf32>
    %540 = arith.addf %539, %538 : vector<2x128xf32>
    %541 = arith.divf %539, %540 : vector<2x128xf32>
    %542 = math.tanh %536 : vector<2x128xf32>
    %543 = vector.extract_strided_slice %541 {offsets = [0, 0], sizes = [2, 32], strides = [1, 1]} : vector<2x128xf32> to vector<2x32xf32>
    %544 = vector.extract_strided_slice %541 {offsets = [0, 32], sizes = [2, 32], strides = [1, 1]} : vector<2x128xf32> to vector<2x32xf32>
    %545 = vector.extract_strided_slice %542 {offsets = [0, 64], sizes = [2, 32], strides = [1, 1]} : vector<2x128xf32> to vector<2x32xf32>
    %546 = vector.extract_strided_slice %541 {offsets = [0, 96], sizes = [2, 32], strides = [1, 1]} : vector<2x128xf32> to vector<2x32xf32>
    %547 = arith.mulf %544, %531 : vector<2x32xf32>
    %548 = arith.mulf %543, %545 : vector<2x32xf32>
    %549 = arith.addf %547, %548 : vector<2x32xf32>
    %550 = math.tanh %549 : vector<2x32xf32>
    %551 = arith.mulf %546, %550 : vector<2x32xf32>
    %552 = vector.extract_strided_slice %476 {offsets = [8, 0], sizes = [2, 128], strides = [1, 1]} : vector<16x128xf32> to vector<2x128xf32>
    %cst_108 = arith.constant dense<0.000000e+00> : vector<2x128xf32>
    %553 = tpu.matmul %551, %477, %cst_108 {dimension_numbers = #tpu.dot_dimension_numbers<[1], [0], [0], [1], [0, 0, 1, 1], [], []>} : vector<2x32xf32>, vector<32x128xf32>, vector<2x128xf32> -> vector<2x128xf32>
    %554 = arith.addf %552, %553 : vector<2x128xf32>
    %555 = arith.negf %554 : vector<2x128xf32>
    %556 = math.exp %555 : vector<2x128xf32>
    %cst_109 = arith.constant 1.000000e+00 : f32
    %557 = vector.broadcast %cst_109 : f32 to vector<2x128xf32>
    %558 = arith.addf %557, %556 : vector<2x128xf32>
    %559 = arith.divf %557, %558 : vector<2x128xf32>
    %560 = math.tanh %554 : vector<2x128xf32>
    %561 = vector.extract_strided_slice %559 {offsets = [0, 0], sizes = [2, 32], strides = [1, 1]} : vector<2x128xf32> to vector<2x32xf32>
    %562 = vector.extract_strided_slice %559 {offsets = [0, 32], sizes = [2, 32], strides = [1, 1]} : vector<2x128xf32> to vector<2x32xf32>
    %563 = vector.extract_strided_slice %560 {offsets = [0, 64], sizes = [2, 32], strides = [1, 1]} : vector<2x128xf32> to vector<2x32xf32>
    %564 = vector.extract_strided_slice %559 {offsets = [0, 96], sizes = [2, 32], strides = [1, 1]} : vector<2x128xf32> to vector<2x32xf32>
    %565 = arith.mulf %562, %549 : vector<2x32xf32>
    %566 = arith.mulf %561, %563 : vector<2x32xf32>
    %567 = arith.addf %565, %566 : vector<2x32xf32>
    %568 = math.tanh %567 : vector<2x32xf32>
    %569 = arith.mulf %564, %568 : vector<2x32xf32>
    %570 = vector.extract_strided_slice %476 {offsets = [10, 0], sizes = [2, 128], strides = [1, 1]} : vector<16x128xf32> to vector<2x128xf32>
    %cst_110 = arith.constant dense<0.000000e+00> : vector<2x128xf32>
    %571 = tpu.matmul %569, %477, %cst_110 {dimension_numbers = #tpu.dot_dimension_numbers<[1], [0], [0], [1], [0, 0, 1, 1], [], []>} : vector<2x32xf32>, vector<32x128xf32>, vector<2x128xf32> -> vector<2x128xf32>
    %572 = arith.addf %570, %571 : vector<2x128xf32>
    %573 = arith.negf %572 : vector<2x128xf32>
    %574 = math.exp %573 : vector<2x128xf32>
    %cst_111 = arith.constant 1.000000e+00 : f32
    %575 = vector.broadcast %cst_111 : f32 to vector<2x128xf32>
    %576 = arith.addf %575, %574 : vector<2x128xf32>
    %577 = arith.divf %575, %576 : vector<2x128xf32>
    %578 = math.tanh %572 : vector<2x128xf32>
    %579 = vector.extract_strided_slice %577 {offsets = [0, 0], sizes = [2, 32], strides = [1, 1]} : vector<2x128xf32> to vector<2x32xf32>
    %580 = vector.extract_strided_slice %577 {offsets = [0, 32], sizes = [2, 32], strides = [1, 1]} : vector<2x128xf32> to vector<2x32xf32>
    %581 = vector.extract_strided_slice %578 {offsets = [0, 64], sizes = [2, 32], strides = [1, 1]} : vector<2x128xf32> to vector<2x32xf32>
    %582 = vector.extract_strided_slice %577 {offsets = [0, 96], sizes = [2, 32], strides = [1, 1]} : vector<2x128xf32> to vector<2x32xf32>
    %583 = arith.mulf %580, %567 : vector<2x32xf32>
    %584 = arith.mulf %579, %581 : vector<2x32xf32>
    %585 = arith.addf %583, %584 : vector<2x32xf32>
    %586 = math.tanh %585 : vector<2x32xf32>
    %587 = arith.mulf %582, %586 : vector<2x32xf32>
    %588 = vector.extract_strided_slice %476 {offsets = [12, 0], sizes = [2, 128], strides = [1, 1]} : vector<16x128xf32> to vector<2x128xf32>
    %cst_112 = arith.constant dense<0.000000e+00> : vector<2x128xf32>
    %589 = tpu.matmul %587, %477, %cst_112 {dimension_numbers = #tpu.dot_dimension_numbers<[1], [0], [0], [1], [0, 0, 1, 1], [], []>} : vector<2x32xf32>, vector<32x128xf32>, vector<2x128xf32> -> vector<2x128xf32>
    %590 = arith.addf %588, %589 : vector<2x128xf32>
    %591 = arith.negf %590 : vector<2x128xf32>
    %592 = math.exp %591 : vector<2x128xf32>
    %cst_113 = arith.constant 1.000000e+00 : f32
    %593 = vector.broadcast %cst_113 : f32 to vector<2x128xf32>
    %594 = arith.addf %593, %592 : vector<2x128xf32>
    %595 = arith.divf %593, %594 : vector<2x128xf32>
    %596 = math.tanh %590 : vector<2x128xf32>
    %597 = vector.extract_strided_slice %595 {offsets = [0, 0], sizes = [2, 32], strides = [1, 1]} : vector<2x128xf32> to vector<2x32xf32>
    %598 = vector.extract_strided_slice %595 {offsets = [0, 32], sizes = [2, 32], strides = [1, 1]} : vector<2x128xf32> to vector<2x32xf32>
    %599 = vector.extract_strided_slice %596 {offsets = [0, 64], sizes = [2, 32], strides = [1, 1]} : vector<2x128xf32> to vector<2x32xf32>
    %600 = vector.extract_strided_slice %595 {offsets = [0, 96], sizes = [2, 32], strides = [1, 1]} : vector<2x128xf32> to vector<2x32xf32>
    %601 = arith.mulf %598, %585 : vector<2x32xf32>
    %602 = arith.mulf %597, %599 : vector<2x32xf32>
    %603 = arith.addf %601, %602 : vector<2x32xf32>
    %604 = math.tanh %603 : vector<2x32xf32>
    %605 = arith.mulf %600, %604 : vector<2x32xf32>
    %606 = vector.extract_strided_slice %476 {offsets = [14, 0], sizes = [2, 128], strides = [1, 1]} : vector<16x128xf32> to vector<2x128xf32>
    %cst_114 = arith.constant dense<0.000000e+00> : vector<2x128xf32>
    %607 = tpu.matmul %605, %477, %cst_114 {dimension_numbers = #tpu.dot_dimension_numbers<[1], [0], [0], [1], [0, 0, 1, 1], [], []>} : vector<2x32xf32>, vector<32x128xf32>, vector<2x128xf32> -> vector<2x128xf32>
    %608 = arith.addf %606, %607 : vector<2x128xf32>
    %609 = arith.negf %608 : vector<2x128xf32>
    %610 = math.exp %609 : vector<2x128xf32>
    %cst_115 = arith.constant 1.000000e+00 : f32
    %611 = vector.broadcast %cst_115 : f32 to vector<2x128xf32>
    %612 = arith.addf %611, %610 : vector<2x128xf32>
    %613 = arith.divf %611, %612 : vector<2x128xf32>
    %614 = math.tanh %608 : vector<2x128xf32>
    %615 = vector.extract_strided_slice %613 {offsets = [0, 0], sizes = [2, 32], strides = [1, 1]} : vector<2x128xf32> to vector<2x32xf32>
    %616 = vector.extract_strided_slice %613 {offsets = [0, 32], sizes = [2, 32], strides = [1, 1]} : vector<2x128xf32> to vector<2x32xf32>
    %617 = vector.extract_strided_slice %614 {offsets = [0, 64], sizes = [2, 32], strides = [1, 1]} : vector<2x128xf32> to vector<2x32xf32>
    %618 = vector.extract_strided_slice %613 {offsets = [0, 96], sizes = [2, 32], strides = [1, 1]} : vector<2x128xf32> to vector<2x32xf32>
    %619 = arith.mulf %616, %603 : vector<2x32xf32>
    %620 = arith.mulf %615, %617 : vector<2x32xf32>
    %621 = arith.addf %619, %620 : vector<2x32xf32>
    %622 = math.tanh %621 : vector<2x32xf32>
    %623 = arith.mulf %618, %622 : vector<2x32xf32>
    %624 = tpu.concatenate %497, %515, %533, %551, %569, %587, %605, %623 in 1 : vector<2x32xf32>, vector<2x32xf32>, vector<2x32xf32>, vector<2x32xf32>, vector<2x32xf32>, vector<2x32xf32>, vector<2x32xf32>, vector<2x32xf32> -> vector<2x256xf32>
    %c0_116 = arith.constant 0 : index
    %c0_117 = arith.constant 0 : index
    %625 = vector.load %arg19[%c0_116, %c0_117] : memref<256x512xf32, #tpu.memory_space<vmem>>, vector<256x512xf32>
    %cst_118 = arith.constant dense<0.000000e+00> : vector<2x512xf32>
    %626 = tpu.matmul %624, %625, %cst_118 {dimension_numbers = #tpu.dot_dimension_numbers<[1], [0], [0], [1], [0, 0, 1, 1], [], []>} : vector<2x256xf32>, vector<256x512xf32>, vector<2x512xf32> -> vector<2x512xf32>
    %c0_119 = arith.constant 0 : index
    %c0_120 = arith.constant 0 : index
    %627 = vector.load %arg20[%c0_119, %c0_120] : memref<1x512xf32, #tpu.memory_space<vmem>>, vector<1x512xf32>
    %628 = vector.broadcast %627 : vector<1x512xf32> to vector<2x512xf32>
    %629 = arith.addf %626, %628 : vector<2x512xf32>
    %c0_121 = arith.constant 0 : index
    %c0_122 = arith.constant 0 : index
    %630 = vector.load %arg22[%c0_121, %c0_122] : memref<2x512xf32, #tpu.memory_space<vmem>>, vector<2x512xf32>
    tpu.vector_store %arg22[%c0_121, %c0_122], %629 {strides = array<i32>} : memref<2x512xf32, #tpu.memory_space<vmem>>, vector<2x512xf32>,
    return
  }
  func.func @transform_0(%arg0: i32) -> (i32, i32) {
    %c0_i32 = arith.constant 0 : i32
    %c0_i32_0 = arith.constant 0 : i32
    %c0_i32_1 = arith.constant 0 : i32
    return %c0_i32, %c0_i32_0 : i32, i32
  }
  func.func @transform_1(%arg0: i32) -> (i32, i32) {
    %c0_i32 = arith.constant 0 : i32
    %c0_i32_0 = arith.constant 0 : i32
    %c0_i32_1 = arith.constant 0 : i32
    return %c0_i32, %c0_i32_0 : i32, i32
  }
  func.func @transform_2(%arg0: i32) -> (i32, i32) {
    %c0_i32 = arith.constant 0 : i32
    %c0_i32_0 = arith.constant 0 : i32
    %c0_i32_1 = arith.constant 0 : i32
    return %c0_i32, %c0_i32_0 : i32, i32
  }
  func.func @transform_3(%arg0: i32) -> (i32, i32) {
    %c0_i32 = arith.constant 0 : i32
    %c0_i32_0 = arith.constant 0 : i32
    %c0_i32_1 = arith.constant 0 : i32
    return %c0_i32, %c0_i32_0 : i32, i32
  }
  func.func @transform_4(%arg0: i32) -> (i32, i32) {
    %c0_i32 = arith.constant 0 : i32
    %c0_i32_0 = arith.constant 0 : i32
    %c0_i32_1 = arith.constant 0 : i32
    return %c0_i32, %c0_i32_0 : i32, i32
  }
  func.func @transform_5(%arg0: i32) -> (i32, i32) {
    %c0_i32 = arith.constant 0 : i32
    %c0_i32_0 = arith.constant 0 : i32
    %c0_i32_1 = arith.constant 0 : i32
    return %c0_i32, %c0_i32_0 : i32, i32
  }
  func.func @transform_6(%arg0: i32) -> (i32, i32) {
    %c0_i32 = arith.constant 0 : i32
    %c0_i32_0 = arith.constant 0 : i32
    %c0_i32_1 = arith.constant 0 : i32
    return %c0_i32, %c0_i32_0 : i32, i32
  }
  func.func @transform_7(%arg0: i32) -> (i32, i32) {
    %c0_i32 = arith.constant 0 : i32
    %c0_i32_0 = arith.constant 0 : i32
    %c0_i32_1 = arith.constant 0 : i32
    return %c0_i32, %c0_i32_0 : i32, i32
  }
  func.func @transform_8(%arg0: i32) -> (i32, i32) {
    %c0_i32 = arith.constant 0 : i32
    %c0_i32_0 = arith.constant 0 : i32
    %c0_i32_1 = arith.constant 0 : i32
    return %c0_i32, %c0_i32_0 : i32, i32
  }
  func.func @transform_9(%arg0: i32) -> (i32, i32) {
    %c0_i32 = arith.constant 0 : i32
    %c0_i32_0 = arith.constant 0 : i32
    %c0_i32_1 = arith.constant 0 : i32
    return %c0_i32, %c0_i32_0 : i32, i32
  }
  func.func @transform_10(%arg0: i32) -> (i32, i32) {
    %c0_i32 = arith.constant 0 : i32
    %c0_i32_0 = arith.constant 0 : i32
    %c0_i32_1 = arith.constant 0 : i32
    return %c0_i32, %c0_i32_0 : i32, i32
  }
  func.func @transform_11(%arg0: i32) -> (i32, i32) {
    %c0_i32 = arith.constant 0 : i32
    %c0_i32_0 = arith.constant 0 : i32
    %c0_i32_1 = arith.constant 0 : i32
    return %c0_i32, %c0_i32_0 : i32, i32
  }
  func.func @transform_12(%arg0: i32) -> (i32, i32) {
    %c0_i32 = arith.constant 0 : i32
    %c0_i32_0 = arith.constant 0 : i32
    %c0_i32_1 = arith.constant 0 : i32
    return %c0_i32, %c0_i32_0 : i32, i32
  }
  func.func @transform_13(%arg0: i32) -> (i32, i32) {
    %c0_i32 = arith.constant 0 : i32
    %c0_i32_0 = arith.constant 0 : i32
    %c0_i32_1 = arith.constant 0 : i32
    return %c0_i32, %c0_i32_0 : i32, i32
  }
  func.func @transform_14(%arg0: i32) -> (i32, i32) {
    %c0_i32 = arith.constant 0 : i32
    %c0_i32_0 = arith.constant 0 : i32
    %c0_i32_1 = arith.constant 0 : i32
    return %c0_i32, %c0_i32_0 : i32, i32
  }
  func.func @transform_15(%arg0: i32) -> (i32, i32) {
    %c0_i32 = arith.constant 0 : i32
    %c0_i32_0 = arith.constant 0 : i32
    %c0_i32_1 = arith.constant 0 : i32
    return %c0_i32, %c0_i32_0 : i32, i32
  }
  func.func @transform_16(%arg0: i32) -> (i32, i32) {
    %c0_i32 = arith.constant 0 : i32
    %c0_i32_0 = arith.constant 0 : i32
    %c0_i32_1 = arith.constant 0 : i32
    return %c0_i32, %c0_i32_0 : i32, i32
  }
  func.func @transform_17(%arg0: i32) -> (i32, i32) {
    %c0_i32 = arith.constant 0 : i32
    %c0_i32_0 = arith.constant 0 : i32
    %c0_i32_1 = arith.constant 0 : i32
    return %c0_i32, %c0_i32_0 : i32, i32
  }
  func.func @transform_18(%arg0: i32) -> (i32, i32) {
    %c0_i32 = arith.constant 0 : i32
    %c0_i32_0 = arith.constant 0 : i32
    %c0_i32_1 = arith.constant 0 : i32
    return %c0_i32, %c0_i32_0 : i32, i32
  }
  func.func @transform_19(%arg0: i32) -> (i32, i32) {
    %c0_i32 = arith.constant 0 : i32
    %c0_i32_0 = arith.constant 0 : i32
    %c0_i32_1 = arith.constant 0 : i32
    return %c0_i32, %c0_i32_0 : i32, i32
  }
  func.func @transform_20(%arg0: i32) -> (i32, i32) {
    %c0_i32 = arith.constant 0 : i32
    %c0_i32_0 = arith.constant 0 : i32
    %c0_i32_1 = arith.constant 0 : i32
    return %c0_i32, %c0_i32_0 : i32, i32
  }
  func.func @transform_21(%arg0: i32) -> (i32, i32) {
    %c0_i32 = arith.constant 0 : i32
    %c0_i32_0 = arith.constant 0 : i32
    %c0_i32_1 = arith.constant 0 : i32
    return %c0_i32, %c0_i32_0 : i32, i32
  }
}

</mosaic_0001>

<bundles_post_ra>
// kernel: vae_lstm_forward.1
= control target key start
LH: loop header
LB: loop body
LE: loop exit
PB: predicated region body
PF: predicated region fallthrough
CT: control target
= control target key end

     0   :  { %v5670_v3 = vmov 0.0|0.0   ;;  %vm83_vm0 = vcmask 441344   ;;  %vm5671_vm1 = vmmov 0   ;;  %v5672_v7 = vmov 0.0   ;;  %s5673_s27 = smov 64   ;;  %s5675_s30 = smov 16   ;;  %s6849_s2 = inlined_call_operand.vmem [shape: f32[54,128], index: 2, kind: input, shape index: {}]   ;;  %s6850_s3 = inlined_call_operand.vmem [shape: f32[32,128], index: 3, kind: input, shape index: {}]   ;;  %s6851_s0 = inlined_call_operand.vmem [shape: f32[16,54], index: 0, kind: input, shape index: {}]   ;;  %s6852_s4 = inlined_call_operand.vmem [shape: f32[1,128], index: 4, kind: input, shape index: {}]   ;;  %s6853_s5 = inlined_call_operand.vmem [shape: f32[32,128], index: 5, kind: input, shape index: {}]   ;;  %s6854_s6 = inlined_call_operand.vmem [shape: f32[32,128], index: 6, kind: input, shape index: {}]   ;;  %s6855_s7 = inlined_call_operand.vmem [shape: f32[1,128], index: 7, kind: input, shape index: {}]   ;;  %s6856_s8 = inlined_call_operand.vmem [shape: f32[32,32], index: 8, kind: input, shape index: {}]   ;;  %s6857_s1 = inlined_call_operand.vmem [shape: f32[2,16], index: 1, kind: input, shape index: {}]   ;;  %s6858_s10 = inlined_call_operand.vmem [shape: f32[16,32], index: 10, kind: input, shape index: {}]   ;;  %s6859_s9 = inlined_call_operand.vmem [shape: f32[1,32], index: 9, kind: input, shape index: {}]   ;;  %s6860_s20 = inlined_call_operand.vmem [shape: f32[2,32], index: 20, kind: output, shape index: {0}]   ;;  %s6861_s12 = inlined_call_operand.vmem [shape: f32[32,128], index: 12, kind: input, shape index: {}]   ;;  %s6862_s13 = inlined_call_operand.vmem [shape: f32[32,128], index: 13, kind: input, shape index: {}]   ;;  %s6863_s11 = inlined_call_operand.vmem [shape: f32[1,32], index: 11, kind: input, shape index: {}]   ;;  %s6864_s14 = inlined_call_operand.vmem [shape: f32[1,128], index: 14, kind: input, shape index: {}]   ;;  %s6865_s15 = inlined_call_operand.vmem [shape: f32[32,128], index: 15, kind: input, shape index: {}]   ;;  %s6866_s16 = inlined_call_operand.vmem [shape: f32[32,128], index: 16, kind: input, shape index: {}]   ;;  %s6867_s17 = inlined_call_operand.vmem [shape: f32[1,128], index: 17, kind: input, shape index: {}]   ;;  %s6868_s18 = inlined_call_operand.vmem [shape: f32[256,512], index: 18, kind: input, shape index: {}]   ;;  %s6869_s19 = inlined_call_operand.vmem [shape: f32[1,512], index: 19, kind: input, shape index: {}]   ;;  %s6870_s21 = inlined_call_operand.vmem [shape: f32[2,512], index: 21, kind: output, shape index: {1}]  }
   0x1   :  { %6876 = sst [smem:[#allocation2_spill]] %s6849_s2  ;;  %5042 = vmatprep.subr.bf16.mxu1 %v5670_v3  ;;  %4635 = vmatprep.mubr.msk.f32.mxu1 %vm5671_vm1, %v5672_v7  ;;  %vm90_vm2 = vcmask 1045504   ;;  %vm173_vm3 = vcmask 261120   ;;  %vm1016_vm4 = vcmask 1041408   ;;  %vm1018_vm5 = vcmask 1043456  }
   0x2   :  { %6877 = sst [smem:[#allocation3_spill]] %s6850_s3  ;;  %s6882_s26 = sld [smem:[#allocation2_spill]]  ;;  %vm2050_vm6 = vcmask 254976   ;;  %vm2075_vm7 = vcmask 130048   ;;  %vm4010_vm8 = vcmask 523264   ;;  %vm4012_vm9 = vcmask 785408  }
   0x3   :  { %6878 = sst [smem:[#allocation4_spill]] %s6851_s0  ;;  %s6883_s0 = sld [smem:[#allocation3_spill]] }
   0x4   :  { %6879 = sst [smem:[#allocation5_spill]] %s6852_s4  ;;  %s6884_s29 = sld [smem:[#allocation4_spill]] }
   0x5   :  { %6880 = sst [smem:[#allocation6_spill]] %s6853_s5  ;;  %s6885_s25 = sld [smem:[#allocation5_spill]] }
   0x6   :  { %6881 = sst [smem:[#allocation7_spill]] %s6854_s6  ;;  %s5674_s4 = smov 32  }
   0x7   :  { %s6886_s2 = sld [smem:[#allocation6_spill]]  ;;  %s6887_s23 = sld [smem:[#allocation7_spill]] }
   0x8   :  { %v69_v0 = vld [vmem:[%s6882_s26] sm:$0xff]  ;;  %v70_v1 = vld [vmem:[%s6882_s26 + $0x8] sm:$0xff]  ;;  %v71_v2 = vld [vmem:[%s6882_s26 + $0x10] sm:$0xff] }
   0x9   :  { %v5030_v4 = vpack.c.bf16 %v70_v1, %v69_v0  ;;  %v72_v5 = vld [vmem:[%s6882_s26 + $0x18] sm:$0xff]  ;;  %v73_v6 = vld [vmem:[%s6882_s26 + $0x20] sm:$0xff]  ;;  %v74_v9 = vld [vmem:[%s6882_s26 + $0x28] sm:$0xff] }
   0xa   :  { %v5034_v8 = vpack.c.bf16 %v72_v5, %v71_v2  ;;  %v169_v10 = vld [vmem:[%s6883_s0] sm:$0xff]  ;;  %v170_v11 = vld [vmem:[%s6883_s0 + $0x8] sm:$0xff]  ;;  %v171_v14 = vld [vmem:[%s6883_s0 + $0x10] sm:$0xff]  ;;  %v5038_v16 = vpack.c.bf16 %v74_v9, %v73_v6 }
   0xb   :  { %5031 = vmatprep.subr.bf16.mxu0 %v5030_v4  ;;  %v5816_v12 = vpack.c.bf16 %v170_v11, %v169_v10  ;;  %v67_v13 = vld [vmem:[%s6884_s29] sm:$0xff]  ;;  %v172_v15 = vld [vmem:[%s6883_s0 + $0x18] sm:$0xff]  ;;  %v75_v18 = vld [vmem:[%s6882_s26 + $0x30] sm:$0x3f]  ;;  %s5677_s26 = smov 96  }
   0xc   :  { %5033 = vmatpush3.bf16.msra.mxu0 %v5030_v4  ;;  %4624 = vmatprep.mubr.msk.f32.mxu0 %vm83_vm0, %v67_v13  ;;  %v5829_v17 = vpack.c.bf16 %v172_v15, %v171_v14  ;;  %v68_v19 = vld [vmem:[%s6884_s29 + $0x8] sm:$0xff]  ;;  %v4340_v22 = vld [vmem:[%s6885_s25] ss:$0 sm:$0xff] }
   0xd   :  { %5035 = vmatprep.subr.bf16.mxu0 %v5034_v8  ;;  %5044 = vmatpush3.bf16.msra.mxu1 %v5816_v12 }
   0xe   :  { %5045 = vmatprep.subr.bf16.mxu1 %v5670_v3 }
  0x10   :  { %5037 = vmatpush3.bf16.msra.mxu0 %v5034_v8 }
  0x11   :  { %5039 = vmatprep.subr.bf16.mxu0 %v5038_v16  ;;  %5047 = vmatpush3.bf16.msra.mxu1 %v5829_v17 }
  0x12   :  { %5048 = vmatprep.subr.bf16.mxu1 %v5670_v3 }
  0x14   :  { %5041 = vmatpush3.bf16.msra.mxu0 %v5038_v16  ;;  %4636 = vmatmul.mubr.f32.vlgmr.msra.gmra.mrb[0].mxu1 %v5672_v7 }
  0x15   :  { %4622 = vmatprep.subr.msk.mxu0 %vm90_vm2, %v75_v18  ;;  %5050 = vmatpush3.bf16.msra.mxu1 %v5816_v12 }
  0x16   :  { %5051 = vmatprep.subr.bf16.mxu1 %v5670_v3  ;;  %4646 = vmatprep.mubr.msk.f32.mxu1 %vm5671_vm1, %v5672_v7 }
  0x18   :  { %4623 = vmatpush3.msk.msra.mxu0 %vm90_vm2, %v75_v18 }
  0x19   :  { %4625 = vmatmul.mubr.msk.f32.vlgmr.msra.gmra.mrb[0].mxu0 %vm83_vm0, %v68_v19  ;;  %5053 = vmatpush3.bf16.msra.mxu1 %v5829_v17 }
  0x1a   :  { %5054 = vmatprep.subr.bf16.mxu0 %v5670_v3  ;;  %4657 = vmatprep.mubr.msk.f32.mxu0 %vm5671_vm1, %v5672_v7 }
  0x1b   :  { %5056 = vmatpush3.bf16.msra.mxu0 %v5816_v12  ;;  %5060 = vmatprep.subr.bf16.mxu1 %v5670_v3 }
  0x1c   :  { %5057 = vmatprep.subr.bf16.mxu0 %v5670_v3 }
  0x1f   :  { %5059 = vmatpush3.bf16.msra.mxu0 %v5829_v17 }
  0x20   :  { %5066 = vmatprep.subr.bf16.mxu0 %v5670_v3 }
  0xe7   :  { %v243_v20 = vpop.f32.mrb[0].mxu1 }
  0xe8   :  { %v4637_v21 = vpop.f32.mrb[1].mxu1 }
  0xec   :  { %v4626_v23 = vpop.f32.mrb[0].mxu0 }
  0xed   :  { %v5860_v24 = vadd.f32 %v4626_v23, %v4340_v22  ;;  %v160_v25 = vpop.f32.mrb[1].mxu0 }
  0xee   :  { %v5862_v26 = vadd.f32 %v4340_v22, %v160_v25 }
  0xf0   :  { %v247_v27 = vadd.f32 %v243_v20, %v5862_v26 }
  0xf2   :  { %5412 = vtanh.f32 %v247_v27  ;;  %v4344_v29 = vmul.f32 -1.442695, %v247_v27 }
  0xf4   :  { %5414 = vpow2.f32 %v4344_v29 }
  0xfc   :  { %v5413_v28 = vpop.eup %5412 }
  0xfd   :  { %257 = vrot.lane.b32.xlu0 %v5413_v28, %s5673_s27 }
  0xfe   :  { %v5415_v30 = vpop.eup %5414 }
  0xff   :  { %v251_v31 = vadd.f32 1.0, %v5415_v30 }
 0x101   :  { %5416 = vrcp.f32 %v251_v31 }
 0x10b   :  { %v5417_v32 = vpop.eup %5416 }
 0x10c   :  { %v255_v35 = vmul.f32 0.0, %v5417_v32 }
 0x16f   :  { %v258_v33 = vpop.permute.xlu0 %257 }
 0x170   :  { %v260_v34 = vmul.f32 %v5417_v32, %v258_v33 }
 0x172   :  { %262 = vrot.lane.b32.xlu0 %v260_v34, %s5674_s4 }
 0x1e4   :  { %v263_v36 = vpop.permute.xlu0 %262 }
 0x1e5   :  { %v265_v37 = vadd.f32 %v263_v36, %v255_v35 }
 0x1e7   :  { %5418 = vtanh.f32 %v265_v37  ;;  %v359_v53 = vrot.slane %v265_v37, 6 }
 0x1f1   :  { %v5419_v38 = vpop.eup %5418 }
 0x1f2   :  { %268 = vrot.lane.b32.xlu1 %v5419_v38, %s5673_s27 }
 0x264   :  { %v269_v39 = vpop.permute.xlu1 %268 }
 0x265   :  { %v5868_v40 = vmul.f32 %v5417_v32, %v269_v39 }
 0x267   :  { %273 = vrot.lane.b32.xlu1 %v5868_v40, %s5674_s4 }
 0x2d9   :  { %v274_v41 = vpop.permute.xlu1 %273 }
 0x2da   :  { %4647 = vmatmul.mubr.msk.f32.vlgmr.msra.gmra.mrb[2].mxu1 %vm173_vm3, %v274_v41 }
 0x2db   :  { %5062 = vmatpush3.bf16.msra.mxu1 %v5816_v12  ;;  %4668 = vmatprep.mubr.msk.f32.mxu1 %vm5671_vm1, %v5672_v7 }
 0x2dc   :  { %5063 = vmatprep.subr.bf16.mxu1 %v5670_v3 }
 0x2df   :  { %5065 = vmatpush3.bf16.msra.mxu1 %v5829_v17 }
 0x2e0   :  { %5072 = vmatprep.subr.bf16.mxu1 %v5670_v3 }
 0x3ad   :  { %v343_v42 = vpop.f32.mrb[2].mxu1 }
 0x3ae   :  { %v348_v43 = vrot.slane %v343_v42, 6  ;;  %v4648_v44 = vpop.f32.mrb[3].mxu1 }
 0x3b0   :  { %v350_v45 = vadd.f32 %v348_v43, %v5862_v26 }
 0x3b2   :  { %5420 = vtanh.f32 %v350_v45  ;;  %v4346_v47 = vmul.f32 -1.442695, %v350_v45 }
 0x3b4   :  { %5422 = vpow2.f32 %v4346_v47 }
 0x3bc   :  { %v5421_v46 = vpop.eup %5420 }
 0x3bd   :  { %363 = vrot.lane.b32.xlu0 %v5421_v46, %s5673_s27 }
 0x3be   :  { %v5423_v48 = vpop.eup %5422 }
 0x3bf   :  { %v354_v49 = vadd.f32 1.0, %v5423_v48 }
 0x3c1   :  { %5424 = vrcp.f32 %v354_v49 }
 0x3cb   :  { %v5425_v50 = vpop.eup %5424 }
 0x3cc   :  { %v361_v54 = vmul.f32 %v5425_v50, %v359_v53 }
 0x42f   :  { %v364_v51 = vpop.permute.xlu0 %363 }
 0x430   :  { %v366_v52 = vmul.f32 %v5425_v50, %v364_v51 }
 0x432   :  { %368 = vrot.lane.b32.xlu1 %v366_v52, %s5674_s4 }
 0x4a4   :  { %v369_v55 = vpop.permute.xlu1 %368 }
 0x4a5   :  { %v371_v56 = vadd.f32 %v369_v55, %v361_v54 }
 0x4a7   :  { %5426 = vtanh.f32 %v371_v56  ;;  %v466_v11 = vrot.slane %v371_v56, 6 }
 0x4b1   :  { %v5427_v57 = vpop.eup %5426 }
 0x4b2   :  { %374 = vrot.lane.b32.xlu0 %v5427_v57, %s5673_s27 }
 0x524   :  { %v375_v58 = vpop.permute.xlu0 %374 }
 0x525   :  { %v377_v59 = vmul.f32 %v5425_v50, %v375_v58 }
 0x527   :  { %v379_v60 = vrot.slane %v377_v59, 2  ;;  %v1017_v20 = vsel %vm1016_vm4, %v5868_v40, %v377_v59 }
 0x529   :  { %380 = vrot.lane.b32.xlu1 %v379_v60, %s5674_s4 }
 0x59b   :  { %v381_v61 = vpop.permute.xlu1 %380 }
 0x59c   :  { %4658 = vmatmul.mubr.msk.f32.vlgmr.msra.gmra.mrb[2].mxu0 %vm173_vm3, %v381_v61 }
 0x59d   :  { %5068 = vmatpush3.bf16.msra.mxu0 %v5816_v12  ;;  %4679 = vmatprep.mubr.msk.f32.mxu0 %vm5671_vm1, %v5672_v7 }
 0x59e   :  { %5069 = vmatprep.subr.bf16.mxu0 %v5670_v3 }
 0x5a1   :  { %5071 = vmatpush3.bf16.msra.mxu0 %v5829_v17 }
 0x5a2   :  { %5078 = vmatprep.subr.bf16.mxu0 %v5670_v3 }
 0x66f   :  { %v450_v62 = vpop.f32.mrb[2].mxu0 }
 0x670   :  { %v455_v63 = vrot.slane %v450_v62, 4  ;;  %v4659_v0 = vpop.f32.mrb[3].mxu0 }
 0x672   :  { %v457_v1 = vadd.f32 %v455_v63, %v5862_v26 }
 0x674   :  { %5428 = vtanh.f32 %v457_v1  ;;  %v4348_v4 = vmul.f32 -1.442695, %v457_v1 }
 0x676   :  { %5430 = vpow2.f32 %v4348_v4 }
 0x67e   :  { %v5429_v2 = vpop.eup %5428 }
 0x67f   :  { %470 = vrot.lane.b32.xlu0 %v5429_v2, %s5673_s27 }
 0x680   :  { %v5431_v5 = vpop.eup %5430 }
 0x681   :  { %v461_v6 = vadd.f32 1.0, %v5431_v5 }
 0x683   :  { %5432 = vrcp.f32 %v461_v6 }
 0x68d   :  { %v5433_v8 = vpop.eup %5432 }
 0x68e   :  { %v468_v13 = vmul.f32 %v5433_v8, %v466_v11 }
 0x6f1   :  { %v471_v9 = vpop.permute.xlu0 %470 }
 0x6f2   :  { %v473_v10 = vmul.f32 %v5433_v8, %v471_v9 }
 0x6f4   :  { %475 = vrot.lane.b32.xlu1 %v473_v10, %s5674_s4 }
 0x766   :  { %v476_v14 = vpop.permute.xlu1 %475 }
 0x767   :  { %v478_v15 = vadd.f32 %v476_v14, %v468_v13 }
 0x769   :  { %5434 = vtanh.f32 %v478_v15  ;;  %v573_v37 = vrot.slane %v478_v15, 6 }
 0x773   :  { %v5435_v16 = vpop.eup %5434 }
 0x774   :  { %481 = vrot.lane.b32.xlu0 %v5435_v16, %s5673_s27 }
 0x7e6   :  { %v482_v18 = vpop.permute.xlu0 %481 }
 0x7e7   :  { %v484_v19 = vmul.f32 %v5433_v8, %v482_v18 }
 0x7e9   :  { %v486_v21 = vrot.slane %v484_v19, 4  ;;  %v1019_v22 = vsel %vm1018_vm5, %v1017_v20, %v484_v19 }
 0x7eb   :  { %487 = vrot.lane.b32.xlu1 %v486_v21, %s5674_s4 }
 0x85d   :  { %v488_v23 = vpop.permute.xlu1 %487 }
 0x85e   :  { %4669 = vmatmul.mubr.msk.f32.vlgmr.msra.gmra.mrb[4].mxu1 %vm173_vm3, %v488_v23 }
 0x85f   :  { %5074 = vmatpush3.bf16.msra.mxu1 %v5816_v12  ;;  %4690 = vmatprep.mubr.msk.f32.mxu1 %vm5671_vm1, %v5672_v7 }
 0x860   :  { %5075 = vmatprep.subr.bf16.mxu1 %v5670_v3 }
 0x863   :  { %5077 = vmatpush3.bf16.msra.mxu1 %v5829_v17 }
 0x864   :  { %5084 = vmatprep.subr.bf16.mxu1 %v5670_v3 }
 0x931   :  { %v557_v25 = vpop.f32.mrb[4].mxu1 }
 0x932   :  { %v562_v27 = vrot.slane %v557_v25, 2  ;;  %v4670_v28 = vpop.f32.mrb[5].mxu1 }
 0x934   :  { %v564_v29 = vadd.f32 %v562_v27, %v5862_v26 }
 0x936   :  { %5436 = vtanh.f32 %v564_v29  ;;  %v4350_v31 = vmul.f32 -1.442695, %v564_v29 }
 0x938   :  { %5438 = vpow2.f32 %v4350_v31 }
 0x940   :  { %v5437_v30 = vpop.eup %5436 }
 0x941   :  { %577 = vrot.lane.b32.xlu0 %v5437_v30, %s5673_s27 }
 0x942   :  { %v5439_v32 = vpop.eup %5438 }
 0x943   :  { %v568_v33 = vadd.f32 1.0, %v5439_v32 }
 0x945   :  { %5440 = vrcp.f32 %v568_v33 }
 0x94f   :  { %v5441_v34 = vpop.eup %5440 }
 0x950   :  { %v575_v38 = vmul.f32 %v5441_v34, %v573_v37 }
 0x9b3   :  { %v578_v35 = vpop.permute.xlu0 %577 }
 0x9b4   :  { %v580_v36 = vmul.f32 %v5441_v34, %v578_v35 }
 0x9b6   :  { %582 = vrot.lane.b32.xlu1 %v580_v36, %s5674_s4 }
 0xa28   :  { %v583_v39 = vpop.permute.xlu1 %582 }
 0xa29   :  { %v585_v40 = vadd.f32 %v583_v39, %v575_v38 }
 0xa2b   :  { %5442 = vtanh.f32 %v585_v40  ;;  %v677_v56 = vrot.slane %v585_v40, 6 }
 0xa35   :  { %v5443_v26 = vpop.eup %5442 }
 0xa36   :  { %588 = vrot.lane.b32.xlu0 %v5443_v26, %s5673_s27 }
 0xaa8   :  { %v589_v41 = vpop.permute.xlu0 %588 }
 0xaa9   :  { %v591_v42 = vmul.f32 %v5441_v34, %v589_v41 }
 0xaab   :  { %v593_v43 = vrot.slane %v591_v42, 6  ;;  %v5911_v44 = vsel %vm90_vm2, %v1019_v22, %v591_v42 }
 0xaad   :  { %594 = vrot.lane.b32.xlu1 %v593_v43, %s5674_s4 }
 0xb1f   :  { %v595_v45 = vpop.permute.xlu1 %594 }
 0xb20   :  { %4680 = vmatmul.mubr.msk.f32.vlgmr.msra.gmra.mrb[4].mxu0 %vm173_vm3, %v595_v45 }
 0xb21   :  { %5080 = vmatpush3.bf16.msra.mxu0 %v5816_v12  ;;  %4701 = vmatprep.mubr.msk.f32.mxu0 %vm5671_vm1, %v5672_v7 }
 0xb22   :  { %5081 = vmatprep.subr.bf16.mxu0 %v5670_v3 }
 0xb25   :  { %5083 = vmatpush3.bf16.msra.mxu0 %v5829_v17 }
 0xbf3   :  { %v664_v46 = vpop.f32.mrb[4].mxu0 }
 0xbf4   :  { %v668_v47 = vadd.f32 %v664_v46, %v5860_v24  ;;  %v4681_v48 = vpop.f32.mrb[5].mxu0 }
 0xbf6   :  { %5444 = vtanh.f32 %v668_v47  ;;  %v4352_v50 = vmul.f32 -1.442695, %v668_v47 }
 0xbf8   :  { %5446 = vpow2.f32 %v4352_v50 }
 0xc00   :  { %v5445_v49 = vpop.eup %5444 }
 0xc01   :  { %681 = vrot.lane.b32.xlu0 %v5445_v49, %s5673_s27 }
 0xc02   :  { %v5447_v51 = vpop.eup %5446 }
 0xc03   :  { %v672_v52 = vadd.f32 1.0, %v5447_v51 }
 0xc05   :  { %5448 = vrcp.f32 %v672_v52 }
 0xc0f   :  { %v5449_v53 = vpop.eup %5448 }
 0xc10   :  { %v679_v57 = vmul.f32 %v5449_v53, %v677_v56 }
 0xc73   :  { %v682_v54 = vpop.permute.xlu0 %681 }
 0xc74   :  { %v684_v55 = vmul.f32 %v5449_v53, %v682_v54 }
 0xc76   :  { %686 = vrot.lane.b32.xlu1 %v684_v55, %s5674_s4 }
 0xce8   :  { %v687_v58 = vpop.permute.xlu1 %686 }
 0xce9   :  { %v689_v59 = vadd.f32 %v687_v58, %v679_v57 }
 0xceb   :  { %5450 = vtanh.f32 %v689_v59 }
 0xcf5   :  { %v5451_v60 = vpop.eup %5450 }
 0xcf6   :  { %692 = vrot.lane.b32.xlu0 %v5451_v60, %s5673_s27 }
 0xd68   :  { %v693_v61 = vpop.permute.xlu0 %692 }
 0xd69   :  { %v5924_v62 = vmul.f32 %v5449_v53, %v693_v61  ;;  %v1024_v61 = vld [vmem:[%s6886_s2] sm:$0xff] }
 0xd6b   :  { %697 = vrot.lane.b32.xlu1 %v5924_v62, %s5674_s4 }
 0xddd   :  { %v698_v63 = vpop.permute.xlu1 %697 }
 0xdde   :  { %4691 = vmatmul.mubr.msk.f32.vlgmr.msra.gmra.mrb[6].mxu1 %vm173_vm3, %v698_v63 }
 0xddf   :  { %5086 = vmatpush3.bf16.msra.mxu1 %v5816_v12  ;;  %4712 = vmatprep.mubr.msk.f32.mxu1 %vm5671_vm1, %v5672_v7 }
 0xde0   :  { %5087 = vmatprep.subr.bf16.mxu1 %v5670_v3 }
 0xde3   :  { %5089 = vmatpush3.bf16.msra.mxu1 %v5829_v17  ;;  %v783_v17 = vrot.slane %v689_v59, 6 }
 0xde4   :  { %5098 = vmatprep.subr.bf16.mxu1 %v5670_v3 }
 0xeb1   :  { %v767_v0 = vpop.f32.mrb[6].mxu1 }
 0xeb2   :  { %v772_v1 = vrot.slane %v767_v0, 6  ;;  %v4692_v2 = vpop.f32.mrb[7].mxu1  ;;  %v1121_v0 = vld [vmem:[%s6887_s23 + $0x8] sm:$0xff] }
 0xeb3   :  { %v1027_v2 = vld [vmem:[%s6886_s2 + $0x18] sm:$0xff] }
 0xeb4   :  { %v774_v4 = vadd.f32 %v772_v1, %v5860_v24  ;;  %v1026_v1 = vld [vmem:[%s6886_s2 + $0x10] sm:$0xff] }
 0xeb6   :  { %5452 = vtanh.f32 %v774_v4  ;;  %v4354_v6 = vmul.f32 -1.442695, %v774_v4 }
 0xeb8   :  { %5454 = vpow2.f32 %v4354_v6  ;;  %v1122_v6 = vld [vmem:[%s6887_s23 + $0x10] sm:$0xff] }
 0xec0   :  { %v5453_v5 = vpop.eup %5452 }
 0xec1   :  { %787 = vrot.lane.b32.xlu0 %v5453_v5, %s5673_s27  ;;  %v5094_v5 = vpack.c.bf16 %v1027_v2, %v1026_v1 }
 0xec2   :  { %v5455_v12 = vpop.eup %5454 }
 0xec3   :  { %v778_v8 = vadd.f32 1.0, %v5455_v12  ;;  %v1123_v12 = vld [vmem:[%s6887_s23 + $0x18] sm:$0xff] }
 0xec5   :  { %5456 = vrcp.f32 %v778_v8  ;;  %v5987_v8 = vpack.c.bf16 %v1123_v12, %v1122_v6 }
 0xecf   :  { %v5457_v9 = vpop.eup %5456 }
 0xed0   :  { %v785_v13 = vmul.f32 %v5457_v9, %v783_v17 }
 0xf33   :  { %v788_v10 = vpop.permute.xlu0 %787 }
 0xf34   :  { %v790_v11 = vmul.f32 %v5457_v9, %v788_v10 }
 0xf36   :  { %792 = vrot.lane.b32.xlu1 %v790_v11, %s5674_s4 }
 0xfa8   :  { %v793_v14 = vpop.permute.xlu1 %792 }
 0xfa9   :  { %v795_v15 = vadd.f32 %v793_v14, %v785_v13 }
 0xfab   :  { %5458 = vtanh.f32 %v795_v15  ;;  %v890_v35 = vrot.slane %v795_v15, 6 }
 0xfb5   :  { %v5459_v16 = vpop.eup %5458 }
 0xfb6   :  { %798 = vrot.lane.b32.xlu0 %v5459_v16, %s5673_s27  ;;  %v4359_v16 = vld [vmem:[%s6855_s7] ss:$0 sm:$0xff] }
0x1028   :  { %v799_v18 = vpop.permute.xlu0 %798 }
0x1029   :  { %v801_v19 = vmul.f32 %v5457_v9, %v799_v18 }
0x102b   :  { %v803_v20 = vrot.slane %v801_v19, 2  ;;  %v1021_v41 = vsel %vm1016_vm4, %v5924_v62, %v801_v19  ;;  %v1025_v62 = vld [vmem:[%s6886_s2 + $0x8] sm:$0xff] }
0x102c   :  { %v5090_v63 = vpack.c.bf16 %v1025_v62, %v1024_v61 }
0x102d   :  { %804 = vrot.lane.b32.xlu1 %v803_v20, %s5674_s4 }
0x102e   :  { %5091 = vmatprep.subr.bf16.mxu0 %v5090_v63 }
0x109f   :  { %v805_v21 = vpop.permute.xlu1 %804 }
0x10a0   :  { %4702 = vmatmul.mubr.msk.f32.vlgmr.msra.gmra.mrb[6].mxu0 %vm173_vm3, %v805_v21 }
0x10a1   :  { %5093 = vmatpush3.bf16.msra.mxu0 %v5090_v63 }
0x10a2   :  { %5095 = vmatprep.subr.bf16.mxu0 %v5094_v5 }
0x10a5   :  { %5097 = vmatpush3.bf16.msra.mxu0 %v5094_v5 }
0x10a6   :  { %5104 = vmatprep.subr.bf16.mxu0 %v5670_v3 }
0x1173   :  { %v874_v22 = vpop.f32.mrb[6].mxu0 }
0x1174   :  { %v879_v23 = vrot.slane %v874_v22, 4  ;;  %v4703_v25 = vpop.f32.mrb[7].mxu0 }
0x1176   :  { %v881_v27 = vadd.f32 %v879_v23, %v5860_v24 }
0x1178   :  { %5460 = vtanh.f32 %v881_v27  ;;  %v4356_v29 = vmul.f32 -1.442695, %v881_v27 }
0x117a   :  { %5462 = vpow2.f32 %v4356_v29 }
0x1182   :  { %v5461_v28 = vpop.eup %5460 }
0x1183   :  { %894 = vrot.lane.b32.xlu0 %v5461_v28, %s5673_s27 }
0x1184   :  { %v5463_v30 = vpop.eup %5462 }
0x1185   :  { %v885_v31 = vadd.f32 1.0, %v5463_v30 }
0x1187   :  { %5464 = vrcp.f32 %v885_v31 }
0x1191   :  { %v5465_v32 = vpop.eup %5464 }
0x1192   :  { %v892_v36 = vmul.f32 %v5465_v32, %v890_v35 }
0x11f5   :  { %v895_v33 = vpop.permute.xlu0 %894 }
0x11f6   :  { %v897_v34 = vmul.f32 %v5465_v32, %v895_v33 }
0x11f8   :  { %899 = vrot.lane.b32.xlu1 %v897_v34, %s5674_s4 }
0x126a   :  { %v900_v37 = vpop.permute.xlu1 %899 }
0x126b   :  { %v902_v38 = vadd.f32 %v900_v37, %v892_v36 }
0x126d   :  { %5466 = vtanh.f32 %v902_v38  ;;  %v997_v57 = vrot.slane %v902_v38, 6 }
0x1277   :  { %v5467_v39 = vpop.eup %5466 }
0x1278   :  { %905 = vrot.lane.b32.xlu0 %v5467_v39, %s5673_s27 }
0x12ea   :  { %v906_v40 = vpop.permute.xlu0 %905 }
0x12eb   :  { %v908_v26 = vmul.f32 %v5465_v32, %v906_v40 }
0x12ed   :  { %v910_v42 = vrot.slane %v908_v26, 4  ;;  %v5948_v43 = vsel %vm1018_vm5, %v1021_v41, %v908_v26 }
0x12ef   :  { %911 = vrot.lane.b32.xlu1 %v910_v42, %s5674_s4 }
0x1361   :  { %v912_v45 = vpop.permute.xlu1 %911 }
0x1362   :  { %4713 = vmatmul.mubr.msk.f32.vlgmr.msra.gmra.mrb[8].mxu1 %vm173_vm3, %v912_v45 }
0x1363   :  { %4734 = vmatprep.mubr.msk.f32.mxu1 %vm5671_vm1, %v5672_v7 }
0x1435   :  { %v981_v46 = vpop.f32.mrb[8].mxu1 }
0x1436   :  { %v986_v47 = vrot.slane %v981_v46, 2  ;;  %v4714_v48 = vpop.f32.mrb[9].mxu1 }
0x1438   :  { %v988_v49 = vadd.f32 %v986_v47, %v5860_v24 }
0x143a   :  { %5468 = vtanh.f32 %v988_v49  ;;  %v4358_v51 = vmul.f32 -1.442695, %v988_v49 }
0x143c   :  { %5470 = vpow2.f32 %v4358_v51 }
0x1444   :  { %v5469_v50 = vpop.eup %5468 }
0x1445   :  { %1001 = vrot.lane.b32.xlu0 %v5469_v50, %s5673_s27 }
0x1446   :  { %v5471_v52 = vpop.eup %5470 }
0x1447   :  { %v992_v53 = vadd.f32 1.0, %v5471_v52 }
0x1449   :  { %5472 = vrcp.f32 %v992_v53 }
0x1453   :  { %v5473_v54 = vpop.eup %5472 }
0x1454   :  { %v999_v58 = vmul.f32 %v5473_v54, %v997_v57 }
0x14b7   :  { %v1002_v55 = vpop.permute.xlu0 %1001 }
0x14b8   :  { %v1004_v56 = vmul.f32 %v5473_v54, %v1002_v55 }
0x14ba   :  { %1006 = vrot.lane.b32.xlu1 %v1004_v56, %s5674_s4 }
0x14be   :  { %1037 = vrot.lane.b32.xlu1 %v5911_v44, %s5674_s4  ;;  %v1120_v44 = vld [vmem:[%s6887_s23] sm:$0xff] }
0x14bf   :  { %v5978_v4 = vpack.c.bf16 %v1121_v0, %v1120_v44 }
0x14c1   :  { %5100 = vmatpush3.bf16.msra.mxu1 %v5978_v4 }
0x14c2   :  { %5101 = vmatprep.subr.bf16.mxu1 %v5670_v3 }
0x14c5   :  { %5103 = vmatpush3.bf16.msra.mxu1 %v5987_v8 }
0x14c6   :  { %5110 = vmatprep.subr.bf16.mxu1 %v5670_v3 }
0x14c8   :  { %4735 = vmatmul.mubr.f32.vlgmr.msra.gmra.mrb[10].mxu1 %v5672_v7 }
0x14c9   :  { %5112 = vmatpush3.bf16.msra.mxu1 %v5978_v4  ;;  %4756 = vmatprep.mubr.msk.f32.mxu1 %vm5671_vm1, %v5672_v7 }
0x14ca   :  { %5113 = vmatprep.subr.bf16.mxu1 %v5670_v3 }
0x14cd   :  { %5115 = vmatpush3.bf16.msra.mxu1 %v5987_v8 }
0x14ce   :  { %5122 = vmatprep.subr.bf16.mxu1 %v5670_v3 }
0x152c   :  { %v1007_v24 = vpop.permute.xlu1 %1006 }
0x152d   :  { %v1009_v59 = vadd.f32 %v1007_v24, %v999_v58 }
0x152f   :  { %5474 = vtanh.f32 %v1009_v59 }
0x1530   :  { %v1038_v60 = vpop.permute.xlu1 %1037 }
0x1531   :  { %4723 = vmatprep.mubr.msk.f32.mxu0 %vm173_vm3, %v1038_v60 }
0x1539   :  { %v5475_v9 = vpop.eup %5474 }
0x153a   :  { %1012 = vrot.lane.b32.xlu0 %v5475_v9, %s5673_s27 }
0x159b   :  { %v1190_v14 = vpop.f32.mrb[10].mxu1 }
0x159c   :  { %v4736_v15 = vpop.f32.mrb[11].mxu1 }
0x15ac   :  { %v1013_v10 = vpop.permute.xlu0 %1012 }
0x15ad   :  { %v1015_v11 = vmul.f32 %v5473_v54, %v1013_v10 }
0x15af   :  { %v1023_v17 = vsel %vm90_vm2, %v5948_v43, %v1015_v11 }
0x15b0   :  { %1039 = vrot.lane.b32.xlu0 %v1023_v17, %s5674_s4 }
0x1622   :  { %v1040_v13 = vpop.permute.xlu0 %1039 }
0x1623   :  { %4724 = vmatmul.mubr.msk.f32.vlgmr.msra.gmra.mrb[8].mxu0 %vm173_vm3, %v1040_v13 }
0x1624   :  { %5106 = vmatpush3.bf16.msra.mxu0 %v5978_v4  ;;  %4745 = vmatprep.mubr.msk.f32.mxu0 %vm5671_vm1, %v5672_v7 }
0x1625   :  { %5107 = vmatprep.subr.bf16.mxu0 %v5670_v3 }
0x1628   :  { %5109 = vmatpush3.bf16.msra.mxu0 %v5987_v8 }
0x1629   :  { %5116 = vmatprep.subr.bf16.mxu0 %v5670_v3 }
0x16f6   :  { %v4725_v18 = vpop.f32.mrb[8].mxu0 }
0x16f7   :  { %v6014_v19 = vadd.f32 %v4725_v18, %v4359_v16  ;;  %v1111_v20 = vpop.f32.mrb[9].mxu0 }
0x16f8   :  { %v6016_v21 = vadd.f32 %v4359_v16, %v1111_v20 }
0x16fa   :  { %v1194_v22 = vadd.f32 %v1190_v14, %v6016_v21 }
0x16fc   :  { %5476 = vtanh.f32 %v1194_v22  ;;  %v4362_v25 = vmul.f32 -1.442695, %v1194_v22 }
0x16fe   :  { %5478 = vpow2.f32 %v4362_v25 }
0x1706   :  { %v5477_v23 = vpop.eup %5476 }
0x1707   :  { %1204 = vrot.lane.b32.xlu1 %v5477_v23, %s5673_s27 }
0x1708   :  { %v5479_v27 = vpop.eup %5478 }
0x1709   :  { %v1198_v28 = vadd.f32 1.0, %v5479_v27 }
0x170b   :  { %5480 = vrcp.f32 %v1198_v28 }
0x1715   :  { %v5481_v29 = vpop.eup %5480 }
0x1716   :  { %v1202_v32 = vmul.f32 0.0, %v5481_v29 }
0x1779   :  { %v1205_v30 = vpop.permute.xlu1 %1204 }
0x177a   :  { %v1207_v31 = vmul.f32 %v5481_v29, %v1205_v30 }
0x177c   :  { %1209 = vrot.lane.b32.xlu0 %v1207_v31, %s5674_s4 }
0x17ee   :  { %v1210_v33 = vpop.permute.xlu0 %1209 }
0x17ef   :  { %v1212_v34 = vadd.f32 %v1210_v33, %v1202_v32 }
0x17f1   :  { %5482 = vtanh.f32 %v1212_v34  ;;  %v1306_v50 = vrot.slane %v1212_v34, 6 }
0x17fb   :  { %v5483_v35 = vpop.eup %5482 }
0x17fc   :  { %1215 = vrot.lane.b32.xlu1 %v5483_v35, %s5673_s27 }
0x186e   :  { %v1216_v36 = vpop.permute.xlu1 %1215 }
0x186f   :  { %v1218_v37 = vmul.f32 %v5481_v29, %v1216_v36 }
0x1871   :  { %1220 = vrot.lane.b32.xlu0 %v1218_v37, %s5674_s4 }
0x18e3   :  { %v1221_v38 = vpop.permute.xlu0 %1220 }
0x18e4   :  { %4746 = vmatmul.mubr.msk.f32.vlgmr.msra.gmra.mrb[10].mxu0 %vm173_vm3, %v1221_v38 }
0x18e5   :  { %5118 = vmatpush3.bf16.msra.mxu0 %v5978_v4  ;;  %4767 = vmatprep.mubr.msk.f32.mxu0 %vm5671_vm1, %v5672_v7 }
0x18e6   :  { %5119 = vmatprep.subr.bf16.mxu0 %v5670_v3 }
0x18e9   :  { %5121 = vmatpush3.bf16.msra.mxu0 %v5987_v8 }
0x18ea   :  { %5128 = vmatprep.subr.bf16.mxu0 %v5670_v3 }
0x19b7   :  { %v1290_v39 = vpop.f32.mrb[10].mxu0 }
0x19b8   :  { %v1295_v40 = vrot.slane %v1290_v39, 6  ;;  %v4747_v26 = vpop.f32.mrb[11].mxu0 }
0x19ba   :  { %v1297_v41 = vadd.f32 %v1295_v40, %v6016_v21 }
0x19bc   :  { %5484 = vtanh.f32 %v1297_v41  ;;  %v4364_v43 = vmul.f32 -1.442695, %v1297_v41 }
0x19be   :  { %5486 = vpow2.f32 %v4364_v43 }
0x19c6   :  { %v5485_v42 = vpop.eup %5484 }
0x19c7   :  { %1310 = vrot.lane.b32.xlu1 %v5485_v42, %s5673_s27 }
0x19c8   :  { %v5487_v45 = vpop.eup %5486 }
0x19c9   :  { %v1301_v46 = vadd.f32 1.0, %v5487_v45 }
0x19cb   :  { %5488 = vrcp.f32 %v1301_v46 }
0x19d5   :  { %v5489_v47 = vpop.eup %5488 }
0x19d6   :  { %v1308_v51 = vmul.f32 %v5489_v47, %v1306_v50 }
0x1a39   :  { %v1311_v48 = vpop.permute.xlu1 %1310 }
0x1a3a   :  { %v1313_v49 = vmul.f32 %v5489_v47, %v1311_v48 }
0x1a3c   :  { %1315 = vrot.lane.b32.xlu0 %v1313_v49, %s5674_s4 }
0x1aae   :  { %v1316_v52 = vpop.permute.xlu0 %1315 }
0x1aaf   :  { %v1318_v53 = vadd.f32 %v1316_v52, %v1308_v51 }
0x1ab1   :  { %5490 = vtanh.f32 %v1318_v53  ;;  %v1413_v6 = vrot.slane %v1318_v53, 6 }
0x1abb   :  { %v5491_v54 = vpop.eup %5490 }
0x1abc   :  { %1321 = vrot.lane.b32.xlu1 %v5491_v54, %s5673_s27 }
0x1b2e   :  { %v1322_v55 = vpop.permute.xlu1 %1321 }
0x1b2f   :  { %v1324_v56 = vmul.f32 %v5489_v47, %v1322_v55 }
0x1b31   :  { %v1326_v57 = vrot.slane %v1324_v56, 2 }
0x1b33   :  { %1327 = vrot.lane.b32.xlu0 %v1326_v57, %s5674_s4 }
0x1ba5   :  { %v1328_v58 = vpop.permute.xlu0 %1327 }
0x1ba6   :  { %4757 = vmatmul.mubr.msk.f32.vlgmr.msra.gmra.mrb[12].mxu1 %vm173_vm3, %v1328_v58 }
0x1ba7   :  { %5124 = vmatpush3.bf16.msra.mxu1 %v5978_v4  ;;  %4778 = vmatprep.mubr.msk.f32.mxu1 %vm5671_vm1, %v5672_v7 }
0x1ba8   :  { %5125 = vmatprep.subr.bf16.mxu1 %v5670_v3 }
0x1bab   :  { %5127 = vmatpush3.bf16.msra.mxu1 %v5987_v8 }
0x1bac   :  { %5134 = vmatprep.subr.bf16.mxu1 %v5670_v3 }
0x1c79   :  { %v1397_v24 = vpop.f32.mrb[12].mxu1 }
0x1c7a   :  { %v1402_v59 = vrot.slane %v1397_v24, 4  ;;  %v4758_v60 = vpop.f32.mrb[13].mxu1 }
0x1c7c   :  { %v1404_v61 = vadd.f32 %v1402_v59, %v6016_v21 }
0x1c7e   :  { %5492 = vtanh.f32 %v1404_v61  ;;  %v4366_v44 = vmul.f32 -1.442695, %v1404_v61 }
0x1c80   :  { %5494 = vpow2.f32 %v4366_v44 }
0x1c88   :  { %v5493_v62 = vpop.eup %5492 }
0x1c89   :  { %1417 = vrot.lane.b32.xlu1 %v5493_v62, %s5673_s27 }
0x1c8a   :  { %v5495_v63 = vpop.eup %5494 }
0x1c8b   :  { %v1408_v0 = vadd.f32 1.0, %v5495_v63 }
0x1c8d   :  { %5496 = vrcp.f32 %v1408_v0 }
0x1c97   :  { %v5497_v1 = vpop.eup %5496 }
0x1c98   :  { %v1415_v12 = vmul.f32 %v5497_v1, %v1413_v6 }
0x1cfb   :  { %v1418_v2 = vpop.permute.xlu1 %1417 }
0x1cfc   :  { %v1420_v5 = vmul.f32 %v5497_v1, %v1418_v2 }
0x1cfe   :  { %1422 = vrot.lane.b32.xlu0 %v1420_v5, %s5674_s4 }
0x1d70   :  { %v1423_v9 = vpop.permute.xlu0 %1422 }
0x1d71   :  { %v1425_v10 = vadd.f32 %v1423_v9, %v1415_v12 }
0x1d73   :  { %5498 = vtanh.f32 %v1425_v10  ;;  %v1520_v32 = vrot.slane %v1425_v10, 6 }
0x1d7d   :  { %v5499_v11 = vpop.eup %5498 }
0x1d7e   :  { %1428 = vrot.lane.b32.xlu1 %v5499_v11, %s5673_s27 }
0x1df0   :  { %v1429_v17 = vpop.permute.xlu1 %1428 }
0x1df1   :  { %v1431_v13 = vmul.f32 %v5497_v1, %v1429_v17 }
0x1df3   :  { %v1433_v14 = vrot.slane %v1431_v13, 4 }
0x1df5   :  { %1434 = vrot.lane.b32.xlu0 %v1433_v14, %s5674_s4 }
0x1e67   :  { %v1435_v15 = vpop.permute.xlu0 %1434 }
0x1e68   :  { %4768 = vmatmul.mubr.msk.f32.vlgmr.msra.gmra.mrb[12].mxu0 %vm173_vm3, %v1435_v15 }
0x1e69   :  { %5130 = vmatpush3.bf16.msra.mxu0 %v5978_v4  ;;  %4789 = vmatprep.mubr.msk.f32.mxu0 %vm5671_vm1, %v5672_v7 }
0x1e6a   :  { %5131 = vmatprep.subr.bf16.mxu0 %v5670_v3 }
0x1e6d   :  { %5133 = vmatpush3.bf16.msra.mxu0 %v5987_v8 }
0x1e6e   :  { %5140 = vmatprep.subr.bf16.mxu0 %v5670_v3 }
0x1f3b   :  { %v1504_v16 = vpop.f32.mrb[12].mxu0 }
0x1f3c   :  { %v1509_v18 = vrot.slane %v1504_v16, 2  ;;  %v4769_v20 = vpop.f32.mrb[13].mxu0 }
0x1f3e   :  { %v1511_v22 = vadd.f32 %v1509_v18, %v6016_v21 }
0x1f40   :  { %5500 = vtanh.f32 %v1511_v22  ;;  %v4368_v25 = vmul.f32 -1.442695, %v1511_v22 }
0x1f42   :  { %5502 = vpow2.f32 %v4368_v25 }
0x1f4a   :  { %v5501_v23 = vpop.eup %5500 }
0x1f4b   :  { %1524 = vrot.lane.b32.xlu1 %v5501_v23, %s5673_s27 }
0x1f4c   :  { %v5503_v27 = vpop.eup %5502 }
0x1f4d   :  { %v1515_v28 = vadd.f32 1.0, %v5503_v27 }
0x1f4f   :  { %5504 = vrcp.f32 %v1515_v28 }
0x1f59   :  { %v5505_v29 = vpop.eup %5504 }
0x1f5a   :  { %v1522_v33 = vmul.f32 %v5505_v29, %v1520_v32 }
0x1fbd   :  { %v1525_v30 = vpop.permute.xlu1 %1524 }
0x1fbe   :  { %v1527_v31 = vmul.f32 %v5505_v29, %v1525_v30 }
0x1fc0   :  { %1529 = vrot.lane.b32.xlu0 %v1527_v31, %s5674_s4 }
0x2032   :  { %v1530_v34 = vpop.permute.xlu0 %1529 }
0x2033   :  { %v1532_v35 = vadd.f32 %v1530_v34, %v1522_v33 }
0x2035   :  { %5506 = vtanh.f32 %v1532_v35  ;;  %v1624_v50 = vrot.slane %v1532_v35, 6 }
0x203f   :  { %v5507_v21 = vpop.eup %5506 }
0x2040   :  { %1535 = vrot.lane.b32.xlu1 %v5507_v21, %s5673_s27 }
0x20b2   :  { %v1536_v36 = vpop.permute.xlu1 %1535 }
0x20b3   :  { %v1538_v37 = vmul.f32 %v5505_v29, %v1536_v36 }
0x20b5   :  { %v1540_v38 = vrot.slane %v1538_v37, 6 }
0x20b7   :  { %1541 = vrot.lane.b32.xlu0 %v1540_v38, %s5674_s4 }
0x2129   :  { %v1542_v39 = vpop.permute.xlu0 %1541 }
0x212a   :  { %4779 = vmatmul.mubr.msk.f32.vlgmr.msra.gmra.mrb[14].mxu1 %vm173_vm3, %v1542_v39 }
0x212b   :  { %5136 = vmatpush3.bf16.msra.mxu1 %v5978_v4  ;;  %4800 = vmatprep.mubr.msk.f32.mxu1 %vm5671_vm1, %v5672_v7 }
0x212c   :  { %5137 = vmatprep.subr.bf16.mxu1 %v5670_v3 }
0x212f   :  { %5139 = vmatpush3.bf16.msra.mxu1 %v5987_v8 }
0x2130   :  { %5146 = vmatprep.subr.bf16.mxu1 %v5670_v3 }
0x21fd   :  { %v1611_v40 = vpop.f32.mrb[14].mxu1 }
0x21fe   :  { %v1615_v26 = vadd.f32 %v1611_v40, %v6014_v19  ;;  %v4780_v41 = vpop.f32.mrb[15].mxu1 }
0x2200   :  { %5508 = vtanh.f32 %v1615_v26  ;;  %v4370_v43 = vmul.f32 -1.442695, %v1615_v26 }
0x2202   :  { %5510 = vpow2.f32 %v4370_v43 }
0x220a   :  { %v5509_v42 = vpop.eup %5508 }
0x220b   :  { %1628 = vrot.lane.b32.xlu1 %v5509_v42, %s5673_s27 }
0x220c   :  { %v5511_v45 = vpop.eup %5510 }
0x220d   :  { %v1619_v46 = vadd.f32 1.0, %v5511_v45 }
0x220f   :  { %5512 = vrcp.f32 %v1619_v46 }
0x2219   :  { %v5513_v47 = vpop.eup %5512 }
0x221a   :  { %v1626_v51 = vmul.f32 %v5513_v47, %v1624_v50 }
0x227d   :  { %v1629_v48 = vpop.permute.xlu1 %1628 }
0x227e   :  { %v1631_v49 = vmul.f32 %v5513_v47, %v1629_v48 }
0x2280   :  { %1633 = vrot.lane.b32.xlu0 %v1631_v49, %s5674_s4 }
0x22f2   :  { %v1634_v52 = vpop.permute.xlu0 %1633 }
0x22f3   :  { %v1636_v53 = vadd.f32 %v1634_v52, %v1626_v51  ;;  %v1964_v52 = vld [vmem:[%s6856_s8 + $0x8] sm:$0xff] }
0x22f5   :  { %5514 = vtanh.f32 %v1636_v53 }
0x22ff   :  { %v5515_v54 = vpop.eup %5514 }
0x2300   :  { %1639 = vrot.lane.b32.xlu1 %v5515_v54, %s5673_s27 }
0x2372   :  { %v1640_v55 = vpop.permute.xlu1 %1639 }
0x2373   :  { %v1642_v56 = vmul.f32 %v5513_v47, %v1640_v55  ;;  %v1966_v55 = vld [vmem:[%s6856_s8 + $0x18] sm:$0xff] }
0x2375   :  { %1644 = vrot.lane.b32.xlu0 %v1642_v56, %s5674_s4 }
0x23e7   :  { %v1645_v57 = vpop.permute.xlu0 %1644 }
0x23e8   :  { %4790 = vmatmul.mubr.msk.f32.vlgmr.msra.gmra.mrb[14].mxu0 %vm173_vm3, %v1645_v57 }
0x23e9   :  { %5142 = vmatpush3.bf16.msra.mxu0 %v5978_v4  ;;  %4811 = vmatprep.mubr.msk.f32.mxu0 %vm5671_vm1, %v5672_v7 }
0x23ea   :  { %5143 = vmatprep.subr.bf16.mxu0 %v5670_v3 }
0x23ed   :  { %5145 = vmatpush3.bf16.msra.mxu0 %v5987_v8  ;;  %v1730_v8 = vrot.slane %v1636_v53, 6  ;;  %v1965_v53 = vld [vmem:[%s6856_s8 + $0x10] sm:$0xff] }
0x23ee   :  { %5152 = vmatprep.subr.bf16.mxu0 %v5670_v3  ;;  %v5150_v56 = vpack.c.bf16 %v1966_v55, %v1965_v53 }
0x24bb   :  { %v1714_v58 = vpop.f32.mrb[14].mxu0 }
0x24bc   :  { %v1719_v24 = vrot.slane %v1714_v58, 6  ;;  %v4791_v59 = vpop.f32.mrb[15].mxu0  ;;  %v2055_v58 = vld [vmem:[%s6857_s1] sm:$0x3] }
0x24be   :  { %v1721_v60 = vadd.f32 %v1719_v24, %v6014_v19 }
0x24c0   :  { %5516 = vtanh.f32 %v1721_v60  ;;  %v4372_v62 = vmul.f32 -1.442695, %v1721_v60 }
0x24c2   :  { %5518 = vpow2.f32 %v4372_v62  ;;  %v2066_v62 = vld [vmem:[%s6858_s10] sm:$0xff] }
0x24ca   :  { %v5517_v61 = vpop.eup %5516 }
0x24cb   :  { %1734 = vrot.lane.b32.xlu1 %v5517_v61, %s5673_s27 }
0x24cc   :  { %v5519_v4 = vpop.eup %5518 }
0x24cd   :  { %v1725_v44 = vadd.f32 1.0, %v5519_v4  ;;  %v2067_v4 = vld [vmem:[%s6858_s10 + $0x8] sm:$0xff] }
0x24cf   :  { %5520 = vrcp.f32 %v1725_v44  ;;  %v5153_v44 = vpack.c.bf16 %v2067_v4, %v2066_v62 }
0x24d9   :  { %v5521_v63 = vpop.eup %5520 }
0x24da   :  { %v1732_v2 = vmul.f32 %v5521_v63, %v1730_v8 }
0x253d   :  { %v1735_v0 = vpop.permute.xlu1 %1734 }
0x253e   :  { %v1737_v1 = vmul.f32 %v5521_v63, %v1735_v0 }
0x2540   :  { %1739 = vrot.lane.b32.xlu0 %v1737_v1, %s5674_s4 }
0x25b2   :  { %v1740_v5 = vpop.permute.xlu0 %1739 }
0x25b3   :  { %v1742_v6 = vadd.f32 %v1740_v5, %v1732_v2 }
0x25b5   :  { %5522 = vtanh.f32 %v1742_v6  ;;  %v1837_v29 = vrot.slane %v1742_v6, 6  ;;  %v2150_v6 = vld [vmem:[%s6861_s12] sm:$0xff] }
0x25bf   :  { %v5523_v12 = vpop.eup %5522 }
0x25c0   :  { %1745 = vrot.lane.b32.xlu1 %v5523_v12, %s5673_s27  ;;  %v2151_v12 = vld [vmem:[%s6861_s12 + $0x8] sm:$0xff] }
0x2632   :  { %v1746_v9 = vpop.permute.xlu1 %1745 }
0x2633   :  { %v1748_v10 = vmul.f32 %v5521_v63, %v1746_v9  ;;  %v4377_v63 = vld [vmem:[%s6859_s9] ss:$0 sm:$0xff]  ;;  %v5156_v9 = vpack.c.bf16 %v2151_v12, %v2150_v6  ;;  %s5676_s9 = smov 112  }
0x2635   :  { %v1750_v11 = vrot.slane %v1748_v10, 2 }
0x2637   :  { %1751 = vrot.lane.b32.xlu0 %v1750_v11, %s5674_s4 }
0x26a9   :  { %v1752_v17 = vpop.permute.xlu0 %1751 }
0x26aa   :  { %4801 = vmatmul.mubr.msk.f32.vlgmr.msra.gmra.mrb[16].mxu1 %vm173_vm3, %v1752_v17 }
0x26ab   :  { %4822 = vmatprep.mubr.msk.f32.mxu1 %vm5671_vm1, %v5672_v7 }
0x277d   :  { %v1821_v13 = vpop.f32.mrb[16].mxu1 }
0x277e   :  { %v1826_v14 = vrot.slane %v1821_v13, 4  ;;  %v4802_v15 = vpop.f32.mrb[17].mxu1  ;;  %v2234_v13 = vld [vmem:[%s6862_s13] sm:$0xff] }
0x2780   :  { %v1828_v16 = vadd.f32 %v1826_v14, %v6014_v19  ;;  %v2235_v14 = vld [vmem:[%s6862_s13 + $0x8] sm:$0xff] }
0x2782   :  { %5524 = vtanh.f32 %v1828_v16  ;;  %v4374_v20 = vmul.f32 -1.442695, %v1828_v16  ;;  %v6145_v16 = vpack.c.bf16 %v2235_v14, %v2234_v13 }
0x2784   :  { %5526 = vpow2.f32 %v4374_v20  ;;  %v2152_v20 = vld [vmem:[%s6861_s12 + $0x10] sm:$0xff] }
0x278c   :  { %v5525_v18 = vpop.eup %5524 }
0x278d   :  { %1841 = vrot.lane.b32.xlu1 %v5525_v18, %s5673_s27 }
0x278e   :  { %v5527_v22 = vpop.eup %5526 }
0x278f   :  { %v1832_v23 = vadd.f32 1.0, %v5527_v22  ;;  %v2153_v22 = vld [vmem:[%s6861_s12 + $0x18] sm:$0xff] }
0x2791   :  { %5528 = vrcp.f32 %v1832_v23  ;;  %v5159_v23 = vpack.c.bf16 %v2153_v22, %v2152_v20 }
0x279b   :  { %v5529_v25 = vpop.eup %5528 }
0x279c   :  { %v1839_v30 = vmul.f32 %v5529_v25, %v1837_v29  ;;  %v4379_v29 = vld [vmem:[%s6863_s11] ss:$0 sm:$0xff] }
0x27ff   :  { %v1842_v27 = vpop.permute.xlu1 %1841 }
0x2800   :  { %v1844_v28 = vmul.f32 %v5529_v25, %v1842_v27  ;;  %v2237_v27 = vld [vmem:[%s6862_s13 + $0x18] sm:$0xff] }
0x2802   :  { %1846 = vrot.lane.b32.xlu0 %v1844_v28, %s5674_s4 }
0x2874   :  { %v1847_v31 = vpop.permute.xlu0 %1846 }
0x2875   :  { %v1849_v32 = vadd.f32 %v1847_v31, %v1839_v30 }
0x2877   :  { %5530 = vtanh.f32 %v1849_v32  ;;  %v1944_v48 = vrot.slane %v1849_v32, 6 }
0x2881   :  { %v5531_v33 = vpop.eup %5530 }
0x2882   :  { %1852 = vrot.lane.b32.xlu1 %v5531_v33, %s5673_s27 }
0x28f4   :  { %v1853_v34 = vpop.permute.xlu1 %1852 }
0x28f5   :  { %v1855_v35 = vmul.f32 %v5529_v25, %v1853_v34  ;;  %v2236_v25 = vld [vmem:[%s6862_s13 + $0x10] sm:$0xff] }
0x28f6   :  { %v6163_v28 = vpack.c.bf16 %v2237_v27, %v2236_v25 }
0x28f7   :  { %v1857_v21 = vrot.slane %v1855_v35, 4 }
0x28f9   :  { %1858 = vrot.lane.b32.xlu0 %v1857_v21, %s5674_s4  ;;  %v4381_v21 = vld [vmem:[%s6864_s14] ss:$0 sm:$0xff] }
0x296b   :  { %v1859_v36 = vpop.permute.xlu0 %1858 }
0x296c   :  { %4812 = vmatmul.mubr.msk.f32.vlgmr.msra.gmra.mrb[16].mxu0 %vm173_vm3, %v1859_v36 }
0x296d   :  { %4829 = vmatprep.mubr.msk.f32.mxu0 %vm5671_vm1, %v5672_v7  ;;  %5154 = vmatpush3.bf16.msra.mxu0 %v5153_v44 }
0x296e   :  { %5161 = vmatprep.subr.bf16.mxu0 %v5670_v3 }
0x2a3f   :  { %v1928_v37 = vpop.f32.mrb[16].mxu0 }
0x2a40   :  { %v1933_v38 = vrot.slane %v1928_v37, 2  ;;  %v4813_v39 = vpop.f32.mrb[17].mxu0 }
0x2a42   :  { %v1935_v40 = vadd.f32 %v1933_v38, %v6014_v19  ;;  %v1963_v19 = vld [vmem:[%s6856_s8] sm:$0xff] }
0x2a43   :  { %v5147_v54 = vpack.c.bf16 %v1964_v52, %v1963_v19 }
0x2a44   :  { %5532 = vtanh.f32 %v1935_v40  ;;  %v4376_v41 = vmul.f32 -1.442695, %v1935_v40 }
0x2a45   :  { %5148 = vmatpush3.bf16.msra.mxu1 %v5147_v54 }
0x2a46   :  { %5534 = vpow2.f32 %v4376_v41  ;;  %5149 = vmatprep.subr.bf16.mxu1 %v5670_v3 }
0x2a49   :  { %5151 = vmatpush3.bf16.msra.mxu1 %v5150_v56 }
0x2a4a   :  { %5155 = vmatprep.subr.bf16.mxu1 %v5670_v3 }
0x2a4e   :  { %v5533_v26 = vpop.eup %5532 }
0x2a4f   :  { %1948 = vrot.lane.b32.xlu1 %v5533_v26, %s5673_s27 }
0x2a50   :  { %v5535_v42 = vpop.eup %5534 }
0x2a51   :  { %v1939_v43 = vadd.f32 1.0, %v5535_v42 }
0x2a53   :  { %5536 = vrcp.f32 %v1939_v43 }
0x2a5d   :  { %v5537_v45 = vpop.eup %5536 }
0x2a5e   :  { %v1946_v49 = vmul.f32 %v5537_v45, %v1944_v48 }
0x2ac1   :  { %v1949_v46 = vpop.permute.xlu1 %1948 }
0x2ac2   :  { %v1951_v47 = vmul.f32 %v5537_v45, %v1949_v46 }
0x2ac4   :  { %1953 = vrot.lane.b32.xlu0 %v1951_v47, %s5674_s4 }
0x2b36   :  { %v1954_v50 = vpop.permute.xlu0 %1953 }
0x2b37   :  { %v1956_v51 = vadd.f32 %v1954_v50, %v1946_v49 }
0x2b39   :  { %5538 = vtanh.f32 %v1956_v51 }
0x2b43   :  { %v5539_v57 = vpop.eup %5538 }
0x2b44   :  { %1959 = vrot.lane.b32.xlu1 %v5539_v57, %s5673_s27 }
0x2b48   :  { %2057 = vrot.lane.b32.xlu1 %v2055_v58, %s5675_s30 }
0x2bb6   :  { %v1960_v24 = vpop.permute.xlu1 %1959 }
0x2bb7   :  { %v1962_v59 = vmul.f32 %v5537_v45, %v1960_v24 }
0x2bb9   :  { %v1975_v60 = vrot.slane %v1962_v59, 6 }
0x2bba   :  { %v2058_v10 = vpop.permute.xlu1 %2057 }
0x2bbb   :  { %1976 = vrot.lane.b32.xlu0 %v1975_v60, %s5674_s4 }
0x2c2d   :  { %v1977_v61 = vpop.permute.xlu0 %1976 }
0x2c2e   :  { %4823 = vmatmul.mubr.msk.f32.vlgmr.msra.gmra.mrb[18].mxu1 %vm173_vm3, %v1977_v61 }
0x2c2f   :  { %4840 = vmatprep.mubr.msk.f32.mxu1 %vm5671_vm1, %v5672_v7  ;;  %5157 = vmatpush3.bf16.msra.mxu1 %v5156_v9 }
0x2c30   :  { %5158 = vmatprep.subr.bf16.mxu1 %v5670_v3 }
0x2c33   :  { %5160 = vmatpush3.bf16.msra.mxu1 %v5159_v23 }
0x2c34   :  { %5167 = vmatprep.subr.bf16.mxu1 %v5670_v3 }
0x2d01   :  { %v2046_v0 = vpop.f32.mrb[18].mxu1 }
0x2d02   :  { %v2047_v1 = vadd.f32 %v4377_v63, %v2046_v0  ;;  %v4824_v8 = vpop.f32.mrb[19].mxu1 }
0x2d04   :  { %2051 = vst.msk [vmem:[%s6860_s20] sm:$0x3] %vm2050_vm6, %v2047_v1  ;;  %v2052_v2 = vmul.f32 0.5, %v2047_v1 }
0x2d06   :  { %v2053_v5 = vmul.f32 1.442695, %v2052_v2 }
0x2d08   :  { %5540 = vpow2.f32 %v2053_v5 }
0x2d12   :  { %v5541_v11 = vpop.eup %5540 }
0x2d13   :  { %v2060_v17 = vmul.f32 %v5541_v11, %v2058_v10 }
0x2d15   :  { %2062 = vrot.lane.b32.xlu0 %v2060_v17, %s5676_s9 }
0x2d87   :  { %v2063_v15 = vpop.permute.xlu0 %2062 }
0x2d88   :  { %v2065_v18 = vadd.f32 %v2063_v15, %v2047_v1 }
0x2d8a   :  { %4830 = vmatmul.mubr.msk.f32.vlgmr.msra.gmra.mrb[18].mxu0 %vm2075_vm7, %v2065_v18 }
0x2d8b   :  { %5163 = vmatpush3.bf16.msra.mxu0 %v6145_v16  ;;  %4851 = vmatprep.mubr.msk.f32.mxu0 %vm5671_vm1, %v5672_v7 }
0x2d8c   :  { %5164 = vmatprep.subr.bf16.mxu0 %v5670_v3 }
0x2d8f   :  { %5166 = vmatpush3.bf16.msra.mxu0 %v6163_v28 }
0x2d90   :  { %5173 = vmatprep.subr.bf16.mxu0 %v5670_v3 }
0x2d92   :  { %4852 = vmatmul.mubr.f32.vlgmr.msra.gmra.mrb[20].mxu0 %v5672_v7 }
0x2d93   :  { %5175 = vmatpush3.bf16.msra.mxu0 %v6145_v16  ;;  %4873 = vmatprep.mubr.msk.f32.mxu0 %vm5671_vm1, %v5672_v7 }
0x2d94   :  { %5176 = vmatprep.subr.bf16.mxu0 %v5670_v3 }
0x2d97   :  { %5178 = vmatpush3.bf16.msra.mxu0 %v6163_v28 }
0x2d98   :  { %5185 = vmatprep.subr.bf16.mxu0 %v5670_v3 }
0x2e5d   :  { %v2145_v30 = vpop.f32.mrb[18].mxu0 }
0x2e5e   :  { %v2146_v31 = vadd.f32 %v4379_v29, %v2145_v30  ;;  %v4831_v32 = vpop.f32.mrb[19].mxu0 }
0x2e60   :  { %v2149_v33 = vmax.f32 %v2146_v31, 0.0 }
0x2e62   :  { %4841 = vmatmul.mubr.msk.f32.vlgmr.msra.gmra.mrb[20].mxu1 %vm173_vm3, %v2149_v33 }
0x2e63   :  { %5169 = vmatpush3.bf16.msra.mxu1 %v6145_v16  ;;  %4862 = vmatprep.mubr.msk.f32.mxu1 %vm5671_vm1, %v5672_v7 }
0x2e64   :  { %5170 = vmatprep.subr.bf16.mxu1 %v5670_v3 }
0x2e65   :  { %v2304_v34 = vpop.f32.mrb[20].mxu0 }
0x2e66   :  { %v4853_v35 = vpop.f32.mrb[21].mxu0 }
0x2e67   :  { %5172 = vmatpush3.bf16.msra.mxu1 %v6163_v28 }
0x2e68   :  { %5179 = vmatprep.subr.bf16.mxu1 %v5670_v3 }
0x2f35   :  { %v2230_v36 = vpop.f32.mrb[20].mxu1 }
0x2f36   :  { %v6188_v37 = vadd.f32 %v4381_v21, %v2230_v36  ;;  %v4842_v38 = vpop.f32.mrb[21].mxu1 }
0x2f38   :  { %v2308_v39 = vadd.f32 %v2304_v34, %v6188_v37 }
0x2f3a   :  { %5542 = vtanh.f32 %v2308_v39  ;;  %v4383_v26 = vmul.f32 -1.442695, %v2308_v39 }
0x2f3c   :  { %5544 = vpow2.f32 %v4383_v26 }
0x2f44   :  { %v5543_v40 = vpop.eup %5542 }
0x2f45   :  { %2318 = vrot.lane.b32.xlu1 %v5543_v40, %s5673_s27 }
0x2f46   :  { %v5545_v41 = vpop.eup %5544 }
0x2f47   :  { %v2312_v42 = vadd.f32 1.0, %v5545_v41 }
0x2f49   :  { %5546 = vrcp.f32 %v2312_v42 }
0x2f53   :  { %v5547_v43 = vpop.eup %5546 }
0x2f54   :  { %v2316_v47 = vmul.f32 0.0, %v5547_v43 }
0x2fb7   :  { %v2319_v45 = vpop.permute.xlu1 %2318 }
0x2fb8   :  { %v2321_v46 = vmul.f32 %v5547_v43, %v2319_v45 }
0x2fba   :  { %2323 = vrot.lane.b32.xlu0 %v2321_v46, %s5674_s4 }
0x302c   :  { %v2324_v48 = vpop.permute.xlu0 %2323 }
0x302d   :  { %v2326_v49 = vadd.f32 %v2324_v48, %v2316_v47 }
0x302f   :  { %5548 = vtanh.f32 %v2326_v49 }
0x3039   :  { %v5549_v50 = vpop.eup %5548 }
0x303a   :  { %2329 = vrot.lane.b32.xlu1 %v5549_v50, %s5673_s27 }
0x30ac   :  { %v2330_v51 = vpop.permute.xlu1 %2329 }
0x30ad   :  { %v6194_v19 = vmul.f32 %v5547_v43, %v2330_v51 }
0x30af   :  { %2334 = vrot.lane.b32.xlu0 %v6194_v19, %s5674_s4 }
0x3121   :  { %v2335_v52 = vpop.permute.xlu0 %2334 }
0x3122   :  { %4863 = vmatmul.mubr.msk.f32.vlgmr.msra.gmra.mrb[22].mxu1 %vm173_vm3, %v2335_v52 }
0x3123   :  { %5181 = vmatpush3.bf16.msra.mxu1 %v6145_v16  ;;  %4884 = vmatprep.mubr.msk.f32.mxu1 %vm5671_vm1, %v5672_v7 }
0x3124   :  { %5182 = vmatprep.subr.bf16.mxu1 %v5670_v3 }
0x3127   :  { %5184 = vmatpush3.bf16.msra.mxu1 %v6163_v28 }
0x3128   :  { %5191 = vmatprep.subr.bf16.mxu1 %v5670_v3 }
0x31f5   :  { %v2404_v53 = vpop.f32.mrb[22].mxu1 }
0x31f6   :  { %v2408_v54 = vadd.f32 %v2404_v53, %v6188_v37  ;;  %v4864_v55 = vpop.f32.mrb[23].mxu1 }
0x31f8   :  { %5550 = vtanh.f32 %v2408_v54  ;;  %v4385_v57 = vmul.f32 -1.442695, %v2408_v54 }
0x31fa   :  { %5552 = vpow2.f32 %v4385_v57 }
0x3202   :  { %v5551_v56 = vpop.eup %5550 }
0x3203   :  { %2418 = vrot.lane.b32.xlu1 %v5551_v56, %s5673_s27 }
0x3204   :  { %v5553_v58 = vpop.eup %5552 }
0x3205   :  { %v2412_v24 = vadd.f32 1.0, %v5553_v58 }
0x3207   :  { %5554 = vrcp.f32 %v2412_v24 }
0x3211   :  { %v5555_v59 = vpop.eup %5554 }
0x3212   :  { %v2416_v62 = vmul.f32 %v5555_v59, %v2326_v49 }
0x3275   :  { %v2419_v60 = vpop.permute.xlu1 %2418 }
0x3276   :  { %v2421_v61 = vmul.f32 %v5555_v59, %v2419_v60 }
0x3278   :  { %2423 = vrot.lane.b32.xlu0 %v2421_v61, %s5674_s4 }
0x32ea   :  { %v2424_v4 = vpop.permute.xlu0 %2423 }
0x32eb   :  { %v2426_v44 = vadd.f32 %v2424_v4, %v2416_v62 }
0x32ed   :  { %5556 = vtanh.f32 %v2426_v44 }
0x32f7   :  { %v5557_v63 = vpop.eup %5556 }
0x32f8   :  { %2429 = vrot.lane.b32.xlu1 %v5557_v63, %s5673_s27 }
0x336a   :  { %v2430_v0 = vpop.permute.xlu1 %2429 }
0x336b   :  { %v2432_v1 = vmul.f32 %v5555_v59, %v2430_v0 }
0x336d   :  { %2434 = vrot.lane.b32.xlu0 %v2432_v1, %s5674_s4  ;;  %v3033_v23 = vrot.slane %v2432_v1, 6 }
0x336f   :  { %v3046_v30 = vsel %vm1016_vm4, %v6194_v19, %v3033_v23 }
0x33df   :  { %v2435_v8 = vpop.permute.xlu0 %2434 }
0x33e0   :  { %4874 = vmatmul.mubr.msk.f32.vlgmr.msra.gmra.mrb[22].mxu0 %vm173_vm3, %v2435_v8 }
0x33e1   :  { %5187 = vmatpush3.bf16.msra.mxu0 %v6145_v16  ;;  %4895 = vmatprep.mubr.msk.f32.mxu0 %vm5671_vm1, %v5672_v7 }
0x33e2   :  { %5188 = vmatprep.subr.bf16.mxu0 %v5670_v3 }
0x33e5   :  { %5190 = vmatpush3.bf16.msra.mxu0 %v6163_v28 }
0x33e6   :  { %5197 = vmatprep.subr.bf16.mxu0 %v5670_v3 }
0x34b3   :  { %v2504_v2 = vpop.f32.mrb[22].mxu0 }
0x34b4   :  { %v2508_v5 = vadd.f32 %v2504_v2, %v6188_v37  ;;  %v4875_v6 = vpop.f32.mrb[23].mxu0 }
0x34b6   :  { %5558 = vtanh.f32 %v2508_v5  ;;  %v4387_v9 = vmul.f32 -1.442695, %v2508_v5 }
0x34b8   :  { %5560 = vpow2.f32 %v4387_v9 }
0x34c0   :  { %v5559_v12 = vpop.eup %5558 }
0x34c1   :  { %2518 = vrot.lane.b32.xlu1 %v5559_v12, %s5673_s27 }
0x34c2   :  { %v5561_v10 = vpop.eup %5560 }
0x34c3   :  { %v2512_v11 = vadd.f32 1.0, %v5561_v10 }
0x34c5   :  { %5562 = vrcp.f32 %v2512_v11 }
0x34cf   :  { %v5563_v17 = vpop.eup %5562 }
0x34d0   :  { %v2516_v15 = vmul.f32 %v5563_v17, %v2426_v44 }
0x3533   :  { %v2519_v13 = vpop.permute.xlu1 %2518 }
0x3534   :  { %v2521_v14 = vmul.f32 %v5563_v17, %v2519_v13 }
0x3536   :  { %2523 = vrot.lane.b32.xlu0 %v2521_v14, %s5674_s4 }
0x35a8   :  { %v2524_v18 = vpop.permute.xlu0 %2523 }
0x35a9   :  { %v2526_v20 = vadd.f32 %v2524_v18, %v2516_v15 }
0x35ab   :  { %5564 = vtanh.f32 %v2526_v20 }
0x35b5   :  { %v5565_v22 = vpop.eup %5564 }
0x35b6   :  { %2529 = vrot.lane.b32.xlu1 %v5565_v22, %s5673_s27 }
0x3628   :  { %v2530_v25 = vpop.permute.xlu1 %2529 }
0x3629   :  { %v2532_v27 = vmul.f32 %v5563_v17, %v2530_v25 }
0x362b   :  { %v3035_v29 = vrot.slane %v2532_v27, 4  ;;  %2534 = vrot.lane.b32.xlu0 %v2532_v27, %s5674_s4 }
0x362d   :  { %v3047_v31 = vsel %vm1018_vm5, %v3046_v30, %v3035_v29 }
0x369d   :  { %v2535_v32 = vpop.permute.xlu0 %2534 }
0x369e   :  { %4885 = vmatmul.mubr.msk.f32.vlgmr.msra.gmra.mrb[24].mxu1 %vm173_vm3, %v2535_v32 }
0x369f   :  { %5193 = vmatpush3.bf16.msra.mxu1 %v6145_v16  ;;  %4906 = vmatprep.mubr.msk.f32.mxu1 %vm5671_vm1, %v5672_v7 }
0x36a0   :  { %5194 = vmatprep.subr.bf16.mxu1 %v5670_v3 }
0x36a3   :  { %5196 = vmatpush3.bf16.msra.mxu1 %v6163_v28 }
0x36a4   :  { %5203 = vmatprep.subr.bf16.mxu1 %v5670_v3 }
0x3771   :  { %v2604_v33 = vpop.f32.mrb[24].mxu1 }
0x3772   :  { %v2608_v34 = vadd.f32 %v2604_v33, %v6188_v37  ;;  %v4886_v35 = vpop.f32.mrb[25].mxu1 }
0x3774   :  { %5566 = vtanh.f32 %v2608_v34  ;;  %v4389_v36 = vmul.f32 -1.442695, %v2608_v34 }
0x3776   :  { %5568 = vpow2.f32 %v4389_v36 }
0x377e   :  { %v5567_v21 = vpop.eup %5566 }
0x377f   :  { %2618 = vrot.lane.b32.xlu1 %v5567_v21, %s5673_s27 }
0x3780   :  { %v5569_v38 = vpop.eup %5568 }
0x3781   :  { %v2612_v39 = vadd.f32 1.0, %v5569_v38 }
0x3783   :  { %5570 = vrcp.f32 %v2612_v39 }
0x378d   :  { %v5571_v40 = vpop.eup %5570 }
0x378e   :  { %v2616_v42 = vmul.f32 %v5571_v40, %v2526_v20 }
0x37f1   :  { %v2619_v26 = vpop.permute.xlu1 %2618 }
0x37f2   :  { %v2621_v41 = vmul.f32 %v5571_v40, %v2619_v26 }
0x37f4   :  { %2623 = vrot.lane.b32.xlu0 %v2621_v41, %s5674_s4 }
0x3866   :  { %v2624_v43 = vpop.permute.xlu0 %2623 }
0x3867   :  { %v2626_v45 = vadd.f32 %v2624_v43, %v2616_v42 }
0x3869   :  { %5572 = vtanh.f32 %v2626_v45 }
0x3873   :  { %v5573_v46 = vpop.eup %5572 }
0x3874   :  { %2629 = vrot.lane.b32.xlu1 %v5573_v46, %s5673_s27 }
0x38e6   :  { %v2630_v47 = vpop.permute.xlu1 %2629 }
0x38e7   :  { %v2632_v48 = vmul.f32 %v5571_v40, %v2630_v47 }
0x38e9   :  { %v3037_v49 = vrot.slane %v2632_v48, 2  ;;  %2634 = vrot.lane.b32.xlu0 %v2632_v48, %s5674_s4 }
0x38eb   :  { %v6238_v50 = vsel %vm90_vm2, %v3047_v31, %v3037_v49 }
0x395b   :  { %v2635_v51 = vpop.permute.xlu0 %2634 }
0x395c   :  { %4896 = vmatmul.mubr.msk.f32.vlgmr.msra.gmra.mrb[24].mxu0 %vm173_vm3, %v2635_v51 }
0x395d   :  { %5199 = vmatpush3.bf16.msra.mxu0 %v6145_v16  ;;  %4917 = vmatprep.mubr.msk.f32.mxu0 %vm5671_vm1, %v5672_v7 }
0x395e   :  { %5200 = vmatprep.subr.bf16.mxu0 %v5670_v3 }
0x3961   :  { %5202 = vmatpush3.bf16.msra.mxu0 %v6163_v28 }
0x3a2f   :  { %v2704_v19 = vpop.f32.mrb[24].mxu0 }
0x3a30   :  { %v2708_v52 = vadd.f32 %v2704_v19, %v6188_v37  ;;  %v4897_v53 = vpop.f32.mrb[25].mxu0 }
0x3a32   :  { %5574 = vtanh.f32 %v2708_v52  ;;  %v4391_v55 = vmul.f32 -1.442695, %v2708_v52 }
0x3a34   :  { %5576 = vpow2.f32 %v4391_v55 }
0x3a3c   :  { %v5575_v54 = vpop.eup %5574 }
0x3a3d   :  { %2718 = vrot.lane.b32.xlu1 %v5575_v54, %s5673_s27 }
0x3a3e   :  { %v5577_v56 = vpop.eup %5576 }
0x3a3f   :  { %v2712_v57 = vadd.f32 1.0, %v5577_v56 }
0x3a41   :  { %5578 = vrcp.f32 %v2712_v57 }
0x3a4b   :  { %v5579_v58 = vpop.eup %5578 }
0x3a4c   :  { %v2716_v60 = vmul.f32 %v5579_v58, %v2626_v45 }
0x3aaf   :  { %v2719_v24 = vpop.permute.xlu1 %2718 }
0x3ab0   :  { %v2721_v59 = vmul.f32 %v5579_v58, %v2719_v24  ;;  %v3052_v24 = vld [vmem:[%s6865_s15] sm:$0xff] }
0x3ab2   :  { %2723 = vrot.lane.b32.xlu0 %v2721_v59, %s5674_s4  ;;  %v3053_v59 = vld [vmem:[%s6865_s15 + $0x8] sm:$0xff] }
0x3b24   :  { %v2724_v61 = vpop.permute.xlu0 %2723 }
0x3b25   :  { %v2726_v62 = vadd.f32 %v2724_v61, %v2716_v60  ;;  %v3148_v60 = vld [vmem:[%s6866_s16] sm:$0xff]  ;;  %v3149_v61 = vld [vmem:[%s6866_s16 + $0x8] sm:$0xff] }
0x3b27   :  { %5580 = vtanh.f32 %v2726_v62 }
0x3b31   :  { %v5581_v4 = vpop.eup %5580 }
0x3b32   :  { %2729 = vrot.lane.b32.xlu1 %v5581_v4, %s5673_s27  ;;  %v3055_v4 = vld [vmem:[%s6865_s15 + $0x18] sm:$0xff] }
0x3ba4   :  { %v2730_v44 = vpop.permute.xlu1 %2729 }
0x3ba5   :  { %v2732_v63 = vmul.f32 %v5579_v58, %v2730_v44  ;;  %v6298_v44 = vpack.c.bf16 %v3149_v61, %v3148_v60 }
0x3ba7   :  { %2734 = vrot.lane.b32.xlu0 %v2732_v63, %s5674_s4 }
0x3c19   :  { %v2735_v0 = vpop.permute.xlu0 %2734 }
0x3c1a   :  { %4907 = vmatmul.mubr.msk.f32.vlgmr.msra.gmra.mrb[26].mxu1 %vm173_vm3, %v2735_v0  ;;  %v3150_v0 = vld [vmem:[%s6866_s16 + $0x10] sm:$0xff] }
0x3c1b   :  { %5205 = vmatpush3.bf16.msra.mxu1 %v6145_v16  ;;  %4928 = vmatprep.mubr.msk.f32.mxu1 %vm5671_vm1, %v5672_v7 }
0x3c1c   :  { %5206 = vmatprep.subr.bf16.mxu1 %v5670_v3 }
0x3c1f   :  { %5208 = vmatpush3.bf16.msra.mxu1 %v6163_v28 }
0x3c20   :  { %5217 = vmatprep.subr.bf16.mxu1 %v5670_v3 }
0x3ced   :  { %v2804_v1 = vpop.f32.mrb[26].mxu1 }
0x3cee   :  { %v2808_v8 = vadd.f32 %v2804_v1, %v6188_v37  ;;  %v4908_v2 = vpop.f32.mrb[27].mxu1  ;;  %v3151_v1 = vld [vmem:[%s6866_s16 + $0x18] sm:$0xff] }
0x3cf0   :  { %5582 = vtanh.f32 %v2808_v8  ;;  %v4393_v6 = vmul.f32 -1.442695, %v2808_v8  ;;  %v6307_v8 = vpack.c.bf16 %v3151_v1, %v3150_v0 }
0x3cf2   :  { %5584 = vpow2.f32 %v4393_v6 }
0x3cfa   :  { %v5583_v5 = vpop.eup %5582 }
0x3cfb   :  { %2818 = vrot.lane.b32.xlu1 %v5583_v5, %s5673_s27 }
0x3cfc   :  { %v5585_v16 = vpop.eup %5584 }
0x3cfd   :  { %v2812_v12 = vadd.f32 1.0, %v5585_v16 }
0x3cff   :  { %5586 = vrcp.f32 %v2812_v12 }
0x3d09   :  { %v5587_v9 = vpop.eup %5586 }
0x3d0a   :  { %v2816_v28 = vmul.f32 %v5587_v9, %v2726_v62  ;;  %v3054_v62 = vld [vmem:[%s6865_s15 + $0x10] sm:$0xff] }
0x3d6d   :  { %v2819_v10 = vpop.permute.xlu1 %2818 }
0x3d6e   :  { %v2821_v11 = vmul.f32 %v5587_v9, %v2819_v10 }
0x3d70   :  { %2823 = vrot.lane.b32.xlu0 %v2821_v11, %s5674_s4 }
0x3de2   :  { %v2824_v17 = vpop.permute.xlu0 %2823 }
0x3de3   :  { %v2826_v13 = vadd.f32 %v2824_v17, %v2816_v28  ;;  %v4398_v28 = vld [vmem:[%s6867_s17] ss:$0 sm:$0xff] }
0x3de5   :  { %5588 = vtanh.f32 %v2826_v13 }
0x3def   :  { %v5589_v14 = vpop.eup %5588 }
0x3df0   :  { %2829 = vrot.lane.b32.xlu1 %v5589_v14, %s5673_s27 }
0x3e62   :  { %v2830_v15 = vpop.permute.xlu1 %2829 }
0x3e63   :  { %v2832_v18 = vmul.f32 %v5587_v9, %v2830_v15 }
0x3e65   :  { %2834 = vrot.lane.b32.xlu0 %v2832_v18, %s5674_s4  ;;  %v3039_v39 = vrot.slane %v2832_v18, 6 }
0x3e67   :  { %v3049_v42 = vsel %vm1016_vm4, %v2732_v63, %v3039_v39  ;;  %v5213_v63 = vpack.c.bf16 %v3055_v4, %v3054_v62 }
0x3ed7   :  { %v2835_v20 = vpop.permute.xlu0 %2834 }
0x3ed8   :  { %4918 = vmatmul.mubr.msk.f32.vlgmr.msra.gmra.mrb[26].mxu0 %vm173_vm3, %v2835_v20 }
0x3fab   :  { %v2904_v22 = vpop.f32.mrb[26].mxu0 }
0x3fac   :  { %v2908_v23 = vadd.f32 %v2904_v22, %v6188_v37  ;;  %v4919_v25 = vpop.f32.mrb[27].mxu0 }
0x3fae   :  { %5590 = vtanh.f32 %v2908_v23  ;;  %v4395_v29 = vmul.f32 -1.442695, %v2908_v23 }
0x3fb0   :  { %5592 = vpow2.f32 %v4395_v29 }
0x3fb8   :  { %v5591_v27 = vpop.eup %5590 }
0x3fb9   :  { %2918 = vrot.lane.b32.xlu1 %v5591_v27, %s5673_s27 }
0x3fba   :  { %v5593_v30 = vpop.eup %5592 }
0x3fbb   :  { %v2912_v31 = vadd.f32 1.0, %v5593_v30 }
0x3fbd   :  { %5594 = vrcp.f32 %v2912_v31 }
0x3fc7   :  { %v5595_v32 = vpop.eup %5594 }
0x3fc8   :  { %v2916_v35 = vmul.f32 %v5595_v32, %v2826_v13 }
0x402b   :  { %v2919_v33 = vpop.permute.xlu1 %2918 }
0x402c   :  { %v2921_v34 = vmul.f32 %v5595_v32, %v2919_v33 }
0x402e   :  { %2923 = vrot.lane.b32.xlu0 %v2921_v34, %s5674_s4 }
0x40a0   :  { %v2924_v21 = vpop.permute.xlu0 %2923 }
0x40a1   :  { %v2926_v36 = vadd.f32 %v2924_v21, %v2916_v35 }
0x40a3   :  { %5596 = vtanh.f32 %v2926_v36 }
0x40ad   :  { %v5597_v38 = vpop.eup %5596 }
0x40ae   :  { %2929 = vrot.lane.b32.xlu1 %v5597_v38, %s5673_s27 }
0x4120   :  { %v2930_v40 = vpop.permute.xlu1 %2929 }
0x4121   :  { %v2932_v26 = vmul.f32 %v5595_v32, %v2930_v40 }
0x4123   :  { %v3041_v41 = vrot.slane %v2932_v26, 4  ;;  %2934 = vrot.lane.b32.xlu0 %v2932_v26, %s5674_s4 }
0x4125   :  { %v3050_v43 = vsel %vm1018_vm5, %v3049_v42, %v3041_v41 }
0x4195   :  { %v2935_v45 = vpop.permute.xlu0 %2934 }
0x4196   :  { %4929 = vmatmul.mubr.msk.f32.vlgmr.msra.gmra.mrb[28].mxu1 %vm173_vm3, %v2935_v45 }
0x4197   :  { %4950 = vmatprep.mubr.msk.f32.mxu1 %vm5671_vm1, %v5672_v7  ;;  %5219 = vmatpush3.bf16.msra.mxu1 %v6298_v44 }
0x4198   :  { %5220 = vmatprep.subr.bf16.mxu1 %v5670_v3 }
0x419b   :  { %5222 = vmatpush3.bf16.msra.mxu1 %v6307_v8 }
0x419c   :  { %5229 = vmatprep.subr.bf16.mxu1 %v5670_v3 }
0x419e   :  { %4951 = vmatmul.mubr.f32.vlgmr.msra.gmra.mrb[30].mxu1 %v5672_v7 }
0x419f   :  { %5231 = vmatpush3.bf16.msra.mxu1 %v6298_v44  ;;  %4972 = vmatprep.mubr.msk.f32.mxu1 %vm5671_vm1, %v5672_v7 }
0x41a0   :  { %5232 = vmatprep.subr.bf16.mxu1 %v5670_v3 }
0x41a3   :  { %5234 = vmatpush3.bf16.msra.mxu1 %v6307_v8 }
0x41a4   :  { %5241 = vmatprep.subr.bf16.mxu1 %v5670_v3 }
0x4269   :  { %v3004_v46 = vpop.f32.mrb[28].mxu1 }
0x426a   :  { %v3008_v47 = vadd.f32 %v3004_v46, %v6188_v37  ;;  %v4930_v48 = vpop.f32.mrb[29].mxu1 }
0x426c   :  { %5598 = vtanh.f32 %v3008_v47  ;;  %v4397_v51 = vmul.f32 -1.442695, %v3008_v47 }
0x426e   :  { %5600 = vpow2.f32 %v4397_v51 }
0x4271   :  { %v3218_v10 = vpop.f32.mrb[30].mxu1 }
0x4272   :  { %v4952_v11 = vpop.f32.mrb[31].mxu1 }
0x4276   :  { %v5599_v49 = vpop.eup %5598 }
0x4277   :  { %3018 = vrot.lane.b32.xlu1 %v5599_v49, %s5673_s27 }
0x4278   :  { %v5601_v19 = vpop.eup %5600 }
0x4279   :  { %v3012_v52 = vadd.f32 1.0, %v5601_v19 }
0x427b   :  { %5602 = vrcp.f32 %v3012_v52 }
0x4285   :  { %v5603_v53 = vpop.eup %5602 }
0x4286   :  { %v3016_v56 = vmul.f32 %v5603_v53, %v2926_v36 }
0x42e9   :  { %v3019_v54 = vpop.permute.xlu1 %3018 }
0x42ea   :  { %v3021_v55 = vmul.f32 %v5603_v53, %v3019_v54 }
0x42ec   :  { %3023 = vrot.lane.b32.xlu0 %v3021_v55, %s5674_s4 }
0x42f0   :  { %3065 = vrot.lane.b32.xlu0 %v6238_v50, %s5674_s4  ;;  %v5209_v50 = vpack.c.bf16 %v3053_v59, %v3052_v24 }
0x42f2   :  { %5210 = vmatprep.subr.bf16.mxu0 %v5209_v50 }
0x42f3   :  { %5212 = vmatpush3.bf16.msra.mxu0 %v5209_v50 }
0x42f4   :  { %5214 = vmatprep.subr.bf16.mxu0 %v5213_v63 }
0x42f7   :  { %5216 = vmatpush3.bf16.msra.mxu0 %v5213_v63 }
0x42f8   :  { %5223 = vmatprep.subr.bf16.mxu0 %v5670_v3 }
0x435e   :  { %v3024_v37 = vpop.permute.xlu0 %3023 }
0x435f   :  { %v3026_v57 = vadd.f32 %v3024_v37, %v3016_v56 }
0x4361   :  { %5604 = vtanh.f32 %v3026_v57 }
0x4362   :  { %v3066_v58 = vpop.permute.xlu0 %3065 }
0x4363   :  { %4939 = vmatprep.mubr.msk.f32.mxu0 %vm173_vm3, %v3066_v58 }
0x436b   :  { %v5605_v2 = vpop.eup %5604 }
0x436c   :  { %3029 = vrot.lane.b32.xlu1 %v5605_v2, %s5673_s27 }
0x43de   :  { %v3030_v5 = vpop.permute.xlu1 %3029 }
0x43df   :  { %v3032_v6 = vmul.f32 %v5603_v53, %v3030_v5 }
0x43e1   :  { %v3044_v16 = vrot.slane %v3032_v6, 2 }
0x43e3   :  { %v3051_v12 = vsel %vm90_vm2, %v3050_v43, %v3044_v16 }
0x43e4   :  { %3067 = vrot.lane.b32.xlu1 %v3051_v12, %s5674_s4 }
0x4456   :  { %v3068_v9 = vpop.permute.xlu1 %3067 }
0x4457   :  { %4940 = vmatmul.mubr.msk.f32.vlgmr.msra.gmra.mrb[28].mxu0 %vm173_vm3, %v3068_v9 }
0x4458   :  { %5225 = vmatpush3.bf16.msra.mxu0 %v6298_v44  ;;  %4961 = vmatprep.mubr.msk.f32.mxu0 %vm5671_vm1, %v5672_v7 }
0x4459   :  { %5226 = vmatprep.subr.bf16.mxu0 %v5670_v3 }
0x445c   :  { %5228 = vmatpush3.bf16.msra.mxu0 %v6307_v8 }
0x445d   :  { %5235 = vmatprep.subr.bf16.mxu0 %v5670_v3 }
0x452a   :  { %v4941_v17 = vpop.f32.mrb[28].mxu0 }
0x452b   :  { %v6333_v13 = vadd.f32 %v4941_v17, %v4398_v28  ;;  %v3139_v14 = vpop.f32.mrb[29].mxu0 }
0x452c   :  { %v6335_v15 = vadd.f32 %v4398_v28, %v3139_v14 }
0x452e   :  { %v3222_v18 = vadd.f32 %v3218_v10, %v6335_v15 }
0x4530   :  { %5606 = vtanh.f32 %v3222_v18  ;;  %v4401_v22 = vmul.f32 -1.442695, %v3222_v18 }
0x4532   :  { %5608 = vpow2.f32 %v4401_v22 }
0x453a   :  { %v5607_v20 = vpop.eup %5606 }
0x453b   :  { %3232 = vrot.lane.b32.xlu0 %v5607_v20, %s5673_s27 }
0x453c   :  { %v5609_v23 = vpop.eup %5608 }
0x453d   :  { %v3226_v25 = vadd.f32 1.0, %v5609_v23 }
0x453f   :  { %5610 = vrcp.f32 %v3226_v25 }
0x4549   :  { %v5611_v27 = vpop.eup %5610 }
0x454a   :  { %v3230_v31 = vmul.f32 0.0, %v5611_v27 }
0x45ad   :  { %v3233_v29 = vpop.permute.xlu0 %3232 }
0x45ae   :  { %v3235_v30 = vmul.f32 %v5611_v27, %v3233_v29 }
0x45b0   :  { %3237 = vrot.lane.b32.xlu1 %v3235_v30, %s5674_s4 }
0x4622   :  { %v3238_v32 = vpop.permute.xlu1 %3237 }
0x4623   :  { %v3240_v33 = vadd.f32 %v3238_v32, %v3230_v31 }
0x4625   :  { %5612 = vtanh.f32 %v3240_v33  ;;  %v3334_v49 = vrot.slane %v3240_v33, 6 }
0x462f   :  { %v5613_v34 = vpop.eup %5612 }
0x4630   :  { %3243 = vrot.lane.b32.xlu0 %v5613_v34, %s5673_s27 }
0x46a2   :  { %v3244_v35 = vpop.permute.xlu0 %3243 }
0x46a3   :  { %v3246_v21 = vmul.f32 %v5611_v27, %v3244_v35 }
0x46a5   :  { %3248 = vrot.lane.b32.xlu1 %v3246_v21, %s5674_s4 }
0x4717   :  { %v6342_v36 = vpop.permute.xlu1 %3248 }
0x4718   :  { %4962 = vmatmul.mubr.msk.f32.vlgmr.msra.gmra.mrb[30].mxu0 %vm173_vm3, %v6342_v36 }
0x4719   :  { %5237 = vmatpush3.bf16.msra.mxu0 %v6298_v44  ;;  %4983 = vmatprep.mubr.msk.f32.mxu0 %vm5671_vm1, %v5672_v7 }
0x471a   :  { %5238 = vmatprep.subr.bf16.mxu0 %v5670_v3 }
0x471d   :  { %5240 = vmatpush3.bf16.msra.mxu0 %v6307_v8 }
0x471e   :  { %5247 = vmatprep.subr.bf16.mxu0 %v5670_v3 }
0x47eb   :  { %v3318_v38 = vpop.f32.mrb[30].mxu0 }
0x47ec   :  { %v3323_v39 = vrot.slane %v3318_v38, 6  ;;  %v4963_v40 = vpop.f32.mrb[31].mxu0 }
0x47ee   :  { %v3325_v26 = vadd.f32 %v3323_v39, %v6335_v15 }
0x47f0   :  { %5614 = vtanh.f32 %v3325_v26  ;;  %v4403_v42 = vmul.f32 -1.442695, %v3325_v26 }
0x47f2   :  { %5616 = vpow2.f32 %v4403_v42 }
0x47fa   :  { %v5615_v41 = vpop.eup %5614 }
0x47fb   :  { %3338 = vrot.lane.b32.xlu0 %v5615_v41, %s5673_s27 }
0x47fc   :  { %v5617_v43 = vpop.eup %5616 }
0x47fd   :  { %v3329_v45 = vadd.f32 1.0, %v5617_v43 }
0x47ff   :  { %5618 = vrcp.f32 %v3329_v45 }
0x4809   :  { %v5619_v46 = vpop.eup %5618 }
0x480a   :  { %v3336_v51 = vmul.f32 %v5619_v46, %v3334_v49 }
0x486d   :  { %v3339_v47 = vpop.permute.xlu0 %3338 }
0x486e   :  { %v3341_v48 = vmul.f32 %v5619_v46, %v3339_v47 }
0x4870   :  { %3343 = vrot.lane.b32.xlu1 %v3341_v48, %s5674_s4 }
0x48e2   :  { %v3344_v19 = vpop.permute.xlu1 %3343 }
0x48e3   :  { %v3346_v52 = vadd.f32 %v3344_v19, %v3336_v51 }
0x48e5   :  { %5620 = vtanh.f32 %v3346_v52  ;;  %v3441_v1 = vrot.slane %v3346_v52, 6 }
0x48ef   :  { %v5621_v53 = vpop.eup %5620 }
0x48f0   :  { %3349 = vrot.lane.b32.xlu0 %v5621_v53, %s5673_s27 }
0x4962   :  { %v3350_v54 = vpop.permute.xlu0 %3349 }
0x4963   :  { %v6356_v55 = vmul.f32 %v5619_v46, %v3350_v54 }
0x4965   :  { %v3354_v56 = vrot.slane %v6356_v55, 2  ;;  %v4024_v55 = vld [vmem:[%s6868_s18 + $0x38] sm:$0xff] }
0x4967   :  { %3355 = vrot.lane.b32.xlu1 %v3354_v56, %s5674_s4 }
0x49d9   :  { %v3356_v37 = vpop.permute.xlu1 %3355 }
0x49da   :  { %4973 = vmatmul.mubr.msk.f32.vlgmr.msra.gmra.mrb[32].mxu1 %vm173_vm3, %v3356_v37 }
0x49db   :  { %5243 = vmatpush3.bf16.msra.mxu1 %v6298_v44  ;;  %4994 = vmatprep.mubr.msk.f32.mxu1 %vm5671_vm1, %v5672_v7 }
0x49dc   :  { %5244 = vmatprep.subr.bf16.mxu1 %v5670_v3 }
0x49df   :  { %5246 = vmatpush3.bf16.msra.mxu1 %v6307_v8 }
0x49e0   :  { %5253 = vmatprep.subr.bf16.mxu1 %v5670_v3 }
0x4aad   :  { %v3425_v57 = vpop.f32.mrb[32].mxu1 }
0x4aae   :  { %v3430_v58 = vrot.slane %v3425_v57, 4  ;;  %v4974_v24 = vpop.f32.mrb[33].mxu1 }
0x4ab0   :  { %v3432_v59 = vadd.f32 %v3430_v58, %v6335_v15 }
0x4ab2   :  { %5622 = vtanh.f32 %v3432_v59  ;;  %v4405_v50 = vmul.f32 -1.442695, %v3432_v59 }
0x4ab4   :  { %5624 = vpow2.f32 %v4405_v50 }
0x4abc   :  { %v5623_v60 = vpop.eup %5622 }
0x4abd   :  { %3445 = vrot.lane.b32.xlu0 %v5623_v60, %s5673_s27 }
0x4abe   :  { %v5625_v61 = vpop.eup %5624 }
0x4abf   :  { %v3436_v62 = vadd.f32 1.0, %v5625_v61 }
0x4ac1   :  { %5626 = vrcp.f32 %v3436_v62 }
0x4acb   :  { %v5627_v4 = vpop.eup %5626 }
0x4acc   :  { %v3443_v2 = vmul.f32 %v5627_v4, %v3441_v1 }
0x4b2f   :  { %v3446_v63 = vpop.permute.xlu0 %3445 }
0x4b30   :  { %v3448_v0 = vmul.f32 %v5627_v4, %v3446_v63 }
0x4b32   :  { %3450 = vrot.lane.b32.xlu1 %v3448_v0, %s5674_s4 }
0x4ba4   :  { %v3451_v5 = vpop.permute.xlu1 %3450 }
0x4ba5   :  { %v3453_v6 = vadd.f32 %v3451_v5, %v3443_v2 }
0x4ba7   :  { %5628 = vtanh.f32 %v3453_v6  ;;  %v3548_v31 = vrot.slane %v3453_v6, 6 }
0x4bb1   :  { %v5629_v16 = vpop.eup %5628 }
0x4bb2   :  { %3456 = vrot.lane.b32.xlu0 %v5629_v16, %s5673_s27 }
0x4c24   :  { %v3457_v12 = vpop.permute.xlu0 %3456 }
0x4c25   :  { %v6373_v9 = vmul.f32 %v5627_v4, %v3457_v12 }
0x4c27   :  { %v3461_v10 = vrot.slane %v6373_v9, 4 }
0x4c29   :  { %3462 = vrot.lane.b32.xlu1 %v3461_v10, %s5674_s4 }
0x4c9b   :  { %v3463_v11 = vpop.permute.xlu1 %3462 }
0x4c9c   :  { %4984 = vmatmul.mubr.msk.f32.vlgmr.msra.gmra.mrb[32].mxu0 %vm173_vm3, %v3463_v11 }
0x4c9d   :  { %5249 = vmatpush3.bf16.msra.mxu0 %v6298_v44  ;;  %5005 = vmatprep.mubr.msk.f32.mxu0 %vm5671_vm1, %v5672_v7 }
0x4c9e   :  { %5250 = vmatprep.subr.bf16.mxu0 %v5670_v3 }
0x4ca1   :  { %5252 = vmatpush3.bf16.msra.mxu0 %v6307_v8 }
0x4ca2   :  { %5259 = vmatprep.subr.bf16.mxu0 %v5670_v3 }
0x4d6f   :  { %v3532_v28 = vpop.f32.mrb[32].mxu0 }
0x4d70   :  { %v3537_v17 = vrot.slane %v3532_v28, 2  ;;  %v4985_v14 = vpop.f32.mrb[33].mxu0 }
0x4d72   :  { %v3539_v18 = vadd.f32 %v3537_v17, %v6335_v15 }
0x4d74   :  { %5630 = vtanh.f32 %v3539_v18  ;;  %v4407_v22 = vmul.f32 -1.442695, %v3539_v18 }
0x4d76   :  { %5632 = vpow2.f32 %v4407_v22 }
0x4d7e   :  { %v5631_v20 = vpop.eup %5630 }
0x4d7f   :  { %3552 = vrot.lane.b32.xlu0 %v5631_v20, %s5673_s27 }
0x4d80   :  { %v5633_v23 = vpop.eup %5632 }
0x4d81   :  { %v3543_v25 = vadd.f32 1.0, %v5633_v23 }
0x4d83   :  { %5634 = vrcp.f32 %v3543_v25 }
0x4d8d   :  { %v5635_v27 = vpop.eup %5634 }
0x4d8e   :  { %v3550_v32 = vmul.f32 %v5635_v27, %v3548_v31 }
0x4df1   :  { %v3553_v29 = vpop.permute.xlu0 %3552 }
0x4df2   :  { %v3555_v30 = vmul.f32 %v5635_v27, %v3553_v29 }
0x4df4   :  { %3557 = vrot.lane.b32.xlu1 %v3555_v30, %s5674_s4 }
0x4e66   :  { %v3558_v33 = vpop.permute.xlu1 %3557 }
0x4e67   :  { %v3560_v34 = vadd.f32 %v3558_v33, %v3550_v32 }
0x4e69   :  { %5636 = vtanh.f32 %v3560_v34  ;;  %v3652_v51 = vrot.slane %v3560_v34, 6 }
0x4e73   :  { %v5637_v15 = vpop.eup %5636 }
0x4e74   :  { %3563 = vrot.lane.b32.xlu0 %v5637_v15, %s5673_s27 }
0x4ee6   :  { %v3564_v35 = vpop.permute.xlu0 %3563 }
0x4ee7   :  { %v6390_v21 = vmul.f32 %v5635_v27, %v3564_v35 }
0x4ee9   :  { %v3568_v38 = vrot.slane %v6390_v21, 6 }
0x4eeb   :  { %3569 = vrot.lane.b32.xlu1 %v3568_v38, %s5674_s4 }
0x4f5d   :  { %v3570_v39 = vpop.permute.xlu1 %3569 }
0x4f5e   :  { %4995 = vmatmul.mubr.msk.f32.vlgmr.msra.gmra.mrb[34].mxu1 %vm173_vm3, %v3570_v39 }
0x4f5f   :  { %5255 = vmatpush3.bf16.msra.mxu1 %v6298_v44  ;;  %5016 = vmatprep.mubr.msk.f32.mxu1 %vm5671_vm1, %v5672_v7 }
0x4f60   :  { %5256 = vmatprep.subr.bf16.mxu1 %v5670_v3 }
0x4f63   :  { %5258 = vmatpush3.bf16.msra.mxu1 %v6307_v8 }
0x5031   :  { %v3639_v40 = vpop.f32.mrb[34].mxu1 }
0x5032   :  { %v3643_v26 = vadd.f32 %v3639_v40, %v6333_v13  ;;  %v4996_v41 = vpop.f32.mrb[35].mxu1 }
0x5034   :  { %5638 = vtanh.f32 %v3643_v26  ;;  %v4409_v43 = vmul.f32 -1.442695, %v3643_v26 }
0x5036   :  { %5640 = vpow2.f32 %v4409_v43 }
0x503e   :  { %v5639_v42 = vpop.eup %5638 }
0x503f   :  { %3656 = vrot.lane.b32.xlu0 %v5639_v42, %s5673_s27 }
0x5040   :  { %v5641_v45 = vpop.eup %5640 }
0x5041   :  { %v3647_v46 = vadd.f32 1.0, %v5641_v45 }
0x5043   :  { %5642 = vrcp.f32 %v3647_v46 }
0x504d   :  { %v5643_v47 = vpop.eup %5642 }
0x504e   :  { %v3654_v19 = vmul.f32 %v5643_v47, %v3652_v51 }
0x50b1   :  { %v3657_v48 = vpop.permute.xlu0 %3656 }
0x50b2   :  { %v3659_v49 = vmul.f32 %v5643_v47, %v3657_v48 }
0x50b4   :  { %3661 = vrot.lane.b32.xlu1 %v3659_v49, %s5674_s4 }
0x5126   :  { %v3662_v52 = vpop.permute.xlu1 %3661 }
0x5127   :  { %v3664_v53 = vadd.f32 %v3662_v52, %v3654_v19 }
0x5129   :  { %5644 = vtanh.f32 %v3664_v53 }
0x5133   :  { %v5645_v54 = vpop.eup %5644 }
0x5134   :  { %3667 = vrot.lane.b32.xlu0 %v5645_v54, %s5673_s27  ;;  %v4022_v54 = vld [vmem:[%s6868_s18 + $0x28] sm:$0xff] }
0x51a6   :  { %v3668_v37 = vpop.permute.xlu0 %3667 }
0x51a7   :  { %v3670_v57 = vmul.f32 %v5643_v47, %v3668_v37  ;;  %v4020_v37 = vld [vmem:[%s6868_s18 + $0x18] sm:$0xff] }
0x51a9   :  { %3672 = vrot.lane.b32.xlu1 %v3670_v57, %s5674_s4 }
0x521b   :  { %v6407_v58 = vpop.permute.xlu1 %3672 }
0x521c   :  { %5006 = vmatmul.mubr.msk.f32.vlgmr.msra.gmra.mrb[34].mxu0 %vm173_vm3, %v6407_v58 }
0x521d   :  { %5261 = vmatpush3.bf16.msra.mxu0 %v6298_v44  ;;  %5027 = vmatprep.mubr.msk.f32.mxu0 %vm5671_vm1, %v5672_v7 }
0x521e   :  { %5262 = vmatprep.subr.bf16.mxu0 %v5670_v3  ;;  %v3758_v3 = vrot.slane %v3664_v53, 6 }
0x5221   :  { %5264 = vmatpush3.bf16.msra.mxu0 %v6307_v8 }
0x52ef   :  { %v3742_v24 = vpop.f32.mrb[34].mxu0 }
0x52f0   :  { %v3747_v59 = vrot.slane %v3742_v24, 6  ;;  %v5007_v60 = vpop.f32.mrb[35].mxu0  ;;  %v4021_v24 = vld [vmem:[%s6868_s18 + $0x20] sm:$0xff] }
0x52f2   :  { %v3749_v50 = vadd.f32 %v3747_v59, %v6333_v13  ;;  %v5329_v59 = vpack.c.bf16 %v4024_v55, %v4020_v37  ;;  %v4058_v55 = vld [vmem:[%s6868_s18 + $0x148] sm:$0xff] }
0x52f4   :  { %5646 = vtanh.f32 %v3749_v50  ;;  %v4411_v62 = vmul.f32 -1.442695, %v3749_v50  ;;  %v4019_v50 = vld [vmem:[%s6868_s18 + $0x10] sm:$0xff]  ;;  %5330 = vmatprep.subr.bf16.mxu0 %v5329_v59  ;;  %v4064_v59 = vld [vmem:[%s6868_s18 + $0x178] sm:$0xff] }
0x52f6   :  { %5648 = vpow2.f32 %v4411_v62  ;;  %v4026_v62 = vld [vmem:[%s6868_s18 + $0x48] sm:$0xff] }
0x52fe   :  { %v5647_v61 = vpop.eup %5646 }
0x52ff   :  { %3762 = vrot.lane.b32.xlu0 %v5647_v61, %s5673_s27  ;;  %v4023_v61 = vld [vmem:[%s6868_s18 + $0x30] sm:$0xff] }
0x5300   :  { %v5649_v4 = vpop.eup %5648 }
0x5301   :  { %v3753_v44 = vadd.f32 1.0, %v5649_v4  ;;  %v5331_v4 = vpack.c.bf16 %v4023_v61, %v4019_v50 }
0x5303   :  { %5650 = vrcp.f32 %v3753_v44  ;;  %v4030_v44 = vld [vmem:[%s6868_s18 + $0x68] sm:$0xff] }
0x530d   :  { %v5651_v63 = vpop.eup %5650 }
0x530e   :  { %v3760_v8 = vmul.f32 %v5651_v63, %v3758_v3 }
0x5371   :  { %v3763_v7 = vpop.permute.xlu0 %3762 }
0x5372   :  { %v3765_v0 = vmul.f32 %v5651_v63, %v3763_v7  ;;  %v4032_v7 = vld [vmem:[%s6868_s18 + $0x78] sm:$0xff] }
0x5374   :  { %3767 = vrot.lane.b32.xlu1 %v3765_v0, %s5674_s4  ;;  %v5269_v0 = vpack.c.bf16 %v4030_v44, %v4026_v62  ;;  %v4057_v62 = vld [vmem:[%s6868_s18 + $0x140] sm:$0xff]  ;;  %v4059_v44 = vld [vmem:[%s6868_s18 + $0x150] sm:$0xff] }
0x53e6   :  { %v3768_v1 = vpop.permute.xlu1 %3767 }
0x53e7   :  { %v3770_v2 = vadd.f32 %v3768_v1, %v3760_v8  ;;  %v4025_v8 = vld [vmem:[%s6868_s18 + $0x40] sm:$0xff] }
0x53e8   :  { %v4029_v1 = vld [vmem:[%s6868_s18 + $0x60] sm:$0xff] }
0x53e9   :  { %5652 = vtanh.f32 %v3770_v2  ;;  %v3865_v31 = vrot.slane %v3770_v2, 6  ;;  %v4027_v2 = vld [vmem:[%s6868_s18 + $0x50] sm:$0xff] }
0x53f3   :  { %v5653_v5 = vpop.eup %5652 }
0x53f4   :  { %3773 = vrot.lane.b32.xlu0 %v5653_v5, %s5673_s27  ;;  %v5271_v5 = vpack.c.bf16 %v4029_v1, %v4025_v8  ;;  %v4068_v8 = vld [vmem:[%s6868_s18 + $0x198] sm:$0xff] }
0x53f5   :  { %v4072_v1 = vld [vmem:[%s6868_s18 + $0x1b8] sm:$0xff] }
0x5466   :  { %v3774_v6 = vpop.permute.xlu0 %3773 }
0x5467   :  { %v3776_v16 = vmul.f32 %v5651_v63, %v3774_v6  ;;  %v4028_v63 = vld [vmem:[%s6868_s18 + $0x58] sm:$0xff]  ;;  %v4031_v6 = vld [vmem:[%s6868_s18 + $0x70] sm:$0xff] }
0x5468   :  { %v5333_v3 = vpack.c.bf16 %v4032_v7, %v4028_v63  ;;  %v4063_v7 = vld [vmem:[%s6868_s18 + $0x170] sm:$0xff] }
0x5469   :  { %v3778_v12 = vrot.slane %v3776_v16, 2  ;;  %v4034_v16 = vld [vmem:[%s6868_s18 + $0x88] sm:$0xff] }
0x546b   :  { %3779 = vrot.lane.b32.xlu1 %v3778_v12, %s5674_s4  ;;  %v5402_v53 = vpack.i.bf16 %v3354_v56, %v3778_v12  ;;  %v4017_v56 = vld [vmem:[%s6868_s18] sm:$0xff]  ;;  %v4038_v12 = vld [vmem:[%s6868_s18 + $0xa8] sm:$0xff] }
0x546c   :  { %v5267_v60 = vpack.c.bf16 %v4021_v24, %v4017_v56  ;;  %v4062_v56 = vld [vmem:[%s6868_s18 + $0x168] sm:$0xff]  ;;  %v4060_v24 = vld [vmem:[%s6868_s18 + $0x158] sm:$0xff] }
0x546d   :  { %v5285_v61 = vpack.c.bf16 %v4062_v56, %v4058_v55  ;;  %v5349_v63 = vpack.c.bf16 %v4064_v59, %v4060_v24  ;;  %v4089_v56 = vld [vmem:[%s6868_s18 + $0x240] sm:$0xff]  ;;  %v4091_v59 = vld [vmem:[%s6868_s18 + $0x250] sm:$0xff] }
0x546e   :  { %v4093_v24 = vld [vmem:[%s6868_s18 + $0x260] sm:$0xff] }
0x54dd   :  { %v3780_v11 = vpop.permute.xlu1 %3779 }
0x54de   :  { %5017 = vmatmul.mubr.msk.f32.vlgmr.msra.gmra.mrb[36].mxu1 %vm173_vm3, %v3780_v11  ;;  %v5335_v11 = vpack.c.bf16 %v4031_v6, %v4027_v2 }
0x55b1   :  { %v3849_v28 = vpop.f32.mrb[36].mxu1 }
0x55b2   :  { %v3854_v17 = vrot.slane %v3849_v28, 4  ;;  %v5018_v14 = vpop.f32.mrb[37].mxu1  ;;  %v5273_v28 = vpack.c.bf16 %v4038_v12, %v4034_v16  ;;  %v4065_v16 = vld [vmem:[%s6868_s18 + $0x180] sm:$0xff] }
0x55b3   :  { %v4040_v14 = vld [vmem:[%s6868_s18 + $0xb8] sm:$0xff]  ;;  %v4069_v12 = vld [vmem:[%s6868_s18 + $0x1a0] sm:$0xff] }
0x55b4   :  { %v3856_v18 = vadd.f32 %v3854_v17, %v6333_v13  ;;  %v4036_v17 = vld [vmem:[%s6868_s18 + $0x98] sm:$0xff] }
0x55b6   :  { %5654 = vtanh.f32 %v3856_v18  ;;  %v4413_v22 = vmul.f32 -1.442695, %v3856_v18  ;;  %v4033_v18 = vld [vmem:[%s6868_s18 + $0x80] sm:$0xff] }
0x55b8   :  { %5656 = vpow2.f32 %v4413_v22  ;;  %v4037_v22 = vld [vmem:[%s6868_s18 + $0xa0] sm:$0xff] }
0x55c0   :  { %v5655_v20 = vpop.eup %5654 }
0x55c1   :  { %3869 = vrot.lane.b32.xlu0 %v5655_v20, %s5673_s27  ;;  %v5337_v20 = vpack.c.bf16 %v4040_v14, %v4036_v17  ;;  %v4071_v17 = vld [vmem:[%s6868_s18 + $0x1b0] sm:$0xff]  ;;  %v4074_v14 = vld [vmem:[%s6868_s18 + $0x1c8] sm:$0xff] }
0x55c2   :  { %v5657_v23 = vpop.eup %5656 }
0x55c3   :  { %v3860_v25 = vadd.f32 1.0, %v5657_v23  ;;  %v4035_v23 = vld [vmem:[%s6868_s18 + $0x90] sm:$0xff] }
0x55c5   :  { %5658 = vrcp.f32 %v3860_v25  ;;  %v4039_v25 = vld [vmem:[%s6868_s18 + $0xb0] sm:$0xff] }
0x55cf   :  { %v5659_v27 = vpop.eup %5658 }
0x55d0   :  { %v3867_v32 = vmul.f32 %v5659_v27, %v3865_v31  ;;  %v4044_v31 = vld [vmem:[%s6868_s18 + $0xd8] sm:$0xff] }
0x5633   :  { %v3870_v29 = vpop.permute.xlu0 %3869 }
0x5634   :  { %v3872_v30 = vmul.f32 %v5659_v27, %v3870_v29  ;;  %v4042_v29 = vld [vmem:[%s6868_s18 + $0xc8] sm:$0xff] }
0x5636   :  { %3874 = vrot.lane.b32.xlu1 %v3872_v30, %s5674_s4  ;;  %v4046_v30 = vld [vmem:[%s6868_s18 + $0xe8] sm:$0xff] }
0x56a8   :  { %v3875_v33 = vpop.permute.xlu1 %3874 }
0x56a9   :  { %v6425_v34 = vadd.f32 %v3875_v33, %v3867_v32  ;;  %v5339_v32 = vpack.c.bf16 %v4039_v25, %v4035_v23  ;;  %v5277_v33 = vpack.c.bf16 %v4046_v30, %v4042_v29  ;;  %v5291_v23 = vpack.c.bf16 %v4069_v12, %v4065_v16  ;;  %v4073_v29 = vld [vmem:[%s6868_s18 + $0x1c0] sm:$0xff]  ;;  %v4110_v16 = vld [vmem:[%s6868_s18 + $0x2e8] sm:$0xff]  ;;  %v4108_v12 = vld [vmem:[%s6868_s18 + $0x2d8] sm:$0xff] }
0x56aa   :  { %v4077_v30 = vld [vmem:[%s6868_s18 + $0x1e0] sm:$0xff] }
0x56ab   :  { %5660 = vtanh.f32 %v6425_v34 }
0x56b5   :  { %v5661_v15 = vpop.eup %5660 }
0x56b6   :  { %3880 = vrot.lane.b32.xlu0 %v5661_v15, %s5673_s27  ;;  %v4048_v15 = vld [vmem:[%s6868_s18 + $0xf8] sm:$0xff] }
0x5728   :  { %v3881_v35 = vpop.permute.xlu0 %3880 }
0x5729   :  { %v6429_v39 = vmul.f32 %v5659_v27, %v3881_v35  ;;  %v5275_v27 = vpack.c.bf16 %v4037_v22, %v4033_v18  ;;  %v4041_v35 = vld [vmem:[%s6868_s18 + $0xc0] sm:$0xff]  ;;  %v4078_v18 = vld [vmem:[%s6868_s18 + $0x1e8] sm:$0xff]  ;;  %v4080_v22 = vld [vmem:[%s6868_s18 + $0x1f8] sm:$0xff] }
0x572b   :  { %v3885_v40 = vrot.slane %v6429_v39, 4 }
0x572d   :  { %3886 = vrot.lane.b32.xlu1 %v3885_v40, %s5674_s4 }
0x579f   :  { %v3887_v26 = vpop.permute.xlu1 %3886 }
0x57a0   :  { %5028 = vmatmul.mubr.msk.f32.vlgmr.msra.gmra.mrb[36].mxu0 %vm173_vm3, %v3887_v26  ;;  %v4045_v26 = vld [vmem:[%s6868_s18 + $0xe0] sm:$0xff] }
0x57a1   :  { %5332 = vmatpush1.bf16.msra.mxu0 %v5331_v4  ;;  %v4061_v4 = vld [vmem:[%s6868_s18 + $0x160] sm:$0xff] }
0x57a2   :  { %5334 = vmatprep.subr.bf16.mxu0 %v5333_v3  ;;  %v4070_v3 = vld [vmem:[%s6868_s18 + $0x1a8] sm:$0xff]  ;;  %v5287_v2 = vpack.c.bf16 %v4061_v4, %v4057_v62  ;;  %v4100_v4 = vld [vmem:[%s6868_s18 + $0x298] sm:$0xff] }
0x57a3   :  { %v4102_v62 = vld [vmem:[%s6868_s18 + $0x2a8] sm:$0xff] }
0x57a5   :  { %5336 = vmatpush1.bf16.msra.mxu0 %v5335_v11  ;;  %v4067_v11 = vld [vmem:[%s6868_s18 + $0x190] sm:$0xff] }
0x57a6   :  { %5338 = vmatprep.subr.bf16.mxu0 %v5337_v20  ;;  %v4076_v20 = vld [vmem:[%s6868_s18 + $0x1d8] sm:$0xff]  ;;  %v5355_v25 = vpack.c.bf16 %v4071_v17, %v4067_v11 }
0x57a7   :  { %v4112_v11 = vld [vmem:[%s6868_s18 + $0x2f8] sm:$0xff] }
0x57a9   :  { %5340 = vmatpush1.bf16.msra.mxu0 %v5339_v32  ;;  %v5357_v32 = vpack.c.bf16 %v4080_v22, %v4076_v20  ;;  %v4109_v20 = vld [vmem:[%s6868_s18 + $0x2e0] sm:$0xff]  ;;  %v4107_v22 = vld [vmem:[%s6868_s18 + $0x2d0] sm:$0xff] }
0x5873   :  { %v3956_v41 = vpop.f32.mrb[36].mxu0 }
0x5874   :  { %v3961_v42 = vrot.slane %v3956_v41, 2  ;;  %v5029_v43 = vpop.f32.mrb[37].mxu0  ;;  %v5341_v41 = vpack.c.bf16 %v4048_v15, %v4044_v31  ;;  %v4075_v31 = vld [vmem:[%s6868_s18 + $0x1d0] sm:$0xff]  ;;  %v4082_v15 = vld [vmem:[%s6868_s18 + $0x208] sm:$0xff] }
0x5875   :  { %v4047_v43 = vld [vmem:[%s6868_s18 + $0xf0] sm:$0xff] }
0x5876   :  { %v3963_v45 = vadd.f32 %v3961_v42, %v6333_v13  ;;  %v4018_v13 = vld [vmem:[%s6868_s18 + $0x8] sm:$0xff]  ;;  %v4043_v42 = vld [vmem:[%s6868_s18 + $0xd0] sm:$0xff]  ;;  %5342 = vmatprep.subr.bf16.mxu0 %v5341_v41  ;;  %v4088_v41 = vld [vmem:[%s6868_s18 + $0x238] sm:$0xff] }
0x5877   :  { %v5265_v57 = vpack.c.bf16 %v4022_v54, %v4018_v13  ;;  %v4053_v13 = vld [vmem:[%s6868_s18 + $0x120] sm:$0xff]  ;;  %v4051_v54 = vld [vmem:[%s6868_s18 + $0x110] sm:$0xff] }
0x5878   :  { %5662 = vtanh.f32 %v3963_v45  ;;  %v4415_v47 = vmul.f32 -1.442695, %v3963_v45  ;;  %v4050_v45 = vld [vmem:[%s6868_s18 + $0x108] sm:$0xff] }
0x5879   :  { %5266 = vmatprep.subr.bf16.mxu1 %v5265_v57  ;;  %v4055_v57 = vld [vmem:[%s6868_s18 + $0x130] sm:$0xff] }
0x587a   :  { %5664 = vpow2.f32 %v4415_v47  ;;  %5268 = vmatpush1.bf16.msra.mxu1 %v5267_v60  ;;  %v4052_v47 = vld [vmem:[%s6868_s18 + $0x118] sm:$0xff]  ;;  %v5347_v50 = vpack.c.bf16 %v4055_v57, %v4051_v54 }
0x587b   :  { %5270 = vmatprep.subr.bf16.mxu1 %v5269_v0  ;;  %v4066_v0 = vld [vmem:[%s6868_s18 + $0x188] sm:$0xff]  ;;  %v4096_v54 = vld [vmem:[%s6868_s18 + $0x278] sm:$0xff] }
0x587c   :  { %v5289_v6 = vpack.c.bf16 %v4070_v3, %v4066_v0  ;;  %v4097_v3 = vld [vmem:[%s6868_s18 + $0x280] sm:$0xff] }
0x587e   :  { %5272 = vmatpush1.bf16.msra.mxu1 %v5271_v5  ;;  %v5351_v5 = vpack.c.bf16 %v4063_v7, %v4059_v44  ;;  %v4104_v44 = vld [vmem:[%s6868_s18 + $0x2b8] sm:$0xff] }
0x587f   :  { %5274 = vmatprep.subr.bf16.mxu1 %v5273_v28  ;;  %v5353_v28 = vpack.c.bf16 %v4072_v1, %v4068_v8  ;;  %v4101_v8 = vld [vmem:[%s6868_s18 + $0x2a0] sm:$0xff]  ;;  %v4099_v1 = vld [vmem:[%s6868_s18 + $0x290] sm:$0xff] }
0x5882   :  { %v5663_v46 = vpop.eup %5662  ;;  %5276 = vmatpush1.bf16.msra.mxu1 %v5275_v27  ;;  %v5293_v27 = vpack.c.bf16 %v4078_v18, %v4074_v14  ;;  %v4105_v18 = vld [vmem:[%s6868_s18 + $0x2c0] sm:$0xff] }
0x5883   :  { %3976 = vrot.lane.b32.xlu0 %v5663_v46, %s5673_s27  ;;  %v4054_v46 = vld [vmem:[%s6868_s18 + $0x128] sm:$0xff]  ;;  %5278 = vmatprep.subr.bf16.mxu1 %v5277_v33  ;;  %v4079_v33 = vld [vmem:[%s6868_s18 + $0x1f0] sm:$0xff] }
0x5884   :  { %v5665_v48 = vpop.eup %5664 }
0x5885   :  { %v3967_v49 = vadd.f32 1.0, %v5665_v48  ;;  %v4056_v48 = vld [vmem:[%s6868_s18 + $0x138] sm:$0xff] }
0x5886   :  { %v5345_v37 = vpack.c.bf16 %v4056_v48, %v4052_v47  ;;  %v4085_v47 = vld [vmem:[%s6868_s18 + $0x220] sm:$0xff]  ;;  %v4083_v48 = vld [vmem:[%s6868_s18 + $0x210] sm:$0xff] }
0x5887   :  { %5666 = vrcp.f32 %v3967_v49  ;;  %v5279_v49 = vpack.c.bf16 %v4045_v26, %v4041_v35  ;;  %v4086_v35 = vld [vmem:[%s6868_s18 + $0x228] sm:$0xff]  ;;  %v4084_v26 = vld [vmem:[%s6868_s18 + $0x218] sm:$0xff] }
0x5889   :  { %5280 = vmatpush1.bf16.msra.mxu1 %v5279_v49  ;;  %v5361_v49 = vpack.c.bf16 %v4088_v41, %v4084_v26  ;;  %v4117_v26 = vld [vmem:[%s6868_s18 + $0x320] sm:$0xff]  ;;  %v4115_v41 = vld [vmem:[%s6868_s18 + $0x310] sm:$0xff] }
0x5891   :  { %v6438_v51 = vpop.eup %5666 }
0x58f5   :  { %v3977_v19 = vpop.permute.xlu0 %3976 }
0x58f6   :  { %v3979_v52 = vmul.f32 %v6438_v51, %v3977_v19  ;;  %v5343_v19 = vpack.c.bf16 %v4047_v43, %v4043_v42  ;;  %v5295_v42 = vpack.c.bf16 %v4077_v30, %v4073_v29  ;;  %v5359_v43 = vpack.c.bf16 %v4079_v33, %v4075_v31  ;;  %v4118_v29 = vld [vmem:[%s6868_s18 + $0x328] sm:$0xff]  ;;  %v4116_v30 = vld [vmem:[%s6868_s18 + $0x318] sm:$0xff] }
0x58f7   :  { %v4120_v31 = vld [vmem:[%s6868_s18 + $0x338] sm:$0xff] }
0x58f8   :  { %3981 = vrot.lane.b32.xlu1 %v3979_v52, %s5674_s4  ;;  %v5281_v52 = vpack.c.bf16 %v4054_v46, %v4050_v45  ;;  %5344 = vmatpush1.bf16.msra.mxu0 %v5343_v19  ;;  %v5297_v45 = vpack.c.bf16 %v4086_v35, %v4082_v15  ;;  %v4081_v46 = vld [vmem:[%s6868_s18 + $0x200] sm:$0xff]  ;;  %v4087_v19 = vld [vmem:[%s6868_s18 + $0x230] sm:$0xff] }
0x58f9   :  { %5346 = vmatprep.subr.bf16.mxu0 %v5345_v37  ;;  %v5299_v37 = vpack.c.bf16 %v4085_v47, %v4081_v46  ;;  %v5363_v57 = vpack.c.bf16 %v4087_v19, %v4083_v48  ;;  %v4113_v35 = vld [vmem:[%s6868_s18 + $0x300] sm:$0xff]  ;;  %v4126_v46 = vld [vmem:[%s6868_s18 + $0x368] sm:$0xff]  ;;  %v4124_v47 = vld [vmem:[%s6868_s18 + $0x358] sm:$0xff] }
0x58fa   :  { %5282 = vmatprep.subr.bf16.mxu1 %v5281_v52  ;;  %v4090_v52 = vld [vmem:[%s6868_s18 + $0x248] sm:$0xff]  ;;  %v4128_v48 = vld [vmem:[%s6868_s18 + $0x378] sm:$0xff] }
0x58fc   :  { %5403 = vrot.lane.b32.xlu1 %v5402_v53, %s5673_s27  ;;  %v4049_v53 = vld [vmem:[%s6868_s18 + $0x100] sm:$0xff]  ;;  %5348 = vmatpush1.bf16.msra.mxu0 %v5347_v50  ;;  %v4095_v50 = vld [vmem:[%s6868_s18 + $0x270] sm:$0xff] }
0x58fd   :  { %v5283_v60 = vpack.c.bf16 %v4053_v13, %v4049_v53  ;;  %5350 = vmatprep.subr.bf16.mxu0 %v5349_v63  ;;  %v4094_v53 = vld [vmem:[%s6868_s18 + $0x268] sm:$0xff]  ;;  %v4092_v13 = vld [vmem:[%s6868_s18 + $0x258] sm:$0xff]  ;;  %v5303_v63 = vpack.c.bf16 %v4093_v24, %v4089_v56  ;;  %v5367_v7 = vpack.c.bf16 %v4095_v50, %v4091_v59  ;;  %v3972_v24 = vrot.slane %v6425_v34, 6 }
0x58fe   :  { %v5301_v55 = vpack.c.bf16 %v4094_v53, %v4090_v52  ;;  %v4121_v53 = vld [vmem:[%s6868_s18 + $0x340] sm:$0xff]  ;;  %v4134_v50 = vld [vmem:[%s6868_s18 + $0x3a8] sm:$0xff]  ;;  %v4136_v34 = vld [vmem:[%s6868_s18 + $0x3b8] sm:$0xff] }
0x58ff   :  { %5284 = vmatpush1.bf16.msra.mxu1 %v5283_v60  ;;  %v5365_v60 = vpack.c.bf16 %v4096_v54, %v4092_v13  ;;  %v4125_v13 = vld [vmem:[%s6868_s18 + $0x360] sm:$0xff]  ;;  %v5381_v54 = vpack.c.bf16 %v4128_v48, %v4124_v47  ;;  %v3974_v59 = vmul.f32 %v6438_v51, %v3972_v24  ;;  %v5678_v48 = vmov 1983009808  }
0x5900   :  { %5286 = vmatprep.subr.bf16.mxu1 %v5285_v61  ;;  %5352 = vmatpush1.bf16.msra.mxu0 %v5351_v5  ;;  %v4098_v61 = vld [vmem:[%s6868_s18 + $0x288] sm:$0xff]  ;;  %v4103_v5 = vld [vmem:[%s6868_s18 + $0x2b0] sm:$0xff] }
0x5901   :  { %5354 = vmatprep.subr.bf16.mxu0 %v5353_v28  ;;  %v5305_v0 = vpack.c.bf16 %v4102_v62, %v4098_v61  ;;  %v5307_v28 = vpack.c.bf16 %v4101_v8, %v4097_v3  ;;  %v5371_v17 = vpack.c.bf16 %v4103_v5, %v4099_v1  ;;  %v4132_v61 = vld [vmem:[%s6868_s18 + $0x398] sm:$0xff]  ;;  %v4131_v8 = vld [vmem:[%s6868_s18 + $0x390] sm:$0xff]  ;;  %v4138_v5 = vld [vmem:[%s6868_s18 + $0x3c8] sm:$0xff] }
0x5902   :  { %v4135_v1 = vld [vmem:[%s6868_s18 + $0x3b0] sm:$0xff] }
0x5903   :  { %5288 = vmatpush1.bf16.msra.mxu1 %v5287_v2  ;;  %v5369_v2 = vpack.c.bf16 %v4104_v44, %v4100_v4  ;;  %v4129_v44 = vld [vmem:[%s6868_s18 + $0x380] sm:$0xff] }
0x5904   :  { %5290 = vmatprep.subr.bf16.mxu1 %v5289_v6  ;;  %5356 = vmatpush1.bf16.msra.mxu0 %v5355_v25  ;;  %v4106_v6 = vld [vmem:[%s6868_s18 + $0x2c8] sm:$0xff]  ;;  %v4111_v25 = vld [vmem:[%s6868_s18 + $0x2f0] sm:$0xff] }
0x5905   :  { %5358 = vmatprep.subr.bf16.mxu0 %v5357_v32  ;;  %v5309_v14 = vpack.c.bf16 %v4110_v16, %v4106_v6  ;;  %v5311_v32 = vpack.c.bf16 %v4109_v20, %v4105_v18  ;;  %v5375_v33 = vpack.c.bf16 %v4111_v25, %v4107_v22  ;;  %v4142_v6 = vld [vmem:[%s6868_s18 + $0x3e8] sm:$0xff]  ;;  %v4140_v16 = vld [vmem:[%s6868_s18 + $0x3d8] sm:$0xff]  ;;  %v4139_v20 = vld [vmem:[%s6868_s18 + $0x3d0] sm:$0xff] }
0x5906   :  { %v4143_v22 = vld [vmem:[%s6868_s18 + $0x3f0] sm:$0xff] }
0x5907   :  { %5292 = vmatpush1.bf16.msra.mxu1 %v5291_v23  ;;  %v5373_v23 = vpack.c.bf16 %v4112_v11, %v4108_v12  ;;  %v5325_v12 = vpack.c.bf16 %v4142_v6, %v4138_v5  ;;  %v4144_v11 = vld [vmem:[%s6868_s18 + $0x3f8] sm:$0xff] }
0x5908   :  { %5294 = vmatprep.subr.bf16.mxu1 %v5293_v27  ;;  %5360 = vmatpush1.bf16.msra.mxu0 %v5359_v43  ;;  %v4114_v27 = vld [vmem:[%s6868_s18 + $0x308] sm:$0xff]  ;;  %v4119_v43 = vld [vmem:[%s6868_s18 + $0x330] sm:$0xff] }
0x5909   :  { %5362 = vmatprep.subr.bf16.mxu0 %v5361_v49  ;;  %v5313_v15 = vpack.c.bf16 %v4118_v29, %v4114_v27  ;;  %v5315_v49 = vpack.c.bf16 %v4117_v26, %v4113_v35  ;;  %v5379_v19 = vpack.c.bf16 %v4119_v43, %v4115_v41  ;;  %v5407_v27 = vpack.i.bf16 %v3461_v10, %v3885_v40 }
0x590b   :  { %5296 = vmatpush1.bf16.msra.mxu1 %v5295_v42  ;;  %v5377_v42 = vpack.c.bf16 %v4120_v31, %v4116_v30 }
0x590c   :  { %5298 = vmatprep.subr.bf16.mxu1 %v5297_v45  ;;  %5364 = vmatpush1.bf16.msra.mxu0 %v5363_v57  ;;  %v4122_v45 = vld [vmem:[%s6868_s18 + $0x348] sm:$0xff]  ;;  %v4127_v57 = vld [vmem:[%s6868_s18 + $0x370] sm:$0xff] }
0x590d   :  { %5366 = vmatprep.subr.bf16.mxu0 %v5365_v60  ;;  %v5317_v52 = vpack.c.bf16 %v4126_v46, %v4122_v45  ;;  %v4130_v60 = vld [vmem:[%s6868_s18 + $0x388] sm:$0xff] }
0x590e   :  { %v5321_v4 = vpack.c.bf16 %v4134_v50, %v4130_v60 }
0x590f   :  { %5300 = vmatpush1.bf16.msra.mxu1 %v5299_v37  ;;  %v4123_v37 = vld [vmem:[%s6868_s18 + $0x350] sm:$0xff] }
0x5910   :  { %5302 = vmatprep.subr.bf16.mxu1 %v5301_v55  ;;  %5368 = vmatpush1.bf16.msra.mxu0 %v5367_v7  ;;  %v5319_v55 = vpack.c.bf16 %v4125_v13, %v4121_v53  ;;  %v5383_v56 = vpack.c.bf16 %v4127_v57, %v4123_v37 }
0x5911   :  { %5370 = vmatprep.subr.bf16.mxu0 %v5369_v2  ;;  %v5387_v2 = vpack.c.bf16 %v4135_v1, %v4131_v8 }
0x5913   :  { %5304 = vmatpush1.bf16.msra.mxu1 %v5303_v63  ;;  %v4133_v63 = vld [vmem:[%s6868_s18 + $0x3a0] sm:$0xff] }
0x5914   :  { %5306 = vmatprep.subr.bf16.mxu1 %v5305_v0  ;;  %5372 = vmatpush1.bf16.msra.mxu0 %v5371_v17  ;;  %v5385_v0 = vpack.c.bf16 %v4136_v34, %v4132_v61  ;;  %v5323_v3 = vpack.c.bf16 %v4133_v63, %v4129_v44  ;;  %v4141_v17 = vld [vmem:[%s6868_s18 + $0x3e0] sm:$0xff] }
0x5915   :  { %5374 = vmatprep.subr.bf16.mxu0 %v5373_v23  ;;  %v5391_v23 = vpack.c.bf16 %v4143_v22, %v4139_v20 }
0x5917   :  { %5308 = vmatpush1.bf16.msra.mxu1 %v5307_v28  ;;  %v4137_v28 = vld [vmem:[%s6868_s18 + $0x3c0] sm:$0xff] }
0x5918   :  { %5310 = vmatprep.subr.bf16.mxu1 %v5309_v14  ;;  %5376 = vmatpush1.bf16.msra.mxu0 %v5375_v33  ;;  %v5389_v14 = vpack.c.bf16 %v4144_v11, %v4140_v16  ;;  %v5327_v18 = vpack.c.bf16 %v4141_v17, %v4137_v28 }
0x5919   :  { %5378 = vmatprep.subr.bf16.mxu0 %v5377_v42 }
0x591b   :  { %5312 = vmatpush1.bf16.msra.mxu1 %v5311_v32 }
0x591c   :  { %5314 = vmatprep.subr.bf16.mxu1 %v5313_v15  ;;  %5380 = vmatpush1.bf16.msra.mxu0 %v5379_v19 }
0x591d   :  { %5382 = vmatprep.subr.bf16.mxu0 %v5381_v54 }
0x591f   :  { %5316 = vmatpush1.bf16.msra.mxu1 %v5315_v49  ;;  %v4316_v49 = vunpack.c.l.s4 %v5678_v48 }
0x5920   :  { %5318 = vmatprep.subr.bf16.mxu1 %v5317_v52  ;;  %5384 = vmatpush1.bf16.msra.mxu0 %v5383_v56 }
0x5921   :  { %5386 = vmatprep.subr.bf16.mxu0 %v5385_v0 }
0x5923   :  { %5320 = vmatpush1.bf16.msra.mxu1 %v5319_v55 }
0x5924   :  { %5322 = vmatprep.subr.bf16.mxu1 %v5321_v4  ;;  %5388 = vmatpush1.bf16.msra.mxu0 %v5387_v2 }
0x5925   :  { %5390 = vmatprep.subr.bf16.mxu0 %v5389_v14 }
0x5927   :  { %5324 = vmatpush1.bf16.msra.mxu1 %v5323_v3 }
0x5928   :  { %5326 = vmatprep.subr.bf16.mxu1 %v5325_v12  ;;  %5392 = vmatpush1.bf16.msra.mxu0 %v5391_v23 }
0x592b   :  { %5328 = vmatpush1.bf16.msra.mxu1 %v5327_v18 }
0x596a   :  { %v3982_v62 = vpop.permute.xlu1 %3981 }
0x596b   :  { %v3984_v7 = vadd.f32 %v3982_v62, %v3974_v59 }
0x596d   :  { %5668 = vtanh.f32 %v3984_v7 }
0x596e   :  { %v5404_v29 = vpop.permute.xlu1 %5403 }
0x596f   :  { %v5406_v31 = vunpack.i.h.bf16 %v5404_v29  ;;  %v5405_v32 = vunpack.i.l.bf16 %v5404_v29 }
0x5971   :  { %v4009_v41 = vsel %vm173_vm3, %v6342_v36, %v5406_v31  ;;  %v4014_v9 = vsel %vm173_vm3, %v6407_v58, %v5405_v32  ;;  %v4145_v36 = vld [vmem:[%s6869_s19] sm:$0xf] }
0x5977   :  { %v5669_v25 = vpop.eup %5668 }
0x5978   :  { %3987 = vrot.lane.b32.xlu0 %v5669_v25, %s5673_s27 }
0x597c   :  { %5408 = vrot.lane.b32.xlu0 %v5407_v27, %s5677_s26 }
0x59ea   :  { %v3988_v30 = vpop.permute.xlu0 %3987 }
0x59eb   :  { %v3990_v33 = vmul.f32 %v6438_v51, %v3988_v30  ;;  %v4147_v51 = vlaneseq }
0x59ed   :  { %v4007_v10 = vrot.slane %v3990_v33, 6  ;;  %v4148_v45 = vshrl.u32 %v4147_v51, 7 }
0x59ee   :  { %v5409_v15 = vpop.permute.xlu0 %5408 }
0x59ef   :  { %v5411_v35 = vunpack.i.h.bf16 %v5409_v15  ;;  %v5410_v26 = vunpack.i.l.bf16 %v5409_v15  ;;  %v4149_v46 = vsub.s32 0, %v4148_v45  ;;  %v4157_v47 = vsub.s32 2, %v4148_v45 }
0x59f0   :  { %v4153_v58 = vsub.s32 1, %v4148_v45  ;;  %v4161_v19 = vsub.s32 3, %v4148_v45 }
0x59f1   :  { %v4011_v39 = vsel %vm4010_vm8, %v4009_v41, %v5411_v35  ;;  %v4015_v40 = vsel %vm4010_vm8, %v4014_v9, %v5410_v26  ;;  %v4150_v52 = vrot.slane %v4145_v36, %v4149_v46  ;;  %v4158_v53 = vrot.slane %v4145_v36, %v4157_v47 }
0x59f2   :  { %v4016_v42 = vsel %vm4012_vm9, %v4015_v40, %v4007_v10  ;;  %v4013_v43 = vsel %vm4012_vm9, %v4011_v39, %v3568_v38  ;;  %v4154_v21 = vrot.slane %v4145_v36, %v4153_v58  ;;  %v4317_v38 = vunpack.c.0.s8 %v4316_v49 }
0x59f3   :  { %4231 = vmatprep.mubr.f32.mxu1 %v4016_v42  ;;  %4302 = vmatprep.mubr.f32.mxu0 %v4016_v42  ;;  %v4162_v13 = vrot.slane %v4145_v36, %v4161_v19 }
0x59f4   :  { %4232 = vmatmul.mubr.f32.vlgmr.msra.gmra.mrb[38].mxu1 %v4013_v43  ;;  %4303 = vmatmul.mubr.f32.vlgmr.msra.gmra.mrb[38].mxu0 %v4013_v43  ;;  %v4320_v60 = vsub.s32 %v4317_v38, %v4148_v45 }
0x5ac7   :  { %v4233_v54 = vpop.f32.mrb[38].mxu1  ;;  %v4304_v37 = vpop.f32.mrb[38].mxu0 }
0x5ac8   :  { %v4234_v57 = vadd.f32 %v4233_v54, %v4150_v52  ;;  %v4305_v55 = vadd.f32 %v4304_v37, %v4158_v53  ;;  %v4235_v56 = vpop.f32.mrb[39].mxu1  ;;  %v4306_v24 = vpop.f32.mrb[39].mxu0 }
0x5ac9   :  { %v4236_v59 = vadd.f32 %v4235_v56, %v4154_v21  ;;  %v4307_v50 = vadd.f32 %v4306_v24, %v4162_v13 }
0x5acb   :  { %v4313_v61 = vcombine.low %v4234_v57, %v4236_v59  ;;  %v4314_v62 = vcombine.low %v4305_v55, %v4307_v50 }
0x5acd   :  { %v4321_v4 = vrot.slane %v4313_v61, %v4320_v60  ;;  %v4328_v34 = vrot.slane %v4314_v62, %v4320_v60 }
0x5acf   :  { %v4329_v44 = vcombine.low %v4321_v4, %v4328_v34 }
0x5ad1   :  { %4331 = vst [vmem:[%s6870_s21] sm:$0xff] %v4329_v44 }

</bundles_post_ra>
